<compile_context>
chip_gen: v6e
topology: v6e:2x2x1
jax: 0.10.0
libtpu: 0.0.40
codegen_flags: <defaults>
</compile_context>

<pallas_src>
import math

import jax
import jax.numpy as jnp
from jax.experimental import pallas as pl
from jax.experimental.pallas import tpu as pltpu

# ----------------------------- small synthetic hparams ----------------------------
HIDDEN = 32            # hparams['hidden_size']
ENC_LAYERS = 2         # hparams['enc_layers']
NUM_HEADS = 2          # hparams['num_heads']
FFN_KERNEL = 9         # hparams['enc_ffn_kernel_size'], padding='SAME', act='gelu'
FFN_FILTER = 4 * HIDDEN
DUR_CHANS = 48         # dur_prediction_args['hidden_size']
DUR_LAYERS = 2         # dur_prediction_args['num_layers']
DUR_KERNEL = 3         # dur_prediction_args['kernel_size']
DUR_LOG_OFFSET = 1.0   # dur_prediction_args['log_offset'], loss_type='mse'
VOCAB = 20
LN_EPS = 1e-5
POS_MAX_LEN = 5000

# Packed small-parameter array layout (one DMA stream for all tiny vectors).
PACK_W = 128                               # >= max(HIDDEN, FFN_FILTER, DUR_CHANS)
ROWS_PER_LAYER = 6                         # ln1_g, ln1_b, ln2_g, ln2_b, ffn2_b, conv_b
ROW_FIN = ENC_LAYERS * ROWS_PER_LAYER      # 12: final-LN g/b then duration-predictor rows
SMALL_ROWS_PAD = 24                        # 22 used rows, padded to a multiple of 8 sublanes


# ----------------------------- in-kernel helpers ----------------------------------
def _layer_norm(x, g, b, eps=LN_EPS):
    mu = jnp.mean(x, axis=-1, keepdims=True)
    var = jnp.mean(jnp.square(x - mu), axis=-1, keepdims=True)
    return (x - mu) * jax.lax.rsqrt(var + eps) * g + b


def _conv1d_same_im2col(h, w2d, b, K):
    """SAME 1-D conv via im2col + one matmul (bf16 operands, f32 accumulate).

    h:   (T, Cin) f32
    w2d: (K*Cin, Cout) bf16   -- row index is tap*Cin + cin
    b:   (1, Cout) f32
    """
    T, Cin = h.shape
    pad = (K - 1) // 2
    hc = h.astype(w2d.dtype)
    zpad = jnp.zeros((pad, Cin), w2d.dtype)
    hp = jnp.concatenate([zpad, hc, zpad], axis=0)                         # (T+K-1, Cin)
    cols = jnp.concatenate([hp[j:j + T, :] for j in range(K)], axis=-1)    # (T, K*Cin)
    return jnp.dot(cols, w2d, preferred_element_type=jnp.float32) + b


# ----------------------------- fused Pallas kernel ---------------------------------
def _fused_kernel(x_ref, midi_ref, npc_ref, npr_ref, small_ref,
                  wqkv_ref, wo_ref, convw_ref, ffn2w_ref, c0w_ref, c1w_ref,
                  enc_out_ref, dur_out_ref):
    H = HIDDEN
    F = FFN_FILTER
    C = DUR_CHANS
    dh = H // NUM_HEADS

    x = x_ref[0]                 # (T, H)  already embedded / pos-encoded / masked
    nonpad = npc_ref[0]          # (T, 1)  1.0 where not padding
    npr = npr_ref[0]             # (1, T)  row form of the mask
    # NOTE: additive -1e9 (not -inf) key mask: fully-padded query rows get a uniform softmax
    # instead of NaN and are zeroed by the nonpad multiply right after.  Do not "fix" to -inf.
    kbias = (npr - 1.0) * 1e9

    sw = small_ref[...]          # (24, 128) — every tiny parameter vector, one DMA stream

    def vec(r, w):
        return sw[r:r + 1, 0:w]  # (1, w) static slice of the packed array

    # ---------------- FFT encoder layers (pre-LN, bias-free attention) ----------------
    for l in range(ENC_LAYERS):
        base = l * ROWS_PER_LAYER

        # --- self-attention sub-layer (q-scaling already folded into Wq) ---
        residual = x
        h = _layer_norm(x, vec(base + 0, H), vec(base + 1, H))
        qkv = jnp.dot(h.astype(jnp.bfloat16), wqkv_ref[l],
                      preferred_element_type=jnp.float32)                 # (T, 3H) f32
        q = qkv[:, 0:H]
        k = qkv[:, H:2 * H]
        v = qkv[:, 2 * H:3 * H]
        heads = []
        for hd in range(NUM_HEADS):          # static, unrolled (NUM_HEADS == 2)
            lo, hi = hd * dh, (hd + 1) * dh
            s = jax.lax.dot_general(q[:, lo:hi].astype(jnp.bfloat16),
                                    k[:, lo:hi].astype(jnp.bfloat16),
                                    (((1,), (1,)), ((), ())),
                                    preferred_element_type=jnp.float32)   # (T, T) f32
            s = s + kbias
            m = jnp.max(s, axis=-1, keepdims=True)
            e = jnp.exp(s - m)                                            # EUP
            # divide -> EUP reciprocal + VPU multiply (frees the VALU slot)
            p = e * pl.reciprocal(jnp.sum(e, axis=-1, keepdims=True), approx=True)
            heads.append(jnp.dot(p.astype(jnp.bfloat16),
                                 v[:, lo:hi].astype(jnp.bfloat16),
                                 preferred_element_type=jnp.float32))
        ctx = jnp.concatenate(heads, axis=-1)                             # (T, H)
        attn = jnp.dot(ctx.astype(jnp.bfloat16), wo_ref[l],
                       preferred_element_type=jnp.float32)
        x = (residual + attn) * nonpad

        # --- conv-FFN sub-layer (kernel_size**-0.5 folded into conv weight/bias) ---
        residual = x
        h = _layer_norm(x, vec(base + 2, H), vec(base + 3, H))
        acc = _conv1d_same_im2col(h, convw_ref[l], vec(base + 5, F), FFN_KERNEL)
        acc = jax.nn.gelu(acc, approximate=True)       # tanh GELU (EUP); ref uses erf form
        y = jnp.dot(acc.astype(jnp.bfloat16), ffn2w_ref[l],
                    preferred_element_type=jnp.float32) + vec(base + 4, H)
        x = (residual + y) * nonpad

    # ---------------- final LayerNorm ----------------
    fb = ROW_FIN
    enc = _layer_norm(x, vec(fb + 0, H), vec(fb + 1, H)) * nonpad
    enc_out_ref[0] = enc

    # ---------------- duration predictor ----------------
    h = enc + midi_ref[0]        # dur_cond = encoder_out + midi_embed (fused, no HBM trip)

    # conv block 0: conv -> ReLU -> LN(channels) -> mask
    h = _conv1d_same_im2col(h, c0w_ref[...], vec(fb + 2, C), DUR_KERNEL)
    h = jnp.maximum(h, 0.0)
    h = _layer_norm(h, vec(fb + 3, C), vec(fb + 4, C)) * nonpad
    # conv block 1
    h = _conv1d_same_im2col(h, c1w_ref[...], vec(fb + 5, C), DUR_KERNEL)
    h = jnp.maximum(h, 0.0)
    h = _layer_norm(h, vec(fb + 6, C), vec(fb + 7, C)) * nonpad

    # final linear computed lane-dense: (1, C) x (T, C)^T -> (1, T)
    y_row = jax.lax.dot_general(vec(fb + 8, C), h, (((1,), (1,)), ((), ())),
                                preferred_element_type=jnp.float32) + vec(fb + 9, 1)
    y_row = y_row * npr
    dur = jnp.exp(y_row) - DUR_LOG_OFFSET       # mse loss type -> log domain
    dur_out_ref[0] = jnp.maximum(dur, 0.0)      # infer clamp(min=0)


# ----------------------------- pallas_call wrapper ----------------------------------
def _b_spec(shape):
    rest = tuple(shape[1:])
    n = len(rest)
    return pl.BlockSpec((1,) + rest, lambda b, _n=n: (b,) + (0,) * _n)


def _w_spec(shape):
    shp = tuple(shape)
    n = len(shp)
    return pl.BlockSpec(shp, lambda b, _n=n: (0,) * _n)


def _cost_estimate(B, T, in_bytes):
    H, F, C = HIDDEN, FFN_FILTER, DUR_CHANS
    per_layer = (2 * T * H * 3 * H                       # fused QKV projection
                 + 2 * 2 * T * T * H                     # QK^T + PV over all heads
                 + 2 * T * H * H                         # output projection
                 + 2 * T * FFN_KERNEL * H * F            # im2col FFN conv
                 + 2 * T * F * H)                        # FFN linear
    dur_flops = (2 * T * DUR_KERNEL * H * C
                 + 2 * T * DUR_KERNEL * C * C
                 + 2 * T * C)
    flops = B * (ENC_LAYERS * per_layer + dur_flops)
    transcendentals = B * (ENC_LAYERS * (NUM_HEADS * T * T + T * F) + T)
    out_bytes = B * (T * H + T) * 4
    return pl.CostEstimate(flops=flops, transcendentals=transcendentals,
                           bytes_accessed=in_bytes + out_bytes)


def fused_forward_call(x, midi_embed, nonpad_col, nonpad_row, fw):
    B, T, H = x.shape
    inputs = [x, midi_embed, nonpad_col, nonpad_row, fw['small'],
              fw['wqkv'], fw['wo'], fw['conv_w'], fw['ffn2_w'], fw['c0_w'], fw['c1_w']]
    in_specs = ([_b_spec(a.shape) for a in inputs[:4]]
                + [_w_spec(a.shape) for a in inputs[4:]])
    out_shape = (jax.ShapeDtypeStruct((B, T, H), jnp.float32),
                 jax.ShapeDtypeStruct((B, 1, T), jnp.float32))
    out_specs = (_b_spec((B, T, H)), _b_spec((B, 1, T)))
    in_bytes = sum(int(a.size) * a.dtype.itemsize for a in inputs)
    return pl.pallas_call(
        _fused_kernel,
        grid=(B,),
        in_specs=in_specs,
        out_specs=out_specs,
        out_shape=out_shape,
        compiler_params=pltpu.CompilerParams(
            dimension_semantics=("parallel",),
            vmem_limit_bytes=32 * 1024 * 1024),   # raise further on 128-MiB parts at large T
        cost_estimate=_cost_estimate(B, T, in_bytes),
    )(*inputs)


# ----------------------------- host-side weight preparation --------------------------
def prepare_fused_weights(params):
    """Fold constant scalings into weights, pack all tiny vectors into one array, cast big
    matmul weights to bf16.  Plain-JAX, runs once per parameter set (host-side)."""
    enc, fin, dur = params['enc'], params['final_ln'], params['dur']
    H, F, C, L = HIDDEN, FFN_FILTER, DUR_CHANS, ENC_LAYERS
    dh = H // NUM_HEADS

    # Fold q-scaling into the Q columns of the fused QKV matrix (attention is bias-free).
    wqkv = enc['wqkv'].at[:, :, :H].multiply(dh ** -0.5)
    # Fold FFN kernel_size**-0.5 into conv weight AND bias (reference scales after biased conv).
    conv_w = enc['conv_w'] * FFN_KERNEL ** -0.5
    conv_b = enc['conv_b'] * FFN_KERNEL ** -0.5

    small = jnp.zeros((SMALL_ROWS_PAD, PACK_W), jnp.float32)

    def put(arr, r, v):
        v = jnp.reshape(v, (-1,)).astype(jnp.float32)
        return arr.at[r, :v.shape[0]].set(v)

    for l in range(L):
        base = l * ROWS_PER_LAYER
        small = put(small, base + 0, enc['ln1_g'][l])
        small = put(small, base + 1, enc['ln1_b'][l])
        small = put(small, base + 2, enc['ln2_g'][l])
        small = put(small, base + 3, enc['ln2_b'][l])
        small = put(small, base + 4, enc['ffn2_b'][l])
        small = put(small, base + 5, conv_b[l])
    fb = ROW_FIN
    small = put(small, fb + 0, fin['g'])
    small = put(small, fb + 1, fin['b'])
    small = put(small, fb + 2, dur['c0_b'])
    small = put(small, fb + 3, dur['ln0_g'])
    small = put(small, fb + 4, dur['ln0_b'])
    small = put(small, fb + 5, dur['c1_b'])
    small = put(small, fb + 6, dur['ln1_g'])
    small = put(small, fb + 7, dur['ln1_b'])
    small = put(small, fb + 8, dur['lin_w'])
    small = put(small, fb + 9, dur['lin_b'])

    bf = jnp.bfloat16
    return {
        'small': small,
        'wqkv': wqkv.astype(bf),
        'wo': enc['wo'].astype(bf),
        'conv_w': conv_w.astype(bf),
        'ffn2_w': enc['ffn2_w'].astype(bf),
        'c0_w': dur['c0_w'].astype(bf),
        'c1_w': dur['c1_w'].astype(bf),
    }


# ----------------------------- plain-JAX glue ---------------------------------------
def rel_positional_encoding(T, d_model, max_len=POS_MAX_LEN):
    # RelPositionalEncoding(reverse=True): table built once for max_len, prefix of length T.
    position = jnp.arange(max_len - 1, -1, -1.0, dtype=jnp.float32)[:, None]
    div_term = jnp.exp(jnp.arange(0, d_model, 2, dtype=jnp.float32)
                       * -(math.log(10000.0) / d_model))
    pe = jnp.zeros((max_len, d_model), jnp.float32)
    pe = pe.at[:, 0::2].set(jnp.sin(position * div_term))
    pe = pe.at[:, 1::2].set(jnp.cos(position * div_term))
    return pe[:T]


def fastspeech2_variance_forward(params, txt_tokens, midi, ph2word, word_dur):
    """Inference forward. Returns (encoder_out [B,T,H], ph_dur_pred [B,T])."""
    B, T = txt_tokens.shape
    H = HIDDEN

    # --- embeddings / word-duration conditioning (glue: gathers & elementwise) ---
    txt_embed = params['txt_embed'][txt_tokens]                        # padding row 0 is zero
    onset = jnp.diff(ph2word, axis=1,
                     prepend=jnp.zeros((B, 1), ph2word.dtype)) > 0
    onset_embed = params['onset_embed'][onset.astype(jnp.int32)]
    wd_pad = jnp.pad(word_dur, ((0, 0), (1, 0)))                       # F.pad(..., [1,0])
    wd = jnp.take_along_axis(wd_pad, ph2word, axis=1).astype(jnp.float32)
    word_dur_embed = (wd[:, :, None] * params['word_dur_w'][None, None, :]
                      + params['word_dur_b'][None, None, :])           # Linear(1, H)
    dur_embed = onset_embed + word_dur_embed

    padding = (txt_tokens == 0)
    nonpad_col = (~padding).astype(jnp.float32)[:, :, None]            # (B, T, 1)
    nonpad_row = (~padding).astype(jnp.float32)[:, None, :]            # (B, 1, T)

    # forward_embedding (matches reference): x = embed_scale*txt_embed + dur_embed, then
    # RelPositionalEncoding applies x = x*xscale + pe with embed_scale == xscale == sqrt(H),
    # so txt_embed is scaled twice and dur_embed once — intentional, per the reference code.
    embed_scale = math.sqrt(H)
    x = embed_scale * txt_embed + dur_embed
    x = x * embed_scale + rel_positional_encoding(T, H)[None]
    x = x * nonpad_col

    midi_embed = params['midi_embed'][midi]

    # --- fused encoder + duration predictor (single Pallas kernel) ---
    fw = prepare_fused_weights(params)
    encoder_out, dur3 = fused_forward_call(x, midi_embed, nonpad_col, nonpad_row, fw)
    return encoder_out, dur3[:, 0, :]


def init_params(key):
    keys = iter(jax.random.split(key, 64))

    def nrm(shape, scale):
        return jax.random.normal(next(keys), shape, jnp.float32) * scale

    H, F, C, L = HIDDEN, FFN_FILTER, DUR_CHANS, ENC_LAYERS
    K, DK = FFN_KERNEL, DUR_KERNEL

    p = {
        'txt_embed': nrm((VOCAB, H), H ** -0.5).at[0].set(0.0),   # padding_idx = 0
        'onset_embed': nrm((2, H), H ** -0.5),
        'midi_embed': nrm((128, H), H ** -0.5),
        'word_dur_w': nrm((H,), 1.0),
        'word_dur_b': nrm((H,), 0.1),
    }
    # Encoder layer weights, stacked along a leading layer axis. QKV in-projections are
    # merged into one (H, 3H) matrix; conv weights are stored in im2col layout
    # [(tap, cin) flattened, cout] (== torch weight[co, ci, j] at row j*Cin+ci).
    p['enc'] = {
        'ln1_g': jnp.ones((L, 1, H), jnp.float32), 'ln1_b': jnp.zeros((L, 1, H), jnp.float32),
        'wqkv': nrm((L, H, 3 * H), H ** -0.5),
        'wo': nrm((L, H, H), H ** -0.5),
        'ln2_g': jnp.ones((L, 1, H), jnp.float32), 'ln2_b': jnp.zeros((L, 1, H), jnp.float32),
        'conv_w': nrm((L, K * H, F), (H * K) ** -0.5),
        'conv_b': jnp.zeros((L, 1, F), jnp.float32),
        'ffn2_w': nrm((L, F, H), F ** -0.5),
        'ffn2_b': jnp.zeros((L, 1, H), jnp.float32),
    }
    p['final_ln'] = {'g': jnp.ones((1, H), jnp.float32), 'b': jnp.zeros((1, H), jnp.float32)}
    p['dur'] = {
        'c0_w': nrm((DK * H, C), (H * DK) ** -0.5),
        'c0_b': jnp.zeros((1, C), jnp.float32),
        'ln0_g': jnp.ones((1, C), jnp.float32), 'ln0_b': jnp.zeros((1, C), jnp.float32),
        'c1_w': nrm((DK * C, C), (C * DK) ** -0.5),
        'c1_b': jnp.zeros((1, C), jnp.float32),
        'ln1_g': jnp.ones((1, C), jnp.float32), 'ln1_b': jnp.zeros((1, C), jnp.float32),
        'lin_w': nrm((1, C), C ** -0.5),          # row form -> lane-dense (1, T) output
        'lin_b': jnp.zeros((1, 1), jnp.float32),
    }
    return p


if __name__ == "__main__":
    params = init_params(jax.random.PRNGKey(0))

    B, T = 2, 16
    txt_tokens = jnp.array([
        [3, 4, 5, 6, 7, 8, 9, 10, 2, 3, 4, 5, 0, 0, 0, 0],
        [6, 7, 2, 3, 9, 11, 12, 13, 4, 5, 6, 7, 8, 9, 0, 0],
    ], dtype=jnp.int32)
    ph2word = jnp.array([
        [1, 1, 2, 2, 2, 3, 3, 4, 4, 5, 5, 6, 0, 0, 0, 0],
        [1, 2, 2, 3, 3, 3, 4, 4, 5, 5, 5, 5, 6, 6, 0, 0],
    ], dtype=jnp.int32)
    midi = jnp.array([
        [60, 60, 62, 62, 62, 64, 64, 65, 65, 67, 67, 69, 0, 0, 0, 0],
        [57, 59, 59, 60, 60, 60, 62, 62, 64, 64, 64, 64, 65, 65, 0, 0],
    ], dtype=jnp.int32)
    word_dur = jnp.array([
        [0.30, 0.45, 0.25, 0.40, 0.35, 0.50],
        [0.20, 0.55, 0.30, 0.45, 0.60, 0.25],
    ], dtype=jnp.float32)

    encoder_out, ph_dur_pred = fastspeech2_variance_forward(
        params, txt_tokens, midi, ph2word, word_dur)
    jax.block_until_ready((encoder_out, ph_dur_pred))

    assert encoder_out.shape == (B, T, HIDDEN)
    assert ph_dur_pred.shape == (B, T)
    assert bool(jnp.all(jnp.isfinite(encoder_out)))
    assert bool(jnp.all(jnp.isfinite(ph_dur_pred)))
    print("KERNEL_OK")
</pallas_src>

<mosaic_0001>
module attributes {stable_mosaic.version = 11 : i64} {
  func.func @_fused_kernel(%arg0: i32, %arg1: memref<1x16x32xf32, #tpu.memory_space<vmem>>, %arg2: memref<1x16x32xf32, #tpu.memory_space<vmem>>, %arg3: memref<1x16x1xf32, #tpu.memory_space<vmem>>, %arg4: memref<1x1x16xf32, #tpu.memory_space<vmem>>, %arg5: memref<24x128xf32, #tpu.memory_space<vmem>>, %arg6: memref<2x32x96xbf16, #tpu.memory_space<vmem>>, %arg7: memref<2x32x32xbf16, #tpu.memory_space<vmem>>, %arg8: memref<2x288x128xbf16, #tpu.memory_space<vmem>>, %arg9: memref<2x128x32xbf16, #tpu.memory_space<vmem>>, %arg10: memref<96x48xbf16, #tpu.memory_space<vmem>>, %arg11: memref<144x48xbf16, #tpu.memory_space<vmem>>, %arg12: memref<1x16x32xf32, #tpu.memory_space<vmem>>, %arg13: memref<1x1x16xf32, #tpu.memory_space<vmem>>) attributes {dimension_semantics = [#tpu.dimension_semantics<parallel>], iteration_bounds = array<i64: 2>, scalar_prefetch = 0 : i64, scratch_operands = 0 : i64, tpu.core_type = #tpu.core_type<tc>, window_params = [{transform_indices = @transform_0, window_bounds = array<i64: 1, 16, 32>}, {transform_indices = @transform_1, window_bounds = array<i64: 1, 16, 32>}, {transform_indices = @transform_2, window_bounds = array<i64: 1, 16, 1>}, {transform_indices = @transform_3, window_bounds = array<i64: 1, 1, 16>}, {pipeline_mode = #tpu.pipeline_mode<synchronous>, transform_indices = @transform_4, window_bounds = array<i64: 24, 128>}, {pipeline_mode = #tpu.pipeline_mode<synchronous>, transform_indices = @transform_5, window_bounds = array<i64: 2, 32, 96>}, {pipeline_mode = #tpu.pipeline_mode<synchronous>, transform_indices = @transform_6, window_bounds = array<i64: 2, 32, 32>}, {pipeline_mode = #tpu.pipeline_mode<synchronous>, transform_indices = @transform_7, window_bounds = array<i64: 2, 288, 128>}, {pipeline_mode = #tpu.pipeline_mode<synchronous>, transform_indices = @transform_8, window_bounds = array<i64: 2, 128, 32>}, {pipeline_mode = #tpu.pipeline_mode<synchronous>, transform_indices = @transform_9, window_bounds = array<i64: 96, 48>}, {pipeline_mode = #tpu.pipeline_mode<synchronous>, transform_indices = @transform_10, window_bounds = array<i64: 144, 48>}, {transform_indices = @transform_11, window_bounds = array<i64: 1, 16, 32>}, {transform_indices = @transform_12, window_bounds = array<i64: 1, 1, 16>}]} {
    %c0 = arith.constant 0 : index
    %c0_0 = arith.constant 0 : index
    %c0_1 = arith.constant 0 : index
    %0 = vector.load %arg1[%c0, %c0_0, %c0_1] : memref<1x16x32xf32, #tpu.memory_space<vmem>>, vector<1x16x32xf32>
    %1 = vector.shape_cast %0 : vector<1x16x32xf32> to vector<16x32xf32>
    %c0_2 = arith.constant 0 : index
    %c0_3 = arith.constant 0 : index
    %c0_4 = arith.constant 0 : index
    %2 = vector.load %arg3[%c0_2, %c0_3, %c0_4] : memref<1x16x1xf32, #tpu.memory_space<vmem>>, vector<1x16x1xf32>
    %3 = vector.shape_cast %2 : vector<1x16x1xf32> to vector<16x1xf32>
    %c0_5 = arith.constant 0 : index
    %c0_6 = arith.constant 0 : index
    %c0_7 = arith.constant 0 : index
    %4 = vector.load %arg4[%c0_5, %c0_6, %c0_7] : memref<1x1x16xf32, #tpu.memory_space<vmem>>, vector<1x1x16xf32>
    %5 = vector.shape_cast %4 : vector<1x1x16xf32> to vector<1x16xf32>
    %cst = arith.constant 1.000000e+00 : f32
    %6 = vector.broadcast %cst : f32 to vector<1x16xf32>
    %7 = arith.subf %5, %6 : vector<1x16xf32>
    %cst_8 = arith.constant 1.000000e+09 : f32
    %8 = vector.broadcast %cst_8 : f32 to vector<1x16xf32>
    %9 = arith.mulf %7, %8 : vector<1x16xf32>
    %c0_9 = arith.constant 0 : index
    %c0_10 = arith.constant 0 : index
    %10 = vector.load %arg5[%c0_9, %c0_10] : memref<24x128xf32, #tpu.memory_space<vmem>>, vector<24x128xf32>
    %11 = vector.extract_strided_slice %10 {offsets = [0, 0], sizes = [1, 32], strides = [1, 1]} : vector<24x128xf32> to vector<1x32xf32>
    %12 = vector.extract_strided_slice %10 {offsets = [1, 0], sizes = [1, 32], strides = [1, 1]} : vector<24x128xf32> to vector<1x32xf32>
    %cst_11 = arith.constant dense<0.000000e+00> : vector<16xf32>
    %13 = vector.multi_reduction <add>, %1, %cst_11 [1] : vector<16x32xf32> to vector<16xf32>
    %14 = vector.shape_cast %13 : vector<16xf32> to vector<16x1xf32>
    %cst_12 = arith.constant 3.200000e+01 : f32
    %15 = vector.broadcast %cst_12 : f32 to vector<16x1xf32>
    %16 = arith.divf %14, %15 : vector<16x1xf32>
    %17 = vector.broadcast %16 : vector<16x1xf32> to vector<16x32xf32>
    %18 = arith.subf %1, %17 : vector<16x32xf32>
    %19 = arith.mulf %18, %18 : vector<16x32xf32>
    %cst_13 = arith.constant dense<0.000000e+00> : vector<16xf32>
    %20 = vector.multi_reduction <add>, %19, %cst_13 [1] : vector<16x32xf32> to vector<16xf32>
    %21 = vector.shape_cast %20 : vector<16xf32> to vector<16x1xf32>
    %cst_14 = arith.constant 3.200000e+01 : f32
    %22 = vector.broadcast %cst_14 : f32 to vector<16x1xf32>
    %23 = arith.divf %21, %22 : vector<16x1xf32>
    %24 = vector.broadcast %16 : vector<16x1xf32> to vector<16x32xf32>
    %25 = arith.subf %1, %24 : vector<16x32xf32>
    %cst_15 = arith.constant 9.99999974E-6 : f32
    %26 = vector.broadcast %cst_15 : f32 to vector<16x1xf32>
    %27 = arith.addf %23, %26 : vector<16x1xf32>
    %28 = math.rsqrt %27 : vector<16x1xf32>
    %29 = vector.broadcast %28 : vector<16x1xf32> to vector<16x32xf32>
    %30 = arith.mulf %25, %29 : vector<16x32xf32>
    %31 = vector.broadcast %11 : vector<1x32xf32> to vector<16x32xf32>
    %32 = arith.mulf %30, %31 : vector<16x32xf32>
    %33 = vector.broadcast %12 : vector<1x32xf32> to vector<16x32xf32>
    %34 = arith.addf %32, %33 : vector<16x32xf32>
    %35 = arith.truncf %34 : vector<16x32xf32> to vector<16x32xbf16>
    %c0_16 = arith.constant 0 : index
    %c0_17 = arith.constant 0 : index
    %c0_18 = arith.constant 0 : index
    %36 = vector.load %arg6[%c0_16, %c0_17, %c0_18] : memref<2x32x96xbf16, #tpu.memory_space<vmem>>, vector<1x32x96xbf16>
    %37 = vector.shape_cast %36 : vector<1x32x96xbf16> to vector<32x96xbf16>
    %cst_19 = arith.constant dense<0.000000e+00> : vector<16x96xf32>
    %38 = tpu.matmul %35, %37, %cst_19 {dimension_numbers = #tpu.dot_dimension_numbers<[1], [0], [0], [1], [0, 0, 1, 1], [], []>} : vector<16x32xbf16>, vector<32x96xbf16>, vector<16x96xf32> -> vector<16x96xf32>
    %39 = vector.extract_strided_slice %38 {offsets = [0, 0], sizes = [16, 32], strides = [1, 1]} : vector<16x96xf32> to vector<16x32xf32>
    %40 = vector.extract_strided_slice %38 {offsets = [0, 32], sizes = [16, 32], strides = [1, 1]} : vector<16x96xf32> to vector<16x32xf32>
    %41 = vector.extract_strided_slice %38 {offsets = [0, 64], sizes = [16, 32], strides = [1, 1]} : vector<16x96xf32> to vector<16x32xf32>
    %42 = vector.extract_strided_slice %39 {offsets = [0, 0], sizes = [16, 16], strides = [1, 1]} : vector<16x32xf32> to vector<16x16xf32>
    %43 = arith.truncf %42 : vector<16x16xf32> to vector<16x16xbf16>
    %44 = vector.extract_strided_slice %40 {offsets = [0, 0], sizes = [16, 16], strides = [1, 1]} : vector<16x32xf32> to vector<16x16xf32>
    %45 = arith.truncf %44 : vector<16x16xf32> to vector<16x16xbf16>
    %cst_20 = arith.constant dense<0.000000e+00> : vector<16x16xf32>
    %46 = tpu.matmul %43, %45, %cst_20 {dimension_numbers = #tpu.dot_dimension_numbers<[1], [1], [0], [0], [0, 0, 1, 0], [], []>} : vector<16x16xbf16>, vector<16x16xbf16>, vector<16x16xf32> -> vector<16x16xf32>
    %47 = vector.broadcast %9 : vector<1x16xf32> to vector<16x16xf32>
    %48 = arith.addf %46, %47 : vector<16x16xf32>
    %cst_21 = arith.constant dense<0xFF800000> : vector<16xf32>
    %49 = vector.multi_reduction <maximumf>, %48, %cst_21 [1] : vector<16x16xf32> to vector<16xf32>
    %50 = vector.shape_cast %49 : vector<16xf32> to vector<16x1xf32>
    %51 = vector.broadcast %50 : vector<16x1xf32> to vector<16x16xf32>
    %52 = arith.subf %48, %51 : vector<16x16xf32>
    %53 = math.exp %52 : vector<16x16xf32>
    %cst_22 = arith.constant dense<0.000000e+00> : vector<16xf32>
    %54 = vector.multi_reduction <add>, %53, %cst_22 [1] : vector<16x16xf32> to vector<16xf32>
    %55 = vector.shape_cast %54 : vector<16xf32> to vector<16x1xf32>
    %56 = tpu.reciprocal %55 {approx = true} : vector<16x1xf32> -> vector<16x1xf32>
    %57 = vector.broadcast %56 : vector<16x1xf32> to vector<16x16xf32>
    %58 = arith.mulf %53, %57 : vector<16x16xf32>
    %59 = arith.truncf %58 : vector<16x16xf32> to vector<16x16xbf16>
    %60 = vector.extract_strided_slice %41 {offsets = [0, 0], sizes = [16, 16], strides = [1, 1]} : vector<16x32xf32> to vector<16x16xf32>
    %61 = arith.truncf %60 : vector<16x16xf32> to vector<16x16xbf16>
    %cst_23 = arith.constant dense<0.000000e+00> : vector<16x16xf32>
    %62 = tpu.matmul %59, %61, %cst_23 {dimension_numbers = #tpu.dot_dimension_numbers<[1], [0], [0], [1], [0, 0, 1, 1], [], []>} : vector<16x16xbf16>, vector<16x16xbf16>, vector<16x16xf32> -> vector<16x16xf32>
    %63 = vector.extract_strided_slice %39 {offsets = [0, 16], sizes = [16, 16], strides = [1, 1]} : vector<16x32xf32> to vector<16x16xf32>
    %64 = arith.truncf %63 : vector<16x16xf32> to vector<16x16xbf16>
    %65 = vector.extract_strided_slice %40 {offsets = [0, 16], sizes = [16, 16], strides = [1, 1]} : vector<16x32xf32> to vector<16x16xf32>
    %66 = arith.truncf %65 : vector<16x16xf32> to vector<16x16xbf16>
    %cst_24 = arith.constant dense<0.000000e+00> : vector<16x16xf32>
    %67 = tpu.matmul %64, %66, %cst_24 {dimension_numbers = #tpu.dot_dimension_numbers<[1], [1], [0], [0], [0, 0, 1, 0], [], []>} : vector<16x16xbf16>, vector<16x16xbf16>, vector<16x16xf32> -> vector<16x16xf32>
    %68 = vector.broadcast %9 : vector<1x16xf32> to vector<16x16xf32>
    %69 = arith.addf %67, %68 : vector<16x16xf32>
    %cst_25 = arith.constant dense<0xFF800000> : vector<16xf32>
    %70 = vector.multi_reduction <maximumf>, %69, %cst_25 [1] : vector<16x16xf32> to vector<16xf32>
    %71 = vector.shape_cast %70 : vector<16xf32> to vector<16x1xf32>
    %72 = vector.broadcast %71 : vector<16x1xf32> to vector<16x16xf32>
    %73 = arith.subf %69, %72 : vector<16x16xf32>
    %74 = math.exp %73 : vector<16x16xf32>
    %cst_26 = arith.constant dense<0.000000e+00> : vector<16xf32>
    %75 = vector.multi_reduction <add>, %74, %cst_26 [1] : vector<16x16xf32> to vector<16xf32>
    %76 = vector.shape_cast %75 : vector<16xf32> to vector<16x1xf32>
    %77 = tpu.reciprocal %76 {approx = true} : vector<16x1xf32> -> vector<16x1xf32>
    %78 = vector.broadcast %77 : vector<16x1xf32> to vector<16x16xf32>
    %79 = arith.mulf %74, %78 : vector<16x16xf32>
    %80 = arith.truncf %79 : vector<16x16xf32> to vector<16x16xbf16>
    %81 = vector.extract_strided_slice %41 {offsets = [0, 16], sizes = [16, 16], strides = [1, 1]} : vector<16x32xf32> to vector<16x16xf32>
    %82 = arith.truncf %81 : vector<16x16xf32> to vector<16x16xbf16>
    %cst_27 = arith.constant dense<0.000000e+00> : vector<16x16xf32>
    %83 = tpu.matmul %80, %82, %cst_27 {dimension_numbers = #tpu.dot_dimension_numbers<[1], [0], [0], [1], [0, 0, 1, 1], [], []>} : vector<16x16xbf16>, vector<16x16xbf16>, vector<16x16xf32> -> vector<16x16xf32>
    %84 = tpu.concatenate %62, %83 in 1 : vector<16x16xf32>, vector<16x16xf32> -> vector<16x32xf32>
    %85 = arith.truncf %84 : vector<16x32xf32> to vector<16x32xbf16>
    %c0_28 = arith.constant 0 : index
    %c0_29 = arith.constant 0 : index
    %c0_30 = arith.constant 0 : index
    %86 = vector.load %arg7[%c0_28, %c0_29, %c0_30] : memref<2x32x32xbf16, #tpu.memory_space<vmem>>, vector<1x32x32xbf16>
    %87 = vector.shape_cast %86 : vector<1x32x32xbf16> to vector<32x32xbf16>
    %cst_31 = arith.constant dense<0.000000e+00> : vector<16x32xf32>
    %88 = tpu.matmul %85, %87, %cst_31 {dimension_numbers = #tpu.dot_dimension_numbers<[1], [0], [0], [1], [0, 0, 1, 1], [], []>} : vector<16x32xbf16>, vector<32x32xbf16>, vector<16x32xf32> -> vector<16x32xf32>
    %89 = arith.addf %1, %88 : vector<16x32xf32>
    %90 = vector.broadcast %3 : vector<16x1xf32> to vector<16x32xf32>
    %91 = arith.mulf %89, %90 : vector<16x32xf32>
    %92 = vector.extract_strided_slice %10 {offsets = [2, 0], sizes = [1, 32], strides = [1, 1]} : vector<24x128xf32> to vector<1x32xf32>
    %93 = vector.extract_strided_slice %10 {offsets = [3, 0], sizes = [1, 32], strides = [1, 1]} : vector<24x128xf32> to vector<1x32xf32>
    %cst_32 = arith.constant dense<0.000000e+00> : vector<16xf32>
    %94 = vector.multi_reduction <add>, %91, %cst_32 [1] : vector<16x32xf32> to vector<16xf32>
    %95 = vector.shape_cast %94 : vector<16xf32> to vector<16x1xf32>
    %cst_33 = arith.constant 3.200000e+01 : f32
    %96 = vector.broadcast %cst_33 : f32 to vector<16x1xf32>
    %97 = arith.divf %95, %96 : vector<16x1xf32>
    %98 = vector.broadcast %97 : vector<16x1xf32> to vector<16x32xf32>
    %99 = arith.subf %91, %98 : vector<16x32xf32>
    %100 = arith.mulf %99, %99 : vector<16x32xf32>
    %cst_34 = arith.constant dense<0.000000e+00> : vector<16xf32>
    %101 = vector.multi_reduction <add>, %100, %cst_34 [1] : vector<16x32xf32> to vector<16xf32>
    %102 = vector.shape_cast %101 : vector<16xf32> to vector<16x1xf32>
    %cst_35 = arith.constant 3.200000e+01 : f32
    %103 = vector.broadcast %cst_35 : f32 to vector<16x1xf32>
    %104 = arith.divf %102, %103 : vector<16x1xf32>
    %105 = vector.broadcast %97 : vector<16x1xf32> to vector<16x32xf32>
    %106 = arith.subf %91, %105 : vector<16x32xf32>
    %cst_36 = arith.constant 9.99999974E-6 : f32
    %107 = vector.broadcast %cst_36 : f32 to vector<16x1xf32>
    %108 = arith.addf %104, %107 : vector<16x1xf32>
    %109 = math.rsqrt %108 : vector<16x1xf32>
    %110 = vector.broadcast %109 : vector<16x1xf32> to vector<16x32xf32>
    %111 = arith.mulf %106, %110 : vector<16x32xf32>
    %112 = vector.broadcast %92 : vector<1x32xf32> to vector<16x32xf32>
    %113 = arith.mulf %111, %112 : vector<16x32xf32>
    %114 = vector.broadcast %93 : vector<1x32xf32> to vector<16x32xf32>
    %115 = arith.addf %113, %114 : vector<16x32xf32>
    %c0_37 = arith.constant 0 : index
    %c0_38 = arith.constant 0 : index
    %c0_39 = arith.constant 0 : index
    %116 = vector.load %arg8[%c0_37, %c0_38, %c0_39] : memref<2x288x128xbf16, #tpu.memory_space<vmem>>, vector<1x288x128xbf16>
    %117 = vector.shape_cast %116 : vector<1x288x128xbf16> to vector<288x128xbf16>
    %118 = vector.extract_strided_slice %10 {offsets = [5, 0], sizes = [1, 128], strides = [1, 1]} : vector<24x128xf32> to vector<1x128xf32>
    %119 = arith.truncf %115 : vector<16x32xf32> to vector<16x32xbf16>
    %cst_40 = arith.constant 0.000000e+00 : bf16
    %120 = vector.broadcast %cst_40 : bf16 to vector<4x32xbf16>
    %121 = tpu.concatenate %120, %119, %120 in 0 : vector<4x32xbf16>, vector<16x32xbf16>, vector<4x32xbf16> -> vector<24x32xbf16>
    %122 = vector.extract_strided_slice %121 {offsets = [0, 0], sizes = [16, 32], strides = [1, 1]} : vector<24x32xbf16> to vector<16x32xbf16>
    %123 = vector.extract_strided_slice %121 {offsets = [1, 0], sizes = [16, 32], strides = [1, 1]} : vector<24x32xbf16> to vector<16x32xbf16>
    %124 = vector.extract_strided_slice %121 {offsets = [2, 0], sizes = [16, 32], strides = [1, 1]} : vector<24x32xbf16> to vector<16x32xbf16>
    %125 = vector.extract_strided_slice %121 {offsets = [3, 0], sizes = [16, 32], strides = [1, 1]} : vector<24x32xbf16> to vector<16x32xbf16>
    %126 = vector.extract_strided_slice %121 {offsets = [4, 0], sizes = [16, 32], strides = [1, 1]} : vector<24x32xbf16> to vector<16x32xbf16>
    %127 = vector.extract_strided_slice %121 {offsets = [5, 0], sizes = [16, 32], strides = [1, 1]} : vector<24x32xbf16> to vector<16x32xbf16>
    %128 = vector.extract_strided_slice %121 {offsets = [6, 0], sizes = [16, 32], strides = [1, 1]} : vector<24x32xbf16> to vector<16x32xbf16>
    %129 = vector.extract_strided_slice %121 {offsets = [7, 0], sizes = [16, 32], strides = [1, 1]} : vector<24x32xbf16> to vector<16x32xbf16>
    %130 = vector.extract_strided_slice %121 {offsets = [8, 0], sizes = [16, 32], strides = [1, 1]} : vector<24x32xbf16> to vector<16x32xbf16>
    %131 = tpu.concatenate %122, %123, %124, %125, %126, %127, %128, %129, %130 in 1 : vector<16x32xbf16>, vector<16x32xbf16>, vector<16x32xbf16>, vector<16x32xbf16>, vector<16x32xbf16>, vector<16x32xbf16>, vector<16x32xbf16>, vector<16x32xbf16>, vector<16x32xbf16> -> vector<16x288xbf16>
    %cst_41 = arith.constant dense<0.000000e+00> : vector<16x128xf32>
    %132 = tpu.matmul %131, %117, %cst_41 {dimension_numbers = #tpu.dot_dimension_numbers<[1], [0], [0], [1], [0, 0, 1, 1], [], []>} : vector<16x288xbf16>, vector<288x128xbf16>, vector<16x128xf32> -> vector<16x128xf32>
    %133 = vector.broadcast %118 : vector<1x128xf32> to vector<16x128xf32>
    %134 = arith.addf %132, %133 : vector<16x128xf32>
    %135 = arith.mulf %134, %134 : vector<16x128xf32>
    %136 = arith.mulf %134, %135 : vector<16x128xf32>
    %cst_42 = arith.constant 4.471500e-02 : f32
    %137 = vector.broadcast %cst_42 : f32 to vector<16x128xf32>
    %138 = arith.mulf %137, %136 : vector<16x128xf32>
    %139 = arith.addf %134, %138 : vector<16x128xf32>
    %cst_43 = arith.constant 0.797884583 : f32
    %140 = vector.broadcast %cst_43 : f32 to vector<16x128xf32>
    %141 = arith.mulf %140, %139 : vector<16x128xf32>
    %142 = math.tanh %141 : vector<16x128xf32>
    %cst_44 = arith.constant 1.000000e+00 : f32
    %143 = vector.broadcast %cst_44 : f32 to vector<16x128xf32>
    %144 = arith.addf %143, %142 : vector<16x128xf32>
    %cst_45 = arith.constant 5.000000e-01 : f32
    %145 = vector.broadcast %cst_45 : f32 to vector<16x128xf32>
    %146 = arith.mulf %145, %144 : vector<16x128xf32>
    %147 = arith.mulf %134, %146 : vector<16x128xf32>
    %148 = arith.truncf %147 : vector<16x128xf32> to vector<16x128xbf16>
    %c0_46 = arith.constant 0 : index
    %c0_47 = arith.constant 0 : index
    %c0_48 = arith.constant 0 : index
    %149 = vector.load %arg9[%c0_46, %c0_47, %c0_48] : memref<2x128x32xbf16, #tpu.memory_space<vmem>>, vector<1x128x32xbf16>
    %150 = vector.shape_cast %149 : vector<1x128x32xbf16> to vector<128x32xbf16>
    %cst_49 = arith.constant dense<0.000000e+00> : vector<16x32xf32>
    %151 = tpu.matmul %148, %150, %cst_49 {dimension_numbers = #tpu.dot_dimension_numbers<[1], [0], [0], [1], [0, 0, 1, 1], [], []>} : vector<16x128xbf16>, vector<128x32xbf16>, vector<16x32xf32> -> vector<16x32xf32>
    %152 = vector.extract_strided_slice %10 {offsets = [4, 0], sizes = [1, 32], strides = [1, 1]} : vector<24x128xf32> to vector<1x32xf32>
    %153 = vector.broadcast %152 : vector<1x32xf32> to vector<16x32xf32>
    %154 = arith.addf %151, %153 : vector<16x32xf32>
    %155 = arith.addf %91, %154 : vector<16x32xf32>
    %156 = vector.broadcast %3 : vector<16x1xf32> to vector<16x32xf32>
    %157 = arith.mulf %155, %156 : vector<16x32xf32>
    %158 = vector.extract_strided_slice %10 {offsets = [6, 0], sizes = [1, 32], strides = [1, 1]} : vector<24x128xf32> to vector<1x32xf32>
    %159 = vector.extract_strided_slice %10 {offsets = [7, 0], sizes = [1, 32], strides = [1, 1]} : vector<24x128xf32> to vector<1x32xf32>
    %cst_50 = arith.constant dense<0.000000e+00> : vector<16xf32>
    %160 = vector.multi_reduction <add>, %157, %cst_50 [1] : vector<16x32xf32> to vector<16xf32>
    %161 = vector.shape_cast %160 : vector<16xf32> to vector<16x1xf32>
    %cst_51 = arith.constant 3.200000e+01 : f32
    %162 = vector.broadcast %cst_51 : f32 to vector<16x1xf32>
    %163 = arith.divf %161, %162 : vector<16x1xf32>
    %164 = vector.broadcast %163 : vector<16x1xf32> to vector<16x32xf32>
    %165 = arith.subf %157, %164 : vector<16x32xf32>
    %166 = arith.mulf %165, %165 : vector<16x32xf32>
    %cst_52 = arith.constant dense<0.000000e+00> : vector<16xf32>
    %167 = vector.multi_reduction <add>, %166, %cst_52 [1] : vector<16x32xf32> to vector<16xf32>
    %168 = vector.shape_cast %167 : vector<16xf32> to vector<16x1xf32>
    %cst_53 = arith.constant 3.200000e+01 : f32
    %169 = vector.broadcast %cst_53 : f32 to vector<16x1xf32>
    %170 = arith.divf %168, %169 : vector<16x1xf32>
    %171 = vector.broadcast %163 : vector<16x1xf32> to vector<16x32xf32>
    %172 = arith.subf %157, %171 : vector<16x32xf32>
    %cst_54 = arith.constant 9.99999974E-6 : f32
    %173 = vector.broadcast %cst_54 : f32 to vector<16x1xf32>
    %174 = arith.addf %170, %173 : vector<16x1xf32>
    %175 = math.rsqrt %174 : vector<16x1xf32>
    %176 = vector.broadcast %175 : vector<16x1xf32> to vector<16x32xf32>
    %177 = arith.mulf %172, %176 : vector<16x32xf32>
    %178 = vector.broadcast %158 : vector<1x32xf32> to vector<16x32xf32>
    %179 = arith.mulf %177, %178 : vector<16x32xf32>
    %180 = vector.broadcast %159 : vector<1x32xf32> to vector<16x32xf32>
    %181 = arith.addf %179, %180 : vector<16x32xf32>
    %182 = arith.truncf %181 : vector<16x32xf32> to vector<16x32xbf16>
    %c1 = arith.constant 1 : index
    %c0_55 = arith.constant 0 : index
    %c0_56 = arith.constant 0 : index
    %183 = vector.load %arg6[%c1, %c0_55, %c0_56] : memref<2x32x96xbf16, #tpu.memory_space<vmem>>, vector<1x32x96xbf16>
    %184 = vector.shape_cast %183 : vector<1x32x96xbf16> to vector<32x96xbf16>
    %cst_57 = arith.constant dense<0.000000e+00> : vector<16x96xf32>
    %185 = tpu.matmul %182, %184, %cst_57 {dimension_numbers = #tpu.dot_dimension_numbers<[1], [0], [0], [1], [0, 0, 1, 1], [], []>} : vector<16x32xbf16>, vector<32x96xbf16>, vector<16x96xf32> -> vector<16x96xf32>
    %186 = vector.extract_strided_slice %185 {offsets = [0, 0], sizes = [16, 32], strides = [1, 1]} : vector<16x96xf32> to vector<16x32xf32>
    %187 = vector.extract_strided_slice %185 {offsets = [0, 32], sizes = [16, 32], strides = [1, 1]} : vector<16x96xf32> to vector<16x32xf32>
    %188 = vector.extract_strided_slice %185 {offsets = [0, 64], sizes = [16, 32], strides = [1, 1]} : vector<16x96xf32> to vector<16x32xf32>
    %189 = vector.extract_strided_slice %186 {offsets = [0, 0], sizes = [16, 16], strides = [1, 1]} : vector<16x32xf32> to vector<16x16xf32>
    %190 = arith.truncf %189 : vector<16x16xf32> to vector<16x16xbf16>
    %191 = vector.extract_strided_slice %187 {offsets = [0, 0], sizes = [16, 16], strides = [1, 1]} : vector<16x32xf32> to vector<16x16xf32>
    %192 = arith.truncf %191 : vector<16x16xf32> to vector<16x16xbf16>
    %cst_58 = arith.constant dense<0.000000e+00> : vector<16x16xf32>
    %193 = tpu.matmul %190, %192, %cst_58 {dimension_numbers = #tpu.dot_dimension_numbers<[1], [1], [0], [0], [0, 0, 1, 0], [], []>} : vector<16x16xbf16>, vector<16x16xbf16>, vector<16x16xf32> -> vector<16x16xf32>
    %194 = vector.broadcast %9 : vector<1x16xf32> to vector<16x16xf32>
    %195 = arith.addf %193, %194 : vector<16x16xf32>
    %cst_59 = arith.constant dense<0xFF800000> : vector<16xf32>
    %196 = vector.multi_reduction <maximumf>, %195, %cst_59 [1] : vector<16x16xf32> to vector<16xf32>
    %197 = vector.shape_cast %196 : vector<16xf32> to vector<16x1xf32>
    %198 = vector.broadcast %197 : vector<16x1xf32> to vector<16x16xf32>
    %199 = arith.subf %195, %198 : vector<16x16xf32>
    %200 = math.exp %199 : vector<16x16xf32>
    %cst_60 = arith.constant dense<0.000000e+00> : vector<16xf32>
    %201 = vector.multi_reduction <add>, %200, %cst_60 [1] : vector<16x16xf32> to vector<16xf32>
    %202 = vector.shape_cast %201 : vector<16xf32> to vector<16x1xf32>
    %203 = tpu.reciprocal %202 {approx = true} : vector<16x1xf32> -> vector<16x1xf32>
    %204 = vector.broadcast %203 : vector<16x1xf32> to vector<16x16xf32>
    %205 = arith.mulf %200, %204 : vector<16x16xf32>
    %206 = arith.truncf %205 : vector<16x16xf32> to vector<16x16xbf16>
    %207 = vector.extract_strided_slice %188 {offsets = [0, 0], sizes = [16, 16], strides = [1, 1]} : vector<16x32xf32> to vector<16x16xf32>
    %208 = arith.truncf %207 : vector<16x16xf32> to vector<16x16xbf16>
    %cst_61 = arith.constant dense<0.000000e+00> : vector<16x16xf32>
    %209 = tpu.matmul %206, %208, %cst_61 {dimension_numbers = #tpu.dot_dimension_numbers<[1], [0], [0], [1], [0, 0, 1, 1], [], []>} : vector<16x16xbf16>, vector<16x16xbf16>, vector<16x16xf32> -> vector<16x16xf32>
    %210 = vector.extract_strided_slice %186 {offsets = [0, 16], sizes = [16, 16], strides = [1, 1]} : vector<16x32xf32> to vector<16x16xf32>
    %211 = arith.truncf %210 : vector<16x16xf32> to vector<16x16xbf16>
    %212 = vector.extract_strided_slice %187 {offsets = [0, 16], sizes = [16, 16], strides = [1, 1]} : vector<16x32xf32> to vector<16x16xf32>
    %213 = arith.truncf %212 : vector<16x16xf32> to vector<16x16xbf16>
    %cst_62 = arith.constant dense<0.000000e+00> : vector<16x16xf32>
    %214 = tpu.matmul %211, %213, %cst_62 {dimension_numbers = #tpu.dot_dimension_numbers<[1], [1], [0], [0], [0, 0, 1, 0], [], []>} : vector<16x16xbf16>, vector<16x16xbf16>, vector<16x16xf32> -> vector<16x16xf32>
    %215 = vector.broadcast %9 : vector<1x16xf32> to vector<16x16xf32>
    %216 = arith.addf %214, %215 : vector<16x16xf32>
    %cst_63 = arith.constant dense<0xFF800000> : vector<16xf32>
    %217 = vector.multi_reduction <maximumf>, %216, %cst_63 [1] : vector<16x16xf32> to vector<16xf32>
    %218 = vector.shape_cast %217 : vector<16xf32> to vector<16x1xf32>
    %219 = vector.broadcast %218 : vector<16x1xf32> to vector<16x16xf32>
    %220 = arith.subf %216, %219 : vector<16x16xf32>
    %221 = math.exp %220 : vector<16x16xf32>
    %cst_64 = arith.constant dense<0.000000e+00> : vector<16xf32>
    %222 = vector.multi_reduction <add>, %221, %cst_64 [1] : vector<16x16xf32> to vector<16xf32>
    %223 = vector.shape_cast %222 : vector<16xf32> to vector<16x1xf32>
    %224 = tpu.reciprocal %223 {approx = true} : vector<16x1xf32> -> vector<16x1xf32>
    %225 = vector.broadcast %224 : vector<16x1xf32> to vector<16x16xf32>
    %226 = arith.mulf %221, %225 : vector<16x16xf32>
    %227 = arith.truncf %226 : vector<16x16xf32> to vector<16x16xbf16>
    %228 = vector.extract_strided_slice %188 {offsets = [0, 16], sizes = [16, 16], strides = [1, 1]} : vector<16x32xf32> to vector<16x16xf32>
    %229 = arith.truncf %228 : vector<16x16xf32> to vector<16x16xbf16>
    %cst_65 = arith.constant dense<0.000000e+00> : vector<16x16xf32>
    %230 = tpu.matmul %227, %229, %cst_65 {dimension_numbers = #tpu.dot_dimension_numbers<[1], [0], [0], [1], [0, 0, 1, 1], [], []>} : vector<16x16xbf16>, vector<16x16xbf16>, vector<16x16xf32> -> vector<16x16xf32>
    %231 = tpu.concatenate %209, %230 in 1 : vector<16x16xf32>, vector<16x16xf32> -> vector<16x32xf32>
    %232 = arith.truncf %231 : vector<16x32xf32> to vector<16x32xbf16>
    %c1_66 = arith.constant 1 : index
    %c0_67 = arith.constant 0 : index
    %c0_68 = arith.constant 0 : index
    %233 = vector.load %arg7[%c1_66, %c0_67, %c0_68] : memref<2x32x32xbf16, #tpu.memory_space<vmem>>, vector<1x32x32xbf16>
    %234 = vector.shape_cast %233 : vector<1x32x32xbf16> to vector<32x32xbf16>
    %cst_69 = arith.constant dense<0.000000e+00> : vector<16x32xf32>
    %235 = tpu.matmul %232, %234, %cst_69 {dimension_numbers = #tpu.dot_dimension_numbers<[1], [0], [0], [1], [0, 0, 1, 1], [], []>} : vector<16x32xbf16>, vector<32x32xbf16>, vector<16x32xf32> -> vector<16x32xf32>
    %236 = arith.addf %157, %235 : vector<16x32xf32>
    %237 = vector.broadcast %3 : vector<16x1xf32> to vector<16x32xf32>
    %238 = arith.mulf %236, %237 : vector<16x32xf32>
    %239 = vector.extract_strided_slice %10 {offsets = [8, 0], sizes = [1, 32], strides = [1, 1]} : vector<24x128xf32> to vector<1x32xf32>
    %240 = vector.extract_strided_slice %10 {offsets = [9, 0], sizes = [1, 32], strides = [1, 1]} : vector<24x128xf32> to vector<1x32xf32>
    %cst_70 = arith.constant dense<0.000000e+00> : vector<16xf32>
    %241 = vector.multi_reduction <add>, %238, %cst_70 [1] : vector<16x32xf32> to vector<16xf32>
    %242 = vector.shape_cast %241 : vector<16xf32> to vector<16x1xf32>
    %cst_71 = arith.constant 3.200000e+01 : f32
    %243 = vector.broadcast %cst_71 : f32 to vector<16x1xf32>
    %244 = arith.divf %242, %243 : vector<16x1xf32>
    %245 = vector.broadcast %244 : vector<16x1xf32> to vector<16x32xf32>
    %246 = arith.subf %238, %245 : vector<16x32xf32>
    %247 = arith.mulf %246, %246 : vector<16x32xf32>
    %cst_72 = arith.constant dense<0.000000e+00> : vector<16xf32>
    %248 = vector.multi_reduction <add>, %247, %cst_72 [1] : vector<16x32xf32> to vector<16xf32>
    %249 = vector.shape_cast %248 : vector<16xf32> to vector<16x1xf32>
    %cst_73 = arith.constant 3.200000e+01 : f32
    %250 = vector.broadcast %cst_73 : f32 to vector<16x1xf32>
    %251 = arith.divf %249, %250 : vector<16x1xf32>
    %252 = vector.broadcast %244 : vector<16x1xf32> to vector<16x32xf32>
    %253 = arith.subf %238, %252 : vector<16x32xf32>
    %cst_74 = arith.constant 9.99999974E-6 : f32
    %254 = vector.broadcast %cst_74 : f32 to vector<16x1xf32>
    %255 = arith.addf %251, %254 : vector<16x1xf32>
    %256 = math.rsqrt %255 : vector<16x1xf32>
    %257 = vector.broadcast %256 : vector<16x1xf32> to vector<16x32xf32>
    %258 = arith.mulf %253, %257 : vector<16x32xf32>
    %259 = vector.broadcast %239 : vector<1x32xf32> to vector<16x32xf32>
    %260 = arith.mulf %258, %259 : vector<16x32xf32>
    %261 = vector.broadcast %240 : vector<1x32xf32> to vector<16x32xf32>
    %262 = arith.addf %260, %261 : vector<16x32xf32>
    %c1_75 = arith.constant 1 : index
    %c0_76 = arith.constant 0 : index
    %c0_77 = arith.constant 0 : index
    %263 = vector.load %arg8[%c1_75, %c0_76, %c0_77] : memref<2x288x128xbf16, #tpu.memory_space<vmem>>, vector<1x288x128xbf16>
    %264 = vector.shape_cast %263 : vector<1x288x128xbf16> to vector<288x128xbf16>
    %265 = vector.extract_strided_slice %10 {offsets = [11, 0], sizes = [1, 128], strides = [1, 1]} : vector<24x128xf32> to vector<1x128xf32>
    %266 = arith.truncf %262 : vector<16x32xf32> to vector<16x32xbf16>
    %cst_78 = arith.constant 0.000000e+00 : bf16
    %267 = vector.broadcast %cst_78 : bf16 to vector<4x32xbf16>
    %268 = tpu.concatenate %267, %266, %267 in 0 : vector<4x32xbf16>, vector<16x32xbf16>, vector<4x32xbf16> -> vector<24x32xbf16>
    %269 = vector.extract_strided_slice %268 {offsets = [0, 0], sizes = [16, 32], strides = [1, 1]} : vector<24x32xbf16> to vector<16x32xbf16>
    %270 = vector.extract_strided_slice %268 {offsets = [1, 0], sizes = [16, 32], strides = [1, 1]} : vector<24x32xbf16> to vector<16x32xbf16>
    %271 = vector.extract_strided_slice %268 {offsets = [2, 0], sizes = [16, 32], strides = [1, 1]} : vector<24x32xbf16> to vector<16x32xbf16>
    %272 = vector.extract_strided_slice %268 {offsets = [3, 0], sizes = [16, 32], strides = [1, 1]} : vector<24x32xbf16> to vector<16x32xbf16>
    %273 = vector.extract_strided_slice %268 {offsets = [4, 0], sizes = [16, 32], strides = [1, 1]} : vector<24x32xbf16> to vector<16x32xbf16>
    %274 = vector.extract_strided_slice %268 {offsets = [5, 0], sizes = [16, 32], strides = [1, 1]} : vector<24x32xbf16> to vector<16x32xbf16>
    %275 = vector.extract_strided_slice %268 {offsets = [6, 0], sizes = [16, 32], strides = [1, 1]} : vector<24x32xbf16> to vector<16x32xbf16>
    %276 = vector.extract_strided_slice %268 {offsets = [7, 0], sizes = [16, 32], strides = [1, 1]} : vector<24x32xbf16> to vector<16x32xbf16>
    %277 = vector.extract_strided_slice %268 {offsets = [8, 0], sizes = [16, 32], strides = [1, 1]} : vector<24x32xbf16> to vector<16x32xbf16>
    %278 = tpu.concatenate %269, %270, %271, %272, %273, %274, %275, %276, %277 in 1 : vector<16x32xbf16>, vector<16x32xbf16>, vector<16x32xbf16>, vector<16x32xbf16>, vector<16x32xbf16>, vector<16x32xbf16>, vector<16x32xbf16>, vector<16x32xbf16>, vector<16x32xbf16> -> vector<16x288xbf16>
    %cst_79 = arith.constant dense<0.000000e+00> : vector<16x128xf32>
    %279 = tpu.matmul %278, %264, %cst_79 {dimension_numbers = #tpu.dot_dimension_numbers<[1], [0], [0], [1], [0, 0, 1, 1], [], []>} : vector<16x288xbf16>, vector<288x128xbf16>, vector<16x128xf32> -> vector<16x128xf32>
    %280 = vector.broadcast %265 : vector<1x128xf32> to vector<16x128xf32>
    %281 = arith.addf %279, %280 : vector<16x128xf32>
    %282 = arith.mulf %281, %281 : vector<16x128xf32>
    %283 = arith.mulf %281, %282 : vector<16x128xf32>
    %cst_80 = arith.constant 4.471500e-02 : f32
    %284 = vector.broadcast %cst_80 : f32 to vector<16x128xf32>
    %285 = arith.mulf %284, %283 : vector<16x128xf32>
    %286 = arith.addf %281, %285 : vector<16x128xf32>
    %cst_81 = arith.constant 0.797884583 : f32
    %287 = vector.broadcast %cst_81 : f32 to vector<16x128xf32>
    %288 = arith.mulf %287, %286 : vector<16x128xf32>
    %289 = math.tanh %288 : vector<16x128xf32>
    %cst_82 = arith.constant 1.000000e+00 : f32
    %290 = vector.broadcast %cst_82 : f32 to vector<16x128xf32>
    %291 = arith.addf %290, %289 : vector<16x128xf32>
    %cst_83 = arith.constant 5.000000e-01 : f32
    %292 = vector.broadcast %cst_83 : f32 to vector<16x128xf32>
    %293 = arith.mulf %292, %291 : vector<16x128xf32>
    %294 = arith.mulf %281, %293 : vector<16x128xf32>
    %295 = arith.truncf %294 : vector<16x128xf32> to vector<16x128xbf16>
    %c1_84 = arith.constant 1 : index
    %c0_85 = arith.constant 0 : index
    %c0_86 = arith.constant 0 : index
    %296 = vector.load %arg9[%c1_84, %c0_85, %c0_86] : memref<2x128x32xbf16, #tpu.memory_space<vmem>>, vector<1x128x32xbf16>
    %297 = vector.shape_cast %296 : vector<1x128x32xbf16> to vector<128x32xbf16>
    %cst_87 = arith.constant dense<0.000000e+00> : vector<16x32xf32>
    %298 = tpu.matmul %295, %297, %cst_87 {dimension_numbers = #tpu.dot_dimension_numbers<[1], [0], [0], [1], [0, 0, 1, 1], [], []>} : vector<16x128xbf16>, vector<128x32xbf16>, vector<16x32xf32> -> vector<16x32xf32>
    %299 = vector.extract_strided_slice %10 {offsets = [10, 0], sizes = [1, 32], strides = [1, 1]} : vector<24x128xf32> to vector<1x32xf32>
    %300 = vector.broadcast %299 : vector<1x32xf32> to vector<16x32xf32>
    %301 = arith.addf %298, %300 : vector<16x32xf32>
    %302 = arith.addf %238, %301 : vector<16x32xf32>
    %303 = vector.broadcast %3 : vector<16x1xf32> to vector<16x32xf32>
    %304 = arith.mulf %302, %303 : vector<16x32xf32>
    %305 = vector.extract_strided_slice %10 {offsets = [12, 0], sizes = [1, 32], strides = [1, 1]} : vector<24x128xf32> to vector<1x32xf32>
    %306 = vector.extract_strided_slice %10 {offsets = [13, 0], sizes = [1, 32], strides = [1, 1]} : vector<24x128xf32> to vector<1x32xf32>
    %cst_88 = arith.constant dense<0.000000e+00> : vector<16xf32>
    %307 = vector.multi_reduction <add>, %304, %cst_88 [1] : vector<16x32xf32> to vector<16xf32>
    %308 = vector.shape_cast %307 : vector<16xf32> to vector<16x1xf32>
    %cst_89 = arith.constant 3.200000e+01 : f32
    %309 = vector.broadcast %cst_89 : f32 to vector<16x1xf32>
    %310 = arith.divf %308, %309 : vector<16x1xf32>
    %311 = vector.broadcast %310 : vector<16x1xf32> to vector<16x32xf32>
    %312 = arith.subf %304, %311 : vector<16x32xf32>
    %313 = arith.mulf %312, %312 : vector<16x32xf32>
    %cst_90 = arith.constant dense<0.000000e+00> : vector<16xf32>
    %314 = vector.multi_reduction <add>, %313, %cst_90 [1] : vector<16x32xf32> to vector<16xf32>
    %315 = vector.shape_cast %314 : vector<16xf32> to vector<16x1xf32>
    %cst_91 = arith.constant 3.200000e+01 : f32
    %316 = vector.broadcast %cst_91 : f32 to vector<16x1xf32>
    %317 = arith.divf %315, %316 : vector<16x1xf32>
    %318 = vector.broadcast %310 : vector<16x1xf32> to vector<16x32xf32>
    %319 = arith.subf %304, %318 : vector<16x32xf32>
    %cst_92 = arith.constant 9.99999974E-6 : f32
    %320 = vector.broadcast %cst_92 : f32 to vector<16x1xf32>
    %321 = arith.addf %317, %320 : vector<16x1xf32>
    %322 = math.rsqrt %321 : vector<16x1xf32>
    %323 = vector.broadcast %322 : vector<16x1xf32> to vector<16x32xf32>
    %324 = arith.mulf %319, %323 : vector<16x32xf32>
    %325 = vector.broadcast %305 : vector<1x32xf32> to vector<16x32xf32>
    %326 = arith.mulf %324, %325 : vector<16x32xf32>
    %327 = vector.broadcast %306 : vector<1x32xf32> to vector<16x32xf32>
    %328 = arith.addf %326, %327 : vector<16x32xf32>
    %329 = vector.broadcast %3 : vector<16x1xf32> to vector<16x32xf32>
    %330 = arith.mulf %328, %329 : vector<16x32xf32>
    %c0_93 = arith.constant 0 : index
    %c0_94 = arith.constant 0 : index
    %c0_95 = arith.constant 0 : index
    %331 = vector.load %arg12[%c0_93, %c0_94, %c0_95] : memref<1x16x32xf32, #tpu.memory_space<vmem>>, vector<1x16x32xf32>
    %332 = vector.shape_cast %331 : vector<1x16x32xf32> to vector<16x32xf32>
    %333 = vector.shape_cast %330 : vector<16x32xf32> to vector<1x16x32xf32>
    tpu.vector_store %arg12[%c0_93, %c0_94, %c0_95], %333 {strides = array<i32>} : memref<1x16x32xf32, #tpu.memory_space<vmem>>, vector<1x16x32xf32>,
    %c0_96 = arith.constant 0 : index
    %c0_97 = arith.constant 0 : index
    %c0_98 = arith.constant 0 : index
    %334 = vector.load %arg2[%c0_96, %c0_97, %c0_98] : memref<1x16x32xf32, #tpu.memory_space<vmem>>, vector<1x16x32xf32>
    %335 = vector.shape_cast %334 : vector<1x16x32xf32> to vector<16x32xf32>
    %336 = arith.addf %330, %335 : vector<16x32xf32>
    %c0_99 = arith.constant 0 : index
    %c0_100 = arith.constant 0 : index
    %337 = vector.load %arg10[%c0_99, %c0_100] : memref<96x48xbf16, #tpu.memory_space<vmem>>, vector<96x48xbf16>
    %338 = vector.extract_strided_slice %10 {offsets = [14, 0], sizes = [1, 48], strides = [1, 1]} : vector<24x128xf32> to vector<1x48xf32>
    %339 = arith.truncf %336 : vector<16x32xf32> to vector<16x32xbf16>
    %cst_101 = arith.constant 0.000000e+00 : bf16
    %340 = vector.broadcast %cst_101 : bf16 to vector<1x32xbf16>
    %341 = tpu.concatenate %340, %339, %340 in 0 : vector<1x32xbf16>, vector<16x32xbf16>, vector<1x32xbf16> -> vector<18x32xbf16>
    %342 = vector.extract_strided_slice %341 {offsets = [0, 0], sizes = [16, 32], strides = [1, 1]} : vector<18x32xbf16> to vector<16x32xbf16>
    %343 = vector.extract_strided_slice %341 {offsets = [1, 0], sizes = [16, 32], strides = [1, 1]} : vector<18x32xbf16> to vector<16x32xbf16>
    %344 = vector.extract_strided_slice %341 {offsets = [2, 0], sizes = [16, 32], strides = [1, 1]} : vector<18x32xbf16> to vector<16x32xbf16>
    %345 = tpu.concatenate %342, %343, %344 in 1 : vector<16x32xbf16>, vector<16x32xbf16>, vector<16x32xbf16> -> vector<16x96xbf16>
    %cst_102 = arith.constant dense<0.000000e+00> : vector<16x48xf32>
    %346 = tpu.matmul %345, %337, %cst_102 {dimension_numbers = #tpu.dot_dimension_numbers<[1], [0], [0], [1], [0, 0, 1, 1], [], []>} : vector<16x96xbf16>, vector<96x48xbf16>, vector<16x48xf32> -> vector<16x48xf32>
    %347 = vector.broadcast %338 : vector<1x48xf32> to vector<16x48xf32>
    %348 = arith.addf %346, %347 : vector<16x48xf32>
    %cst_103 = arith.constant 0.000000e+00 : f32
    %349 = vector.broadcast %cst_103 : f32 to vector<16x48xf32>
    %350 = arith.maximumf %348, %349 : vector<16x48xf32>
    %351 = vector.extract_strided_slice %10 {offsets = [15, 0], sizes = [1, 48], strides = [1, 1]} : vector<24x128xf32> to vector<1x48xf32>
    %352 = vector.extract_strided_slice %10 {offsets = [16, 0], sizes = [1, 48], strides = [1, 1]} : vector<24x128xf32> to vector<1x48xf32>
    %cst_104 = arith.constant dense<0.000000e+00> : vector<16xf32>
    %353 = vector.multi_reduction <add>, %350, %cst_104 [1] : vector<16x48xf32> to vector<16xf32>
    %354 = vector.shape_cast %353 : vector<16xf32> to vector<16x1xf32>
    %cst_105 = arith.constant 4.800000e+01 : f32
    %355 = vector.broadcast %cst_105 : f32 to vector<16x1xf32>
    %356 = arith.divf %354, %355 : vector<16x1xf32>
    %357 = vector.broadcast %356 : vector<16x1xf32> to vector<16x48xf32>
    %358 = arith.subf %350, %357 : vector<16x48xf32>
    %359 = arith.mulf %358, %358 : vector<16x48xf32>
    %cst_106 = arith.constant dense<0.000000e+00> : vector<16xf32>
    %360 = vector.multi_reduction <add>, %359, %cst_106 [1] : vector<16x48xf32> to vector<16xf32>
    %361 = vector.shape_cast %360 : vector<16xf32> to vector<16x1xf32>
    %cst_107 = arith.constant 4.800000e+01 : f32
    %362 = vector.broadcast %cst_107 : f32 to vector<16x1xf32>
    %363 = arith.divf %361, %362 : vector<16x1xf32>
    %364 = vector.broadcast %356 : vector<16x1xf32> to vector<16x48xf32>
    %365 = arith.subf %350, %364 : vector<16x48xf32>
    %cst_108 = arith.constant 9.99999974E-6 : f32
    %366 = vector.broadcast %cst_108 : f32 to vector<16x1xf32>
    %367 = arith.addf %363, %366 : vector<16x1xf32>
    %368 = math.rsqrt %367 : vector<16x1xf32>
    %369 = vector.broadcast %368 : vector<16x1xf32> to vector<16x48xf32>
    %370 = arith.mulf %365, %369 : vector<16x48xf32>
    %371 = vector.broadcast %351 : vector<1x48xf32> to vector<16x48xf32>
    %372 = arith.mulf %370, %371 : vector<16x48xf32>
    %373 = vector.broadcast %352 : vector<1x48xf32> to vector<16x48xf32>
    %374 = arith.addf %372, %373 : vector<16x48xf32>
    %375 = vector.broadcast %3 : vector<16x1xf32> to vector<16x48xf32>
    %376 = arith.mulf %374, %375 : vector<16x48xf32>
    %c0_109 = arith.constant 0 : index
    %c0_110 = arith.constant 0 : index
    %377 = vector.load %arg11[%c0_109, %c0_110] : memref<144x48xbf16, #tpu.memory_space<vmem>>, vector<144x48xbf16>
    %378 = vector.extract_strided_slice %10 {offsets = [17, 0], sizes = [1, 48], strides = [1, 1]} : vector<24x128xf32> to vector<1x48xf32>
    %379 = arith.truncf %376 : vector<16x48xf32> to vector<16x48xbf16>
    %cst_111 = arith.constant 0.000000e+00 : bf16
    %380 = vector.broadcast %cst_111 : bf16 to vector<1x48xbf16>
    %381 = tpu.concatenate %380, %379, %380 in 0 : vector<1x48xbf16>, vector<16x48xbf16>, vector<1x48xbf16> -> vector<18x48xbf16>
    %382 = vector.extract_strided_slice %381 {offsets = [0, 0], sizes = [16, 48], strides = [1, 1]} : vector<18x48xbf16> to vector<16x48xbf16>
    %383 = vector.extract_strided_slice %381 {offsets = [1, 0], sizes = [16, 48], strides = [1, 1]} : vector<18x48xbf16> to vector<16x48xbf16>
    %384 = vector.extract_strided_slice %381 {offsets = [2, 0], sizes = [16, 48], strides = [1, 1]} : vector<18x48xbf16> to vector<16x48xbf16>
    %385 = tpu.concatenate %382, %383, %384 in 1 : vector<16x48xbf16>, vector<16x48xbf16>, vector<16x48xbf16> -> vector<16x144xbf16>
    %cst_112 = arith.constant dense<0.000000e+00> : vector<16x48xf32>
    %386 = tpu.matmul %385, %377, %cst_112 {dimension_numbers = #tpu.dot_dimension_numbers<[1], [0], [0], [1], [0, 0, 1, 1], [], []>} : vector<16x144xbf16>, vector<144x48xbf16>, vector<16x48xf32> -> vector<16x48xf32>
    %387 = vector.broadcast %378 : vector<1x48xf32> to vector<16x48xf32>
    %388 = arith.addf %386, %387 : vector<16x48xf32>
    %cst_113 = arith.constant 0.000000e+00 : f32
    %389 = vector.broadcast %cst_113 : f32 to vector<16x48xf32>
    %390 = arith.maximumf %388, %389 : vector<16x48xf32>
    %391 = vector.extract_strided_slice %10 {offsets = [18, 0], sizes = [1, 48], strides = [1, 1]} : vector<24x128xf32> to vector<1x48xf32>
    %392 = vector.extract_strided_slice %10 {offsets = [19, 0], sizes = [1, 48], strides = [1, 1]} : vector<24x128xf32> to vector<1x48xf32>
    %cst_114 = arith.constant dense<0.000000e+00> : vector<16xf32>
    %393 = vector.multi_reduction <add>, %390, %cst_114 [1] : vector<16x48xf32> to vector<16xf32>
    %394 = vector.shape_cast %393 : vector<16xf32> to vector<16x1xf32>
    %cst_115 = arith.constant 4.800000e+01 : f32
    %395 = vector.broadcast %cst_115 : f32 to vector<16x1xf32>
    %396 = arith.divf %394, %395 : vector<16x1xf32>
    %397 = vector.broadcast %396 : vector<16x1xf32> to vector<16x48xf32>
    %398 = arith.subf %390, %397 : vector<16x48xf32>
    %399 = arith.mulf %398, %398 : vector<16x48xf32>
    %cst_116 = arith.constant dense<0.000000e+00> : vector<16xf32>
    %400 = vector.multi_reduction <add>, %399, %cst_116 [1] : vector<16x48xf32> to vector<16xf32>
    %401 = vector.shape_cast %400 : vector<16xf32> to vector<16x1xf32>
    %cst_117 = arith.constant 4.800000e+01 : f32
    %402 = vector.broadcast %cst_117 : f32 to vector<16x1xf32>
    %403 = arith.divf %401, %402 : vector<16x1xf32>
    %404 = vector.broadcast %396 : vector<16x1xf32> to vector<16x48xf32>
    %405 = arith.subf %390, %404 : vector<16x48xf32>
    %cst_118 = arith.constant 9.99999974E-6 : f32
    %406 = vector.broadcast %cst_118 : f32 to vector<16x1xf32>
    %407 = arith.addf %403, %406 : vector<16x1xf32>
    %408 = math.rsqrt %407 : vector<16x1xf32>
    %409 = vector.broadcast %408 : vector<16x1xf32> to vector<16x48xf32>
    %410 = arith.mulf %405, %409 : vector<16x48xf32>
    %411 = vector.broadcast %391 : vector<1x48xf32> to vector<16x48xf32>
    %412 = arith.mulf %410, %411 : vector<16x48xf32>
    %413 = vector.broadcast %392 : vector<1x48xf32> to vector<16x48xf32>
    %414 = arith.addf %412, %413 : vector<16x48xf32>
    %415 = vector.broadcast %3 : vector<16x1xf32> to vector<16x48xf32>
    %416 = arith.mulf %414, %415 : vector<16x48xf32>
    %417 = vector.extract_strided_slice %10 {offsets = [20, 0], sizes = [1, 48], strides = [1, 1]} : vector<24x128xf32> to vector<1x48xf32>
    %cst_119 = arith.constant dense<0.000000e+00> : vector<1x16xf32>
    %418 = tpu.matmul %417, %416, %cst_119 {dimension_numbers = #tpu.dot_dimension_numbers<[1], [1], [0], [0], [0, 0, 1, 0], [], []>} : vector<1x48xf32>, vector<16x48xf32>, vector<1x16xf32> -> vector<1x16xf32>
    %419 = vector.extract_strided_slice %10 {offsets = [21, 0], sizes = [1, 1], strides = [1, 1]} : vector<24x128xf32> to vector<1x1xf32>
    %420 = vector.broadcast %419 : vector<1x1xf32> to vector<1x16xf32>
    %421 = arith.addf %418, %420 : vector<1x16xf32>
    %422 = arith.mulf %421, %5 : vector<1x16xf32>
    %423 = math.exp %422 : vector<1x16xf32>
    %cst_120 = arith.constant 1.000000e+00 : f32
    %424 = vector.broadcast %cst_120 : f32 to vector<1x16xf32>
    %425 = arith.subf %423, %424 : vector<1x16xf32>
    %cst_121 = arith.constant 0.000000e+00 : f32
    %426 = vector.broadcast %cst_121 : f32 to vector<1x16xf32>
    %427 = arith.maximumf %425, %426 : vector<1x16xf32>
    %c0_122 = arith.constant 0 : index
    %c0_123 = arith.constant 0 : index
    %c0_124 = arith.constant 0 : index
    %428 = vector.load %arg13[%c0_122, %c0_123, %c0_124] : memref<1x1x16xf32, #tpu.memory_space<vmem>>, vector<1x1x16xf32>
    %429 = vector.shape_cast %428 : vector<1x1x16xf32> to vector<1x16xf32>
    %430 = vector.shape_cast %427 : vector<1x16xf32> to vector<1x1x16xf32>
    tpu.vector_store %arg13[%c0_122, %c0_123, %c0_124], %430 {strides = array<i32>} : memref<1x1x16xf32, #tpu.memory_space<vmem>>, vector<1x1x16xf32>,
    return
  }
  func.func @transform_0(%arg0: i32) -> (i32, i32, i32) {
    %c0_i32 = arith.constant 0 : i32
    %c0_i32_0 = arith.constant 0 : i32
    %c0_i32_1 = arith.constant 0 : i32
    return %arg0, %c0_i32, %c0_i32_0 : i32, i32, i32
  }
  func.func @transform_1(%arg0: i32) -> (i32, i32, i32) {
    %c0_i32 = arith.constant 0 : i32
    %c0_i32_0 = arith.constant 0 : i32
    %c0_i32_1 = arith.constant 0 : i32
    return %arg0, %c0_i32, %c0_i32_0 : i32, i32, i32
  }
  func.func @transform_2(%arg0: i32) -> (i32, i32, i32) {
    %c0_i32 = arith.constant 0 : i32
    %c0_i32_0 = arith.constant 0 : i32
    %c0_i32_1 = arith.constant 0 : i32
    return %arg0, %c0_i32, %c0_i32_0 : i32, i32, i32
  }
  func.func @transform_3(%arg0: i32) -> (i32, i32, i32) {
    %c0_i32 = arith.constant 0 : i32
    %c0_i32_0 = arith.constant 0 : i32
    %c0_i32_1 = arith.constant 0 : i32
    return %arg0, %c0_i32, %c0_i32_0 : i32, i32, i32
  }
  func.func @transform_4(%arg0: i32) -> (i32, i32) {
    %c0_i32 = arith.constant 0 : i32
    %c0_i32_0 = arith.constant 0 : i32
    %c0_i32_1 = arith.constant 0 : i32
    return %c0_i32, %c0_i32_0 : i32, i32
  }
  func.func @transform_5(%arg0: i32) -> (i32, i32, i32) {
    %c0_i32 = arith.constant 0 : i32
    %c0_i32_0 = arith.constant 0 : i32
    %c0_i32_1 = arith.constant 0 : i32
    %c0_i32_2 = arith.constant 0 : i32
    return %c0_i32, %c0_i32_0, %c0_i32_1 : i32, i32, i32
  }
  func.func @transform_6(%arg0: i32) -> (i32, i32, i32) {
    %c0_i32 = arith.constant 0 : i32
    %c0_i32_0 = arith.constant 0 : i32
    %c0_i32_1 = arith.constant 0 : i32
    %c0_i32_2 = arith.constant 0 : i32
    return %c0_i32, %c0_i32_0, %c0_i32_1 : i32, i32, i32
  }
  func.func @transform_7(%arg0: i32) -> (i32, i32, i32) {
    %c0_i32 = arith.constant 0 : i32
    %c0_i32_0 = arith.constant 0 : i32
    %c0_i32_1 = arith.constant 0 : i32
    %c0_i32_2 = arith.constant 0 : i32
    return %c0_i32, %c0_i32_0, %c0_i32_1 : i32, i32, i32
  }
  func.func @transform_8(%arg0: i32) -> (i32, i32, i32) {
    %c0_i32 = arith.constant 0 : i32
    %c0_i32_0 = arith.constant 0 : i32
    %c0_i32_1 = arith.constant 0 : i32
    %c0_i32_2 = arith.constant 0 : i32
    return %c0_i32, %c0_i32_0, %c0_i32_1 : i32, i32, i32
  }
  func.func @transform_9(%arg0: i32) -> (i32, i32) {
    %c0_i32 = arith.constant 0 : i32
    %c0_i32_0 = arith.constant 0 : i32
    %c0_i32_1 = arith.constant 0 : i32
    return %c0_i32, %c0_i32_0 : i32, i32
  }
  func.func @transform_10(%arg0: i32) -> (i32, i32) {
    %c0_i32 = arith.constant 0 : i32
    %c0_i32_0 = arith.constant 0 : i32
    %c0_i32_1 = arith.constant 0 : i32
    return %c0_i32, %c0_i32_0 : i32, i32
  }
  func.func @transform_11(%arg0: i32) -> (i32, i32, i32) {
    %c0_i32 = arith.constant 0 : i32
    %c0_i32_0 = arith.constant 0 : i32
    %c0_i32_1 = arith.constant 0 : i32
    return %arg0, %c0_i32, %c0_i32_0 : i32, i32, i32
  }
  func.func @transform_12(%arg0: i32) -> (i32, i32, i32) {
    %c0_i32 = arith.constant 0 : i32
    %c0_i32_0 = arith.constant 0 : i32
    %c0_i32_1 = arith.constant 0 : i32
    return %arg0, %c0_i32, %c0_i32_0 : i32, i32, i32
  }
}

</mosaic_0001>

<bundles_post_ra>
// kernel: tpu_custom_call.1
= control target key start
LH: loop header
LB: loop body
LE: loop exit
PB: predicated region body
PF: predicated region fallthrough
CT: control target
= control target key end

     0   :  { %s5086_s0 = inlined_call_operand.vmem [shape: f32[2,16,32], index: 0, kind: input, shape index: {}]   ;;  %s5087_s1 = inlined_call_operand.hbm [shape: f32[2,16,32], index: 1, kind: input, shape index: {}]   ;;  %s5088_s2 = inlined_call_operand.vmem [shape: f32[2,16,1], index: 2, kind: input, shape index: {}]   ;;  %s5089_s3 = inlined_call_operand.hbm [shape: f32[2,1,16], index: 3, kind: input, shape index: {}]   ;;  %s5090_s4 = inlined_call_operand.hbm [shape: f32[24,128], index: 4, kind: input, shape index: {}]   ;;  %s5091_s5 = inlined_call_operand.hbm [shape: bf16[2,32,96], index: 5, kind: input, shape index: {}]   ;;  %s5092_s6 = inlined_call_operand.hbm [shape: bf16[2,32,32], index: 6, kind: input, shape index: {}]   ;;  %s5093_s7 = inlined_call_operand.vmem [shape: bf16[2,288,128], index: 7, kind: input, shape index: {}]   ;;  %s5094_s8 = inlined_call_operand.vmem [shape: bf16[2,128,32], index: 8, kind: input, shape index: {}]   ;;  %s5095_s9 = inlined_call_operand.vmem [shape: bf16[96,48], index: 9, kind: input, shape index: {}]   ;;  %s5096_s10 = inlined_call_operand.vmem [shape: bf16[144,48], index: 10, kind: input, shape index: {}]   ;;  %s5097_s11 = inlined_call_operand.hbm [shape: f32[2,16,32], index: 11, kind: output, shape index: {0}]   ;;  %s5098_s12 = inlined_call_operand.hbm [shape: f32[2,1,16], index: 12, kind: output, shape index: {1}]  }
   0x1   :  { %5112 = sst [smem:[#allocation25_spill]] %s5087_s1 }
   0x2   :  { %5113 = sst [smem:[#allocation26_spill]] %s5090_s4 }
   0x3   :  { %5114 = sst [smem:[#allocation27_spill]] %s5091_s5 }
   0x4   :  { %5115 = sst [smem:[#allocation28_spill]] %s5092_s6 }
   0x5   :  { %18 = vsyncpa [#allocation3], 0 }
   0x6   :  { %20 = vsyncpa [#allocation3 + $0x1], 0 }
   0x7   :  { %21 = vsyncpa [#allocation6], 0 }
   0x8   :  { %23 = vsyncpa [#allocation6 + $0x1], 0 }
   0x9   :  { %24 = vsyncpa [#allocation9], 0 }
   0xa   :  { %25 = vsyncpa [#allocation4], 0 }
   0xb   :  { %27 = vsyncpa [#allocation4 + $0x1], 0 }
   0xc   :  { %28 = vsyncpa [#allocation13], 0 }
   0xd   :  { %30 = vsyncpa [#allocation13 + $0x1], 0  ;;  %s4157_s21 = smov 0   ;;  %s4159_s22 = smov 0  }
   0xe   :  { %s4161_s23 = smov 0   ;;  %s4163_s24 = smov 0  }
   0xf LB: > { %5116 = sst [smem:[#allocation20_spill]] %s4055_s21  ;;  %s4178_s25 = sadd.s32 4294967295, %s4067_s24   ;;  %s4067_s24 = sphi %s4163_s24, %s5150_s24   ;;  %s4063_s23 = sphi %s4161_s23, %s5152_s23   ;;  %s4059_s22 = sphi %s4159_s22, %s5154_s22   ;;  %s4055_s21 = sphi %s4157_s21, %s5153_s21  }
  0x10   : > { %5117 = sst [smem:[#allocation21_spill]] %s4063_s23  ;;  %s3123_s26 = sadd.s32 4294967294, %s4067_s24  }
  0x11   : > { %p82_p0 = scmp.ne.s32.totalorder %s4059_s22, %s4055_s21  ;;  %p5102_p1 = scmp.eq.s32.totalorder %s4178_s25, 0 }
  0x12   : > { %p305_p2 = scmp.eq.s32.totalorder %s4178_s25, 1  ;;  %p311_p3 = scmp.eq.s32.totalorder %s3123_s26, 1 }
  0x13   : > { %p4187_p4 = por %p5102_p1, %p82_p0  ;;  %p3124_p5 = scmp.ge.s32.totalorder %s4067_s24, 1 }
  0x14   : > { %p4192_p6 = por %p311_p3, %p82_p0  ;;  %p344_p7 = scmp.lt.s32.totalorder %s4067_s24, 3 }
  0x15   : > { %s5118_s27 = scalar_select %p4187_p4, 1, 0 }
  0x16   : > { %s5119_s28 = scalar_select %p4192_p6, 1, 0 }
  0x17   : > { %p4197_p8 = pnand %p3124_p5, %p344_p7  ;;  %s4069_s30 = smov [#allocation7]  }
  0x18   : > { %5120 = sst [smem:[#allocation22_spill]] %s5119_s28  ;;  %s356_s13 = sshll.u32 %s4069_s30, 4  ;;  %s357_s13 = int_to_ptr.vmem [resolvable:$true] %s356_s13 }
  0x19   : > { %s5121_s29 = scalar_select %p4197_p8, 1, 0 }
  0x1a   : > { %p3586_p9 = pneg %p4197_p8  ;;  %s4070_s15 = smov [#allocation8]  }
  0x1b   : > { %s369_s16 = sshll.u32 %s4070_s15, 4  ;;  %s3838_s17 = scalar_lea.vmem %s357_s13, 384  ;;  %s370_s16 = int_to_ptr.vmem [resolvable:$true] %s369_s16 }
  0x1c   : > { %p4206_p11 = pnand %p3586_p9, %p5102_p1  ;;  %p3839_p13 = scmp.ne.s32.totalorder %s357_s13, %s3838_s17 }
  0x1d   : > { %p3846_p5 = scmp.lt.s32.totalorder %s357_s13, %s357_s13  ;;  %p3847_p7 = scmp.lt.s32.totalorder %s3838_s17, %s3838_s17 }
  0x1e   : > { %p3829_p12 = pneg %p4206_p11 }
  0x1f   : > { %p3848_p10 = por %p3847_p7, %p3846_p5 }
  0x20   : > { %p3841_p0 = pnand %p3839_p13, %p3829_p12 }
  0x22   : > { %p3842_p3 = pneg %p3841_p0 }
  0x24   : > { %p3849_p9 = pnand %p3848_p10, %p3842_p3 }
  0x26   : > { %3852 = shalt.err (!%p3849_p9)
}
  0x27   : > { %s5100_s18 = smov 128   ;;  %s5101_s19 = smov 8  }
  0x28   : > { %s5123_s4 = sld [smem:[#allocation26_spill]]  ;;  %s3864_s30 = scalar_lea.vmem %s370_s16, 512 }
  0x29   : > { %p3865_p13 = scmp.ne.s32.totalorder %s370_s16, %s3864_s30  ;;  %p3872_p10 = scmp.lt.s32.totalorder %s370_s16, %s370_s16 }
  0x2a   : > { %p3873_p3 = scmp.lt.s32.totalorder %s3864_s30, %s3864_s30 }
  0x2b   : > { %p3867_p0 = pnand %p3865_p13, %p3829_p12 }
  0x2c   : > { %p3874_p7 = por %p3873_p3, %p3872_p10 }
  0x2d   : > { %p3868_p5 = pneg %p3867_p0 }
  0x2e   : > { %3589 = dma.hbm_to_vmem [thread:$0]  (!%p4206_p11), %s5123_s4, 384, %s357_s13, [#allocation6], %s5100_s18, %s5100_s18, %s5101_s19  }
  0x2f   : > { %p3875_p9 = pnand %p3874_p7, %p3868_p5 }
  0x31   : > { %3878 = shalt.err (!%p3875_p9)
}
  0x32   : > { %s4073_s15 = smov 64   ;;  %s4074_s17 = smov 4  }
  0x33   : > { %s5124_s5 = sld [smem:[#allocation27_spill]]  ;;  %s4075_s13 = smov [#allocation10]  }
  0x34   : > { %s382_s26 = sshll.u32 %s4075_s13, 4  ;;  %s4232_s18 = sadd.s32 1, %s4067_s24   ;;  %s383_s26 = int_to_ptr.vmem [resolvable:$true] %s382_s26 }
  0x35   : > { %5125 = sst [smem:[#allocation23_spill]] %s4232_s18  ;;  %s3890_s19 = scalar_lea.vmem %s383_s26, 512 }
  0x36   : > { %p3891_p13 = scmp.ne.s32.totalorder %s383_s26, %s3890_s19  ;;  %p3898_p10 = scmp.lt.s32.totalorder %s383_s26, %s383_s26 }
  0x37   : > { %p3899_p3 = scmp.lt.s32.totalorder %s3890_s19, %s3890_s19 }
  0x38   : > { %p3893_p0 = pnand %p3891_p13, %p3829_p12 }
  0x39   : > { %3592 = dma.hbm_to_vmem [thread:$0]  (!%p4206_p11), %s5124_s5, 512, %s370_s16, [#allocation9], %s4073_s15, %s4073_s15, %s4074_s17  }
  0x3a   : > { %p3894_p5 = pneg %p3893_p0  ;;  %p3900_p7 = por %p3899_p3, %p3898_p10 }
  0x3c   : > { %p3901_p9 = pnand %p3900_p7, %p3894_p5 }
  0x3e   : > { %3904 = shalt.err (!%p3901_p9)
}
  0x3f   : > { %s5126_s6 = sld [smem:[#allocation28_spill]]  ;;  %s66_s19 = ssub.s32 %s4067_s24, %s4232_s18 }
  0x40   : > { %s69_s30 = sadd.s32 1, %s4063_s23  ;;  %p67_p12 = scmp.eq.s32.totalorder %s66_s19, 0 }
  0x41   : > { %p76_p13 = scmp.ne.s32.totalorder %s4063_s23, %s4059_s22  ;;  %p77_p0 = scmp.eq.s32.totalorder %s4067_s24, 0 }
  0x42   : > { %p3613_p5 = scmp.lt.s32.totalorder %s4067_s24, 2  ;;  %s4259_s13 = sand.u32 1, %s4063_s23  }
  0x43   : > { %s4250_s14 = scalar_select %p67_p12, %s4063_s23, %s69_s30  }
  0x44   : > { %p78_p10 = por %p77_p0, %p76_p13  ;;  %p4254_p3 = por %p305_p2, %p76_p13 }
  0x45   : > { %3595 = dma.hbm_to_vmem [thread:$0]  (!%p4206_p11), %s5126_s6, 512, %s383_s26, [#allocation9], %s4073_s15, %s4073_s15, %s4074_s17  }
  0x46   : > { %5127 = sst [smem:[#allocation24_spill]] %s4250_s14  ;;  %s3297_s15 = sshll.u32 %s4067_s24, 8 }
  0x47   : > { %s5128_s20 = scalar_select %p4254_p3, 1, 0 }
  0x48   : > { %s3129_s17 = sshll.u32 %s4259_s13, 4  ;;  %s5129_s1 = sld [smem:[#allocation25_spill]] }
  0x49   : > { %s420_s19 = scalar_lea.vmem [#allocation2], %s3129_s17  ;;  %p4268_p2 = pnand %p3613_p5, %p78_p10 }
  0x4a   : > { %s427_s30 = sshll.u32 %s420_s19, 4  ;;  %s4272_s30 = int_to_ptr.vmem [resolvable:$true] %s427_s30 }
  0x4b   : > { %p3907_p7 = pneg %p4268_p2 }
  0x4e   : > { %s4266_s16 = scalar_lea.hbm %s5129_s1, %s3297_s15  ;;  %s3910_s26 = scalar_lea.hbm %s5129_s1, 512 }
  0x4f   : > { %s3905_s14 = scalar_lea.hbm %s4266_s16, 256  ;;  %p3911_p13 = scmp.lt.s32.totalorder %s4266_s16, %s5129_s1 }
  0x50   : > { %p3906_p11 = scmp.ne.s32.totalorder %s4266_s16, %s3905_s14  ;;  %p3912_p0 = scmp.lt.s32.totalorder %s3910_s26, %s3905_s14 }
  0x52   : > { %p3908_p9 = pnand %p3907_p7, %p3906_p11  ;;  %p3913_p5 = por %p3912_p0, %p3911_p13 }
  0x54   : > { %p3909_p12 = pneg %p3908_p9 }
  0x56   : > { %p3914_p10 = pnand %p3913_p5, %p3909_p12 }
  0x58   : > { %3917 = shalt.err (!%p3914_p10)
}
  0x59   : > { %s3918_s5 = scalar_lea.vmem %s4272_s30, 256  ;;  %s4076_s15 = smov [#allocation2]  }
  0x5a   : > { %p3919_p1 = scmp.ne.s32.totalorder %s4272_s30, %s3918_s5  ;;  %s3923_s17 = sshll.u32 %s4076_s15, 4  ;;  %s3924_s17 = int_to_ptr.vmem [resolvable:$false] %s3923_s17 }
  0x5b   : > { %s3925_s6 = scalar_lea.vmem %s3924_s17, 512  ;;  %p3926_p6 = scmp.lt.s32.totalorder %s4272_s30, %s3924_s17 }
  0x5c   : > { %p3921_p11 = pnand %p3919_p1, %p3907_p7  ;;  %p3927_p3 = scmp.lt.s32.totalorder %s3925_s6, %s3918_s5 }
  0x5e   : > { %p3922_p9 = pneg %p3921_p11  ;;  %p3928_p4 = por %p3927_p3, %p3926_p6 }
  0x60   : > { %p3929_p13 = pnand %p3928_p4, %p3922_p9 }
  0x62   : > { %3932 = shalt.err (!%p3929_p13)
}
  0x63   : > { %s5131_s14 = smov 8   ;;  %s5132_s26 = smov 128  }
  0x64   : > { %s5133_s28 = scalar_lea.sflag [#allocation3], %s4259_s13  ;;  %s3132_s19 = sshll.u32 %s4067_s24, 4 }
  0x65   : > { %3599 = dma.hbm_to_vmem [thread:$0]  (!%p4268_p2), %s4266_s16, 256, %s4272_s30, %s5133_s28, %s5132_s26, %s5132_s26, %s5131_s14  }
  0x66   : > { %s4309_s6 = scalar_lea.hbm %s5089_s3, %s3132_s19  ;;  %s448_s17 = scalar_lea.vmem [#allocation5], %s4259_s13 }
  0x67   : > { %s455_s1 = sshll.u32 %s448_s17, 4  ;;  %s5134_s23 = sand.u32 1, %s4067_s24   ;;  %s456_s1 = int_to_ptr.vmem [resolvable:$true] %s455_s1 }
  0x68   : > { %s446_s18 = scalar_lea.sflag [#allocation6], %s5134_s23  ;;  %s3933_s21 = scalar_lea.hbm %s4309_s6, 16 }
  0x69   : > { %p3934_p1 = scmp.ne.s32.totalorder %s4309_s6, %s3933_s21  ;;  %s3938_s14 = scalar_lea.hbm %s5089_s3, 32 }
  0x6a   : > { %p3939_p3 = scmp.lt.s32.totalorder %s4309_s6, %s5089_s3  ;;  %p3940_p12 = scmp.lt.s32.totalorder %s3938_s14, %s3933_s21 }
  0x6b   : > { %p3936_p4 = pnand %p3934_p1, %p3907_p7 }
  0x6c   : > { %p3941_p0 = por %p3940_p12, %p3939_p3 }
  0x6d   : > { %p3937_p6 = pneg %p3936_p4 }
  0x6f   : > { %p3942_p5 = pnand %p3941_p0, %p3937_p6 }
  0x71   : > { %3945 = shalt.err (!%p3942_p5)
}
  0x72   : > { %s3946_s13 = scalar_lea.vmem %s456_s1, 16  ;;  %s4077_s23 = smov [#allocation5]  }
  0x73   : > { %p3947_p10 = scmp.ne.s32.totalorder %s456_s1, %s3946_s13  ;;  %s3951_s19 = sshll.u32 %s4077_s23, 4  ;;  %s3952_s19 = int_to_ptr.vmem [resolvable:$false] %s3951_s19 }
  0x74   : > { %s3953_s15 = scalar_lea.vmem %s3952_s19, 32  ;;  %p3954_p13 = scmp.lt.s32.totalorder %s456_s1, %s3952_s19 }
  0x75   : > { %p3949_p11 = pnand %p3947_p10, %p3907_p7  ;;  %p3955_p1 = scmp.lt.s32.totalorder %s3953_s15, %s3946_s13 }
  0x77   : > { %p3950_p9 = pneg %p3949_p11  ;;  %p3956_p4 = por %p3955_p1, %p3954_p13 }
  0x79   : > { %p3957_p8 = pnand %p3956_p4, %p3950_p9 }
  0x7b   : > { %3960 = shalt.err (!%p3957_p8)
}
  0x7c   : > { %3602 = dma.hbm_to_vmem [thread:$0]  (!%p4268_p2), %s4309_s6, 16, %s456_s1, %s446_s18  }
  0x7d   : > { %p5135_p6 = scmp.ne.s32.totalorder %s5121_s29, 0 }
  0x7e   : > { %s4335_s21 = sand.u32 (!%p5135_p6), 1, %s4059_s22   ;;  %p5136_p8 = scmp.ne.s32.totalorder (!%p5135_p6), %s5118_s27, 0 }
  0x7f   : > { %464 = sbr.rel (%p5135_p6) target bundleno = 7104 (0x1bc0), region = 64  ;;  %s5111_s5 = sshll.u32 (!%p5135_p6), %s4335_s21, 4 }
  0x80   : > { %s467_s17 = scalar_lea.sflag (!%p5135_p6), [#allocation3], %s4335_s21  ;;  %s4341_s16 = scalar_lea.vmem (!%p5135_p6), [#allocation2], %s5111_s5 }
  0x84   : > { %4030 = dma.done.wait (%p5136_p8), %s467_s17, 256  }
  0x85   : > { %4032 = vsyncadd (%p5136_p8), %s467_s17, 4294967040  ;;  %s475_s1 = sand.u32 1, %s4178_s25   ;;  %s5110_s29 = scalar_lea.vmem [#allocation5], %s4335_s21 }
  0x86   : > { %s476_s4 = scalar_lea.sflag [#allocation6], %s475_s1 }
  0x87   : > { %4034 = dma.done.wait (%p5136_p8), %s476_s4, 16  }
  0x88   : > { %4036 = vsyncadd (%p5136_p8), %s476_s4, 4294967280  ;;  %p5137_p2 = scmp.eq.s32.totalorder %s4178_s25, 0 }
  0x8a   : > { %4038 = dma.done.wait (%p5137_p2), [#allocation6], 384   ;;  %p5138_p7 = pmov %p5137_p2 }
  0x8b   : > { %p5139_p3 = pmov %p5137_p2 }
  0x8c   : > { %4040 = vsyncadd (%p5138_p7), [#allocation6], 4294966912 }
  0x8d   : > { %4042 = dma.done.wait (%p5139_p3), [#allocation9], 1024   ;;  %p5140_p12 = pmov %p5137_p2 }
  0x8e   : > { %p549_p0 = scmp.lt.s32.totalorder %s4178_s25, 1  ;;  %vm570_vm0 = vcmask 261120   ;;  %v3681_v14 = vld [vmem:[#allocation8 + $0x8] sm:$0xff]   ;;  %v4078_v15 = vmov 0.0   ;;  %vm4079_vm1 = vmmov 0   ;;  %v3682_v16 = vld [vmem:[#allocation8] sm:$0xff]   ;;  %v598_v23 = vlaneseq }
  0x8f   : > { %4044 = vsyncadd (%p5140_p12), [#allocation9], 4294966272  ;;  %3407 = vmatprep.subr.bf16.mxu1 %v4078_v15  ;;  %3411 = vmatprep.mubr.msk.bf16.mxu1 %vm4079_vm1, %v4078_v15  ;;  %v4396_v26 = vld [vmem:[#allocation7] sm:$0xff]  ;;  %s4080_s26 = smov 80   ;;  %s4081_s28 = smov 96   ;;  %vm681_vm2 = vcmask 130048  }
  0x90   : > { %s4363_s18 = scalar_select %p549_p0, %s4178_s25, 1  ;;  %3408 = vmatpush3.bf16.msra.mxu1 %v3681_v14  ;;  %3421 = vmatprep.subr.bf16.mxu0 %v4078_v15  ;;  %v4391_v24 = vshrl.u32 %v598_v23, 7  ;;  %v564_v49 = vld [vmem:[%s5110_s29] sm:$0x1]  ;;  %vm1082_vm3 = vcmask 1041408   ;;  %vm1150_vm4 = vcmask 1043456  }
  0x91   : > { %3409 = vmatprep.subr.bf16.mxu1 %v4078_v15  ;;  %3423 = vmatprep.mubr.msk.bf16.mxu0 %vm4079_vm1, %v4078_v15  ;;  %s4082_s13 = smov 112   ;;  %v3143_v50 = vadd.f32 -1.0, %v564_v49  ;;  %s4083_s23 = smov 64   ;;  %vm1134_vm5 = vcmask 1044480   ;;  %vm1102_vm6 = vcmask 1046528   ;;  %vm1120_vm11 = vcmask 1045504  }
  0x92   : > { %s3298_s27 = sshll.u32 %s4363_s18, 4  ;;  %v4394_v25 = vsub.s32 0, %v4391_v24  ;;  %v4401_v30 = vsub.s32 1, %v4391_v24  ;;  %s4084_s19 = smov 48   ;;  %vm1124_vm7 = vsmask.f32 5376 }
  0x93   : > { %s553_s14 = scalar_lea.vmem %s5086_s0, %s3298_s27  ;;  %v566_v51 = vmul.f32 1e+09, %v3143_v50  ;;  %s558_s1 = scalar_lea.vmem %s5088_s2, %s3298_s27  ;;  %vm1087_vm8 = vsmask.f32 7424  ;;  %vm1140_vm9 = vsmask.f32 4352 }
  0x94   : > { %v4371_v0 = vld [vmem:[%s553_s14] sm:$0xff]  ;;  %v4373_v1 = vld [vmem:[%s553_s14 + $0x8] sm:$0xff]  ;;  %3410 = vmatpush3.bf16.msra.mxu1 %v3682_v16  ;;  %v601_v29 = vrot.slane %v4396_v26, %v4394_v25  ;;  %v607_v34 = vrot.slane %v4396_v26, %v4401_v30  ;;  %s4086_s4 = smov 16   ;;  %s4087_s17 = smov 32   ;;  %vm1108_vm10 = vsmask.f32 6400 }
  0x95   : > { %v571_v2 = vsel %vm570_vm0, %v4371_v0, 0.0  ;;  %v574_v3 = vsel %vm570_vm0, %v4373_v1, 0.0  ;;  %3415 = vmatprep.subr.bf16.mxu1 %v4078_v15  ;;  %v4430_v52 = vrot.slane %v566_v51, %v4394_v25  ;;  %v3684_v51 = vld [vmem:[#allocation10] sm:$0xff]   ;;  %vm1156_vm12 = vcmask 523264   ;;  %s2920_s5 = scalar_lea.sflag [#allocation4], %s4335_s21  ;;  %p5144_p10 = scmp.ne.s32.totalorder %s5128_s20, 0 }
  0x96   : > { %572 = vadd.xlane.f32.xlu0 %v571_v2  ;;  %vm1159_vm13 = vcmask 785408   ;;  %vm2471_vm14 = vcmask 1040384   ;;  %vm2472_vm15 = vsmask.f32 256 }
  0x9a   : > { %575 = vadd.xlane.f32.xlu0 %v574_v3 }
 0x11f   : > { %v573_v4 = vpop.xlane.xlu0 %572 }
 0x120   : > { %v578_v5 = vmul.f32 0.03125, %v573_v4 }
 0x122   : > { %v580_v6 = vsub.f32 %v4371_v0, %v578_v5 }
 0x123   : > { %v576_v7 = vpop.xlane.xlu0 %575 }
 0x124   : > { %v579_v8 = vmul.f32 0.03125, %v576_v7  ;;  %v582_v9 = vmul.f32 %v580_v6, %v580_v6 }
 0x126   : > { %v581_v10 = vsub.f32 %v4373_v1, %v579_v8  ;;  %v584_v11 = vsel %vm570_vm0, %v582_v9, 0.0 }
 0x127   : > { %585 = vadd.xlane.f32.xlu1 %v584_v11 }
 0x128   : > { %v583_v12 = vmul.f32 %v581_v10, %v581_v10 }
 0x12a   : > { %v587_v13 = vsel %vm570_vm0, %v583_v12, 0.0 }
 0x12b   : > { %588 = vadd.xlane.f32.xlu1 %v587_v13 }
 0x1b0   : > { %v586_v17 = vpop.xlane.xlu1 %585 }
 0x1b1   : > { %v590_v18 = vmul.f32 0.03125, %v586_v17 }
 0x1b3   : > { %v592_v19 = vadd.f32 1e-05, %v590_v18 }
 0x1b4   : > { %v589_v20 = vpop.xlane.xlu1 %588 }
 0x1b5   : > { %3756 = vrsqrt.f32 %v592_v19  ;;  %v591_v21 = vmul.f32 0.03125, %v589_v20 }
 0x1b7   : > { %v593_v22 = vadd.f32 1e-05, %v591_v21 }
 0x1b9   : > { %3758 = vrsqrt.f32 %v593_v22 }
 0x1c2   : > { %v3757_v27 = vpop.eup %3756 }
 0x1c3   : > { %v596_v28 = vmul.f32 %v3757_v27, %v580_v6 }
 0x1c5   : > { %v602_v33 = vmul.f32 %v601_v29, %v596_v28 }
 0x1c6   : > { %v3759_v31 = vpop.eup %3758 }
 0x1c7   : > { %v597_v32 = vmul.f32 %v3759_v31, %v581_v10  ;;  %v608_v36 = vadd.f32 %v607_v34, %v602_v33 }
 0x1c9   : > { %v603_v35 = vmul.f32 %v601_v29, %v597_v32 }
 0x1cb   : > { %v609_v37 = vadd.f32 %v607_v34, %v603_v35 }
 0x1cd   : > { %v610_v38 = vpack.c.bf16 %v609_v37, %v608_v36 }
 0x1cf   : > { %3412 = vmatmul.mubr.msk.bf16.vlgmr.msra.gmra.mxu1 %vm570_vm0, %v610_v38 }
 0x1d0   : > { %3417 = vmatprep.mubr.msk.bf16.mxu1 %vm4079_vm1, %v4078_v15 }
 0x28f   : > { %v664_v39 = vpop.f32.mrf.mxu1 }
 0x291   : > { %v3413_v40 = vpop.f32.mrf.mxu1 }
 0x293   : > { %v667_v41 = vpop.f32.mrf.mxu1 }
 0x294   : > { %v4408_v42 = vpack.c.bf16 %v667_v41, %v664_v39 }
 0x295   : > { %v3414_v43 = vpop.f32.mrf.mxu1 }
 0x296   : > { %801 = vrot.lane.b32.xlu1 %v4408_v42, %s4080_s26  ;;  %679 = vrot.lane.b32.xlu0 %v4408_v42, %s4081_s28 }
 0x29a   : > { %799 = vrot.lane.b32.xlu1 %v4408_v42, %s4082_s13 }
 0x308   : > { %v680_v44 = vpop.permute.xlu0 %679  ;;  %v802_v46 = vpop.permute.xlu1 %801 }
 0x309   : > { %v686_v45 = vsel %vm681_vm2, %v680_v44, 0  ;;  %v807_v47 = vsel %vm681_vm2, %v802_v46, 0 }
 0x30a   : > { %3416 = vmatpush3.bf16.xpose.msra.mxu1 %v686_v45 }
 0x30b   : > { %3427 = vmatprep.subr.bf16.mxu1 %v4078_v15 }
 0x30c   : > { %v800_v48 = vpop.permute.xlu1 %799 }
 0x311   : > { %3418 = vmatmul.mubr.msk.bf16.vlgmr.msra.gmra.mxu1 %vm681_vm2, %v4408_v42 }
 0x312   : > { %3428 = vmatpush3.bf16.xpose.msra.mxu1 %v807_v47  ;;  %3429 = vmatprep.mubr.msk.bf16.mxu1 %vm4079_vm1, %v4078_v15 }
 0x313   : > { %3439 = vmatprep.subr.bf16.mxu1 %v4078_v15 }
 0x319   : > { %3430 = vmatmul.mubr.msk.bf16.vlgmr.msra.gmra.mxu1 %vm681_vm2, %v800_v48  ;;  %v3683_v48 = vld [vmem:[#allocation10 + $0x8] sm:$0xff]  }
 0x31a   : > { %3443 = vmatprep.mubr.msk.bf16.mxu1 %vm4079_vm1, %v4078_v15  ;;  %3440 = vmatpush3.bf16.msra.mxu1 %v3683_v48 }
 0x31b   : > { %3441 = vmatprep.subr.bf16.mxu1 %v4078_v15 }
 0x31e   : > { %3442 = vmatpush3.bf16.msra.mxu1 %v3684_v51 }
 0x31f   : > { %3447 = vmatprep.subr.bf16.mxu1 %v4078_v15 }
 0x3d1   : > { %v722_v53 = vpop.f32.mrf.mxu1 }
 0x3d2   : > { %v723_v54 = vadd.f32 %v722_v53, %v4430_v52 }
 0x3d3   : > { %v3419_v55 = vpop.f32.mrf.mxu1 }
 0x3d4   : > { %v729_v56 = vsel %vm681_vm2, %v723_v54, -inf }
 0x3d5   : > { %730 = vmax.xlane.f32.xlu1 %v729_v56  ;;  %v725_v57 = vpop.f32.mrf.mxu1  ;;  %v4085_v56 = vmov 0  }
 0x3d6   : > { %v726_v58 = vadd.f32 %v725_v57, %v4430_v52  ;;  %3674 = vset.pattern.permute.xlu1 %v4085_v56  ;;  %3680 = vset.pattern.permute.xlu0 %v4085_v56 }
 0x3d7   : > { %v3420_v59 = vpop.f32.mrf.mxu1 }
 0x3d8   : > { %v732_v60 = vsel %vm681_vm2, %v726_v58, -inf }
 0x3d9   : > { %733 = vmax.xlane.f32.xlu0 %v732_v60  ;;  %v843_v61 = vpop.f32.mrf.mxu1 }
 0x3da   : > { %v844_v62 = vadd.f32 %v843_v61, %v4430_v52  ;;  %v562_v61 = vld [vmem:[%s558_s1] sm:$0xff] }
 0x3db   : > { %v3431_v63 = vpop.f32.mrf.mxu1 }
 0x3dc   : > { %v850_v2 = vsel %vm681_vm2, %v844_v62, -inf }
 0x3dd   : > { %851 = vmax.xlane.f32.xlu0 %v850_v2  ;;  %v846_v3 = vpop.f32.mrf.mxu1 }
 0x3de   : > { %v847_v4 = vadd.f32 %v846_v3, %v4430_v52 }
 0x3df   : > { %v3432_v5 = vpop.f32.mrf.mxu1 }
 0x3e0   : > { %v853_v6 = vsel %vm681_vm2, %v847_v4, -inf }
 0x3e1   : > { %854 = vmax.xlane.f32.xlu0 %v853_v6 }
 0x45e   : > { %v731_v7 = vpop.xlane.xlu1 %730 }
 0x45f   : > { %v735_v8 = vsub.f32 %v723_v54, %v731_v7 }
 0x461   : > { %v737_v9 = vmul.f32 1.442695, %v735_v8 }
 0x462   : > { %v734_v10 = vpop.xlane.xlu0 %733 }
 0x463   : > { %3760 = vpow2.f32 %v737_v9  ;;  %v736_v11 = vsub.f32 %v726_v58, %v734_v10 }
 0x465   : > { %v739_v12 = vmul.f32 1.442695, %v736_v11 }
 0x466   : > { %v852_v13 = vpop.xlane.xlu0 %851 }
 0x467   : > { %3762 = vpow2.f32 %v739_v12  ;;  %v856_v14 = vsub.f32 %v844_v62, %v852_v13  ;;  %v563_v62 = vld [vmem:[%s558_s1 + $0x8] sm:$0xff] }
 0x469   : > { %v858_v16 = vmul.f32 1.442695, %v856_v14 }
 0x46a   : > { %v855_v17 = vpop.xlane.xlu0 %854 }
 0x46b   : > { %3764 = vpow2.f32 %v858_v16  ;;  %v857_v18 = vsub.f32 %v847_v4, %v855_v17 }
 0x46d   : > { %v860_v19 = vmul.f32 1.442695, %v857_v18 }
 0x46f   : > { %3766 = vpow2.f32 %v860_v19 }
 0x470   : > { %v3761_v20 = vpop.eup %3760 }
 0x471   : > { %v741_v21 = vsel %vm681_vm2, %v3761_v20, 0.0 }
 0x472   : > { %742 = vadd.xlane.f32.xlu1 %v741_v21 }
 0x474   : > { %v3763_v22 = vpop.eup %3762 }
 0x475   : > { %v744_v23 = vsel %vm681_vm2, %v3763_v22, 0.0 }
 0x476   : > { %745 = vadd.xlane.f32.xlu0 %v744_v23 }
 0x478   : > { %v3765_v27 = vpop.eup %3764 }
 0x479   : > { %v862_v28 = vsel %vm681_vm2, %v3765_v27, 0.0 }
 0x47a   : > { %863 = vadd.xlane.f32.xlu1 %v862_v28 }
 0x47c   : > { %v3767_v29 = vpop.eup %3766 }
 0x47d   : > { %v865_v31 = vsel %vm681_vm2, %v3767_v29, 0.0 }
 0x47e   : > { %866 = vadd.xlane.f32.xlu0 %v865_v31 }
 0x48b   : > { %752 = vrot.lane.b32.xlu1 %v4408_v42, %s4083_s23 }
 0x494   : > { %873 = vrot.lane.b32.xlu0 %v4408_v42, %s4084_s19 }
 0x4fb   : > { %v743_v32 = vpop.xlane.xlu1 %742 }
 0x4fc   : > { %3768 = vrcp.f32 %v743_v32  ;;  %v3685_v32 = vld [vmem:[%s5093_s7 + $0x88] sm:$0xff]  }
 0x4ff   : > { %v746_v33 = vpop.xlane.xlu0 %745 }
 0x500   : > { %3770 = vrcp.f32 %v746_v33  ;;  %v3686_v33 = vld [vmem:[%s5093_s7 + $0x80] sm:$0xff]  }
 0x503   : > { %v864_v34 = vpop.xlane.xlu1 %863 }
 0x504   : > { %3772 = vrcp.f32 %v864_v34  ;;  %v3687_v34 = vld [vmem:[%s5093_s7 + $0x78] sm:$0xff]  }
 0x507   : > { %v753_v35 = vpop.permute.xlu1 %752  ;;  %v867_v36 = vpop.xlane.xlu0 %866 }
 0x508   : > { %3774 = vrcp.f32 %v867_v36  ;;  %3422 = vmatpush3.bf16.msra.mxu0 %v753_v35  ;;  %v3688_v35 = vld [vmem:[%s5093_s7 + $0x38] sm:$0xff]   ;;  %v3689_v36 = vld [vmem:[%s5093_s7 + $0x70] sm:$0xff]  }
 0x509   : > { %3433 = vmatprep.subr.bf16.mxu0 %v4078_v15  ;;  %v3769_v37 = vpop.eup %3768 }
 0x50a   : > { %v749_v39 = vmul.f32 %v3769_v37, %v3761_v20  ;;  %v3690_v37 = vld [vmem:[%s5093_s7 + $0x30] sm:$0xff]  }
 0x50b   : > { %v874_v43 = vpop.permute.xlu0 %873 }
 0x50d   : > { %v3771_v38 = vpop.eup %3770 }
 0x50e   : > { %v750_v40 = vmul.f32 %v3771_v38, %v3763_v22  ;;  %v3691_v38 = vld [vmem:[%s5093_s7 + $0x68] sm:$0xff]  }
 0x510   : > { %v751_v41 = vpack.c.bf16 %v750_v40, %v749_v39  ;;  %v3692_v39 = vld [vmem:[%s5093_s7 + $0x28] sm:$0xff]   ;;  %v3693_v40 = vld [vmem:[%s5093_s7 + $0x60] sm:$0xff]  }
 0x511   : > { %v3773_v42 = vpop.eup %3772 }
 0x512   : > { %3424 = vmatmul.mubr.msk.bf16.vlgmr.msra.gmra.mxu0 %vm681_vm2, %v751_v41  ;;  %v870_v45 = vmul.f32 %v3773_v42, %v3765_v27  ;;  %v3694_v41 = vld [vmem:[%s5093_s7 + $0x20] sm:$0xff]   ;;  %v3696_v42 = vld [vmem:[%s5093_s7 + $0x18] sm:$0xff]  }
 0x513   : > { %3434 = vmatpush3.bf16.msra.mxu0 %v874_v43  ;;  %3435 = vmatprep.mubr.msk.bf16.mxu0 %vm4079_vm1, %v4078_v15  ;;  %v3695_v43 = vld [vmem:[%s5093_s7 + $0x58] sm:$0xff]  }
 0x514   : > { %3315 = vmatprep.subr.bf16.mxu0 %v3687_v34 }
 0x515   : > { %v3775_v44 = vpop.eup %3774 }
 0x516   : > { %v871_v46 = vmul.f32 %v3775_v44, %v3767_v29 }
 0x518   : > { %v872_v47 = vpack.c.bf16 %v871_v46, %v870_v45 }
 0x51a   : > { %3436 = vmatmul.mubr.msk.bf16.vlgmr.msra.gmra.mxu0 %vm681_vm2, %v872_v47 }
 0x51b   : > { %3316 = vmatpush3.bf16.msra.mxu0 %v3688_v35 }
 0x51c   : > { %3317 = vmatprep.subr.bf16.mxu0 %v3689_v36 }
 0x51f   : > { %3318 = vmatpush3.bf16.msra.mxu0 %v3690_v37 }
 0x520   : > { %3319 = vmatprep.subr.bf16.mxu0 %v3691_v38 }
 0x523   : > { %3320 = vmatpush3.bf16.msra.mxu0 %v3692_v39 }
 0x524   : > { %3321 = vmatprep.subr.bf16.mxu0 %v3693_v40 }
 0x527   : > { %3322 = vmatpush3.bf16.msra.mxu0 %v3694_v41 }
 0x528   : > { %3323 = vmatprep.subr.bf16.mxu0 %v3695_v43 }
 0x52b   : > { %3324 = vmatpush3.bf16.msra.mxu0 %v3696_v42 }
 0x5d2   : > { %v792_v49 = vpop.f32.mrf.mxu0 }
 0x5d4   : > { %v3425_v50 = vpop.f32.mrf.mxu0 }
 0x5d5   : > { %v4527_v50 = vsub.s32 2, %v4391_v24 }
 0x5d6   : > { %v795_v53 = vpop.f32.mrf.mxu0 }
 0x5d8   : > { %v3426_v54 = vpop.f32.mrf.mxu0 }
 0x5d9   : > { %v4532_v54 = vsub.s32 3, %v4391_v24 }
 0x5da   : > { %v913_v55 = vpop.f32.mrf.mxu0 }
 0x5dc   : > { %v3437_v57 = vpop.f32.mrf.mxu0 }
 0x5de   : > { %v916_v58 = vpop.f32.mrf.mxu0 }
 0x5df   : > { %v3669_v59 = vpack.i.bf16 %v916_v58, %v913_v55  ;;  %v1040_v58 = vrot.slane %v4396_v26, %v4532_v54 }
 0x5e0   : > { %v3438_v60 = vpop.f32.mrf.mxu0 }
 0x5e1   : > { %3670 = vrot.lane.b32.xlu1 %v3669_v59, %s4086_s4 }
 0x5e5   : > { %995 = vperm.xlu1 %3674, %v562_v61   ;;  %v3697_v61 = vld [vmem:[%s5093_s7 + $0x50] sm:$0xff]  }
 0x5e6   : > { %3325 = vmatprep.subr.bf16.mxu0 %v3697_v61 }
 0x5e9   : > { %1000 = vperm.xlu1 %3674, %v563_v62   ;;  %v3698_v62 = vld [vmem:[%s5093_s7 + $0x10] sm:$0xff]  }
 0x5ea   : > { %3326 = vmatpush3.bf16.msra.mxu0 %v3698_v62 }
 0x653   : > { %v3671_v63 = vpop.permute.xlu1 %3670 }
 0x654   : > { %v3673_v2 = vunpack.i.h.bf16 %v3671_v63  ;;  %v3672_v3 = vunpack.i.l.bf16 %v3671_v63 }
 0x656   : > { %v929_v4 = vsel %vm681_vm2, %v795_v53, %v3673_v2  ;;  %v928_v5 = vsel %vm681_vm2, %v792_v49, %v3672_v3  ;;  %v1034_v53 = vrot.slane %v4396_v26, %v4527_v50 }
 0x657   : > { %v930_v6 = vpack.c.bf16 %v929_v4, %v928_v5  ;;  %v3699_v5 = vld [vmem:[%s5093_s7 + $0x48] sm:$0xff]  }
 0x658   : > { %3327 = vmatprep.subr.bf16.mxu0 %v3699_v5 }
 0x659   : > { %3444 = vmatmul.mubr.msk.bf16.vlgmr.msra.gmra.mxu1 %vm570_vm0, %v930_v6  ;;  %v3700_v6 = vld [vmem:[%s5093_s7 + $0x8] sm:$0xff]  }
 0x65a   : > { %3451 = vmatprep.mubr.msk.bf16.mxu1 %vm4079_vm1, %v4078_v15  ;;  %3448 = vmatpush3.bf16.msra.mxu1 %v3685_v32 }
 0x65b   : > { %3449 = vmatprep.subr.bf16.mxu1 %v4078_v15  ;;  %3328 = vmatpush3.bf16.msra.mxu0 %v3700_v6 }
 0x65e   : > { %3450 = vmatpush3.bf16.msra.mxu1 %v3686_v33 }
 0x65f   : > { %3455 = vmatprep.subr.bf16.mxu1 %v4078_v15 }
 0x660   : > { %v4468_v7 = vpop.permute.xlu1 %995 }
 0x664   : > { %v4477_v16 = vpop.permute.xlu1 %1000 }
 0x719   : > { %v984_v8 = vpop.f32.mrf.mxu1 }
 0x71a   : > { %v991_v9 = vadd.f32 %v984_v8, %v4371_v0 }
 0x71b   : > { %v3445_v10 = vpop.f32.mrf.mxu1 }
 0x71c   : > { %v4472_v11 = vmul.f32 %v4468_v7, %v991_v9 }
 0x71d   : > { %v987_v12 = vpop.f32.mrf.mxu1 }
 0x71e   : > { %v992_v13 = vadd.f32 %v987_v12, %v4373_v1  ;;  %v1005_v14 = vsel %vm570_vm0, %v4472_v11, 0.0  ;;  %v3701_v12 = vld [vmem:[%s5093_s7 + $0x40] sm:$0xff]  }
 0x71f   : > { %1006 = vadd.xlane.f32.xlu0 %v1005_v14  ;;  %v3446_v17 = vpop.f32.mrf.mxu1  ;;  %3329 = vmatprep.subr.bf16.mxu0 %v3701_v12 }
 0x720   : > { %v4480_v18 = vmul.f32 %v4477_v16, %v992_v13 }
 0x722   : > { %v1008_v0 = vsel %vm570_vm0, %v4480_v18, 0.0 }
 0x723   : > { %1009 = vadd.xlane.f32.xlu1 %v1008_v0 }
 0x7a8   : > { %v1007_v19 = vpop.xlane.xlu0 %1006 }
 0x7a9   : > { %v1011_v20 = vmul.f32 0.03125, %v1007_v19 }
 0x7ab   : > { %v1013_v21 = vsub.f32 %v4472_v11, %v1011_v20 }
 0x7ac   : > { %v1010_v22 = vpop.xlane.xlu1 %1009 }
 0x7ad   : > { %v1012_v1 = vmul.f32 0.03125, %v1010_v22  ;;  %v1015_v23 = vmul.f32 %v1013_v21, %v1013_v21 }
 0x7af   : > { %v1014_v27 = vsub.f32 %v4480_v18, %v1012_v1  ;;  %v1017_v28 = vsel %vm570_vm0, %v1015_v23, 0.0  ;;  %v3702_v1 = vld [vmem:[%s5093_s7] sm:$0xff]  }
 0x7b0   : > { %1018 = vadd.xlane.f32.xlu0 %v1017_v28  ;;  %3330 = vmatpush3.bf16.msra.mxu0 %v3702_v1  ;;  %v3704_v1 = vld [vmem:[%s5094_s8 + $0x30] sm:$0xff]  }
 0x7b1   : > { %v1016_v29 = vmul.f32 %v1014_v27, %v1014_v27  ;;  %3475 = vmatprep.subr.bf16.mxu0 %v4078_v15 }
 0x7b3   : > { %v1020_v31 = vsel %vm570_vm0, %v1016_v29, 0.0 }
 0x7b4   : > { %1021 = vadd.xlane.f32.xlu0 %v1020_v31 }
 0x839   : > { %v1019_v44 = vpop.xlane.xlu0 %1018 }
 0x83a   : > { %v1023_v45 = vmul.f32 0.03125, %v1019_v44 }
 0x83c   : > { %v1025_v46 = vadd.f32 1e-05, %v1023_v45 }
 0x83d   : > { %v1022_v47 = vpop.xlane.xlu0 %1021 }
 0x83e   : > { %3776 = vrsqrt.f32 %v1025_v46  ;;  %v1024_v48 = vmul.f32 0.03125, %v1022_v47 }
 0x840   : > { %v1026_v49 = vadd.f32 1e-05, %v1024_v48 }
 0x842   : > { %3778 = vrsqrt.f32 %v1026_v49 }
 0x84b   : > { %v3777_v51 = vpop.eup %3776 }
 0x84c   : > { %v1029_v55 = vmul.f32 %v3777_v51, %v1013_v21 }
 0x84e   : > { %v1035_v59 = vmul.f32 %v1034_v53, %v1029_v55 }
 0x84f   : > { %v3779_v57 = vpop.eup %3778 }
 0x850   : > { %v1030_v60 = vmul.f32 %v3779_v57, %v1014_v27  ;;  %v1041_v2 = vadd.f32 %v1040_v58, %v1035_v59 }
 0x852   : > { %v1036_v63 = vmul.f32 %v1034_v53, %v1030_v60 }
 0x854   : > { %v1042_v3 = vadd.f32 %v1040_v58, %v1036_v63 }
 0x856   : > { %v1079_v4 = vpack.c.bf16 %v1042_v3, %v1041_v2 }
 0x858   : > { %v1081_v8 = vrot.slane %v1079_v4, 6 }
 0x85a   : > { %v4549_v9 = vsel %vm1082_vm3, 0, %v1081_v8  ;;  %v4552_v10 = vsel %vm1082_vm3, %v1081_v8, 0 }
 0x85b   : > { %v1151_v13 = vrot.slane %v4549_v9, 4  ;;  %v1152_v14 = vrot.slane %v4552_v10, 4  ;;  %v1135_v17 = vrot.slane %v4549_v9, 3  ;;  %v1136_v0 = vrot.slane %v4552_v10, 3 }
 0x85c   : > { %v1103_v19 = vrot.slane %v4549_v9, 1  ;;  %v1104_v20 = vrot.slane %v4552_v10, 1  ;;  %v1088_v21 = vshrl.u32 %v4549_v9, 16  ;;  %v1090_v22 = vshll.u32 %v4549_v9, 16 }
 0x85d   : > { %v1153_v23 = vsel %vm1150_vm4, %v1151_v13, %v1152_v14  ;;  %v1137_v27 = vsel %vm1134_vm5, %v1135_v17, %v1136_v0  ;;  %v1094_v28 = vshll.u32 %v4552_v10, 16  ;;  %v1112_v29 = vshrl.u32 %v4552_v10, 16 }
 0x85e   : > { %3452 = vmatmul.mubr.msk.bf16.vlgmr.msra.gmra.mxu1 %vm570_vm0, %v1153_v23  ;;  %1138 = vrot.lane.b32.xlu1 %v1137_v27, %s4083_s23  ;;  %v1125_v31 = vrot.slane %v1088_v21, 2  ;;  %v1126_v32 = vrot.slane %v1090_v22, 3  ;;  %v1141_v33 = vrot.slane %v1088_v21, 3  ;;  %v1142_v36 = vrot.slane %v1090_v22, 4  ;;  %v3705_v23 = vld [vmem:[%s5094_s8 + $0x28] sm:$0xff]   ;;  %v3706_v27 = vld [vmem:[%s5094_s8 + $0x20] sm:$0xff]  }
 0x85f   : > { %v1128_v34 = vrot.slane %v1112_v29, 2  ;;  %v1129_v35 = vrot.slane %v1094_v28, 3  ;;  %v1144_v37 = vrot.slane %v1112_v29, 3  ;;  %3471 = vmatprep.mubr.msk.bf16.mxu1 %vm4079_vm1, %v4078_v15  ;;  %v1145_v39 = vrot.slane %v1094_v28, 4 }
 0x860   : > { %v1127_v38 = vor.u32 %v1126_v32, %v1125_v31  ;;  %v1092_v40 = vrot.slane %v1090_v22, 1  ;;  %v1105_v41 = vsel %vm1102_vm6, %v1103_v19, %v1104_v20  ;;  %v1109_v42 = vrot.slane %v1088_v21, 1  ;;  %v3709_v31 = vld [vmem:[%s5094_s8 + $0x8] sm:$0xff]   ;;  %v3710_v32 = vld [vmem:[%s5094_s8] sm:$0xff]  }
 0x861   : > { %v1130_v43 = vor.u32 %v1129_v35, %v1128_v34  ;;  %v1110_v44 = vrot.slane %v1090_v22, 2  ;;  %v1114_v46 = vrot.slane %v1112_v29, 1  ;;  %v1115_v47 = vrot.slane %v1094_v28, 2  ;;  %v3708_v29 = vld [vmem:[%s5094_s8 + $0x10] sm:$0xff]  }
 0x862   : > { %1106 = vrot.lane.b32.xlu1 %v1105_v41, %s4083_s23  ;;  %v1093_v45 = vor.u32 %v1092_v40, %v1088_v21  ;;  %v1143_v49 = vor.u32 %v1142_v36, %v1141_v33  ;;  %v1146_v51 = vor.u32 %v1145_v39, %v1144_v37  ;;  %v1096_v53 = vrot.slane %v1094_v28, 1  ;;  %v3707_v28 = vld [vmem:[%s5094_s8 + $0x18] sm:$0xff]  }
 0x863   : > { %v1131_v48 = vsel %vm1124_vm7, %v1127_v38, %v1130_v43  ;;  %v1111_v57 = vor.u32 %v1110_v44, %v1109_v42  ;;  %v1116_v58 = vor.u32 %v1115_v47, %v1114_v46  ;;  %v1121_v62 = vrot.slane %v4549_v9, 2 }
 0x864   : > { %1132 = vrot.lane.b32.xlu0 %v1131_v48, %s4087_s17  ;;  %v1097_v55 = vsel %vm1087_vm8, %v1093_v45, %v1096_v53  ;;  %v1147_v59 = vsel %vm1140_vm9, %v1143_v49, %v1146_v51  ;;  %v1122_v63 = vrot.slane %v4552_v10, 2  ;;  %v1173_v33 = vsub.s32 5, %v4391_v24 }
 0x865   : > { %v1117_v60 = vsel %vm1108_vm10, %v1111_v57, %v1116_v58 }
 0x866   : > { %1098 = vrot.lane.b32.xlu1 %v1097_v55, %s4087_s17  ;;  %v1123_v3 = vsel %vm1120_vm11, %v1121_v62, %v1122_v63  ;;  %v1174_v35 = vrot.slane %v4396_v26, %v1173_v33 }
 0x868   : > { %1148 = vrot.lane.b32.xlu0 %v1147_v59, %s4081_s28 }
 0x86a   : > { %1118 = vrot.lane.b32.xlu1 %v1117_v60, %s4081_s28 }
 0x8d0   : > { %v1139_v61 = vpop.permute.xlu1 %1138 }
 0x8d4   : > { %v1107_v2 = vpop.permute.xlu1 %1106 }
 0x8d6   : > { %v1133_v4 = vpop.permute.xlu0 %1132 }
 0x8d7   : > { %v1165_v5 = vsel %vm570_vm0, %v1123_v3, %v1133_v4 }
 0x8d8   : > { %v1099_v6 = vpop.permute.xlu1 %1098  ;;  %v1167_v13 = vsel %vm1156_vm12, %v1165_v5, %v1139_v61 }
 0x8d9   : > { %v1155_v8 = vsel %vm570_vm0, %v4549_v9, %v1099_v6  ;;  %v3703_v9 = vld [vmem:[%s5094_s8 + $0x38] sm:$0xff]   ;;  %v1405_v6 = vsub.s32 4, %v4391_v24 }
 0x8da   : > { %v1149_v12 = vpop.permute.xlu0 %1148  ;;  %v1158_v10 = vsel %vm1156_vm12, %v1155_v8, %v1107_v2  ;;  %3456 = vmatpush3.bf16.msra.mxu1 %v3703_v9 }
 0x8db   : > { %v1169_v14 = vsel %vm1159_vm13, %v1167_v13, %v1149_v12  ;;  %3457 = vmatprep.subr.bf16.mxu1 %v4078_v15  ;;  %v1406_v8 = vrot.slane %v4396_v26, %v1405_v6 }
 0x8dc   : > { %1318 = vmatprep.mubr.bf16.mxu0 %v1169_v14  ;;  %v1119_v17 = vpop.permute.xlu1 %1118 }
 0x8dd   : > { %v1161_v0 = vsel %vm1159_vm13, %v1158_v10, %v1119_v17 }
 0x8de   : > { %1319 = vmatmul.mubr.bf16.vlgmr.msra.gmra.mxu0 %v1161_v0  ;;  %3458 = vmatpush3.bf16.msra.mxu1 %v3704_v1 }
 0x8df   : > { %3479 = vmatprep.mubr.msk.bf16.mxu0 %vm4079_vm1, %v4078_v15  ;;  %3459 = vmatprep.subr.bf16.mxu1 %v4078_v15 }
 0x8e2   : > { %3460 = vmatpush3.bf16.msra.mxu1 %v3705_v23 }
 0x8e3   : > { %3461 = vmatprep.subr.bf16.mxu1 %v4078_v15 }
 0x8e6   : > { %3462 = vmatpush3.bf16.msra.mxu1 %v3706_v27 }
 0x8e7   : > { %3463 = vmatprep.subr.bf16.mxu1 %v4078_v15 }
 0x8ea   : > { %3464 = vmatpush3.bf16.msra.mxu1 %v3707_v28 }
 0x8eb   : > { %3465 = vmatprep.subr.bf16.mxu1 %v4078_v15 }
 0x8ee   : > { %3466 = vmatpush3.bf16.msra.mxu1 %v3708_v29 }
 0x8ef   : > { %3467 = vmatprep.subr.bf16.mxu1 %v4078_v15 }
 0x8f2   : > { %3468 = vmatpush3.bf16.msra.mxu1 %v3709_v31 }
 0x8f3   : > { %3469 = vmatprep.subr.bf16.mxu1 %v4078_v15 }
 0x8f6   : > { %3470 = vmatpush3.bf16.msra.mxu1 %v3710_v32 }
 0x8f7   : > { %3489 = vmatprep.subr.bf16.mxu1 %v4078_v15 }
 0x91e   : > { %v1361_v19 = vpop.f32.mrf.mxu1 }
 0x920   : > { %v3453_v20 = vpop.f32.mrf.mxu1 }
 0x922   : > { %v1364_v21 = vpop.f32.mrf.mxu1 }
 0x924   : > { %v3454_v22 = vpop.f32.mrf.mxu1 }
 0x99e   : > { %v3331_v34 = vpop.f32.mrf.mxu0 }
 0x9a0   : > { %v3332_v36 = vpop.f32.mrf.mxu0 }
 0x9a1   : > { %v3333_v37 = vadd.f32 %v3332_v36, %v3331_v34  ;;  %v3711_v36 = vld [vmem:[#allocation8 + $0x18] sm:$0xff]  }
 0x9a2   : > { %v3334_v38 = vpop.f32.mrf.mxu0  ;;  %3476 = vmatpush3.bf16.msra.mxu0 %v3711_v36 }
 0x9a3   : > { %v1321_v39 = vadd.f32 %v3333_v37, %v1174_v35  ;;  %v3712_v37 = vld [vmem:[#allocation8 + $0x10] sm:$0xff]   ;;  %3477 = vmatprep.subr.bf16.mxu0 %v4078_v15 }
 0x9a4   : > { %v3335_v40 = vpop.f32.mrf.mxu0 }
 0x9a5   : > { %v1362_v41 = vadd.f32 %v1361_v19, %v1321_v39  ;;  %v3336_v43 = vadd.f32 %v3335_v40, %v3334_v38 }
 0x9a6   : > { %3478 = vmatpush3.bf16.msra.mxu0 %v3712_v37 }
 0x9a7   : > { %v1368_v42 = vmul.f32 %v1362_v41, %v1362_v41  ;;  %v1324_v44 = vadd.f32 %v3336_v43, %v1174_v35  ;;  %3483 = vmatprep.subr.bf16.mxu0 %v4078_v15 }
 0x9a9   : > { %v1370_v45 = vmul.f32 %v1368_v42, %v1362_v41  ;;  %v1365_v46 = vadd.f32 %v1364_v21, %v1324_v44  ;;  %v1528_v44 = vsub.s32 6, %v4391_v24 }
 0x9ab   : > { %v1372_v47 = vmul.f32 0.044715, %v1370_v45  ;;  %v1369_v48 = vmul.f32 %v1365_v46, %v1365_v46 }
 0x9ad   : > { %v1374_v49 = vadd.f32 %v1372_v47, %v1362_v41  ;;  %v1371_v51 = vmul.f32 %v1369_v48, %v1365_v46  ;;  %v1529_v47 = vrot.slane %v4396_v26, %v1528_v44  ;;  %v1534_v48 = vsub.s32 7, %v4391_v24  ;;  %v3755_v24 = vld [vmem:[%s5096_s10 + $0x40] sm:$0xff]  }
 0x9af   : > { %v1376_v53 = vmul.f32 0.7978846, %v1374_v49  ;;  %v1373_v55 = vmul.f32 0.044715, %v1371_v51 }
 0x9b1   : > { %3780 = vtanh.f32 %v1376_v53  ;;  %v1375_v57 = vadd.f32 %v1373_v55, %v1365_v46  ;;  %v1535_v55 = vrot.slane %v4396_v26, %v1534_v48 }
 0x9b3   : > { %v1377_v58 = vmul.f32 0.7978846, %v1375_v57 }
 0x9b5   : > { %3782 = vtanh.f32 %v1377_v58 }
 0x9be   : > { %v3781_v59 = vpop.eup %3780 }
 0x9bf   : > { %v1380_v60 = vadd.f32 1.0, %v3781_v59 }
 0x9c1   : > { %v1382_v63 = vmul.f32 0.5, %v1380_v60 }
 0x9c2   : > { %v3783_v61 = vpop.eup %3782 }
 0x9c3   : > { %v1381_v62 = vadd.f32 1.0, %v3783_v61  ;;  %v1384_v3 = vmul.f32 %v1382_v63, %v1362_v41 }
 0x9c5   : > { %v1383_v2 = vmul.f32 0.5, %v1381_v62 }
 0x9c7   : > { %v1385_v4 = vmul.f32 %v1383_v2, %v1365_v46 }
 0x9c9   : > { %v1386_v5 = vpack.c.bf16 %v1385_v4, %v1384_v3 }
 0x9cb   : > { %3472 = vmatmul.mubr.bf16.vlgmr.msra.gmra.mxu1 %v1386_v5 }
 0x9cc   : > { %3491 = vmatprep.mubr.msk.bf16.mxu1 %vm4079_vm1, %v4078_v15 }
 0xa8b   : > { %v1489_v12 = vpop.f32.mrf.mxu1 }
 0xa8c   : > { %v1490_v13 = vadd.f32 %v1489_v12, %v1406_v8 }
 0xa8d   : > { %v3473_v14 = vpop.f32.mrf.mxu1 }
 0xa8e   : > { %v1496_v10 = vadd.f32 %v1490_v13, %v4472_v11 }
 0xa8f   : > { %v1492_v17 = vpop.f32.mrf.mxu1 }
 0xa90   : > { %v4643_v0 = vmul.f32 %v1496_v10, %v4468_v7  ;;  %v1493_v19 = vadd.f32 %v1492_v17, %v1406_v8 }
 0xa91   : > { %v3474_v20 = vpop.f32.mrf.mxu1 }
 0xa92   : > { %v1497_v21 = vadd.f32 %v1493_v19, %v4480_v18  ;;  %v1500_v22 = vsel %vm570_vm0, %v4643_v0, 0.0 }
 0xa93   : > { %1501 = vadd.xlane.f32.xlu0 %v1500_v22 }
 0xa94   : > { %v4649_v9 = vmul.f32 %v1497_v21, %v4477_v16 }
 0xa96   : > { %v1503_v1 = vsel %vm570_vm0, %v4649_v9, 0.0 }
 0xa97   : > { %1504 = vadd.xlane.f32.xlu1 %v1503_v1 }
 0xb1c   : > { %v1502_v11 = vpop.xlane.xlu0 %1501 }
 0xb1d   : > { %v1506_v23 = vmul.f32 0.03125, %v1502_v11 }
 0xb1f   : > { %v1508_v27 = vsub.f32 %v4643_v0, %v1506_v23 }
 0xb20   : > { %v1505_v28 = vpop.xlane.xlu1 %1504 }
 0xb21   : > { %v1507_v29 = vmul.f32 0.03125, %v1505_v28  ;;  %v1510_v31 = vmul.f32 %v1508_v27, %v1508_v27 }
 0xb23   : > { %v1509_v18 = vsub.f32 %v4649_v9, %v1507_v29  ;;  %v1512_v32 = vsel %vm570_vm0, %v1510_v31, 0.0 }
 0xb24   : > { %1513 = vadd.xlane.f32.xlu0 %v1512_v32 }
 0xb25   : > { %v1511_v34 = vmul.f32 %v1509_v18, %v1509_v18 }
 0xb27   : > { %v1515_v35 = vsel %vm570_vm0, %v1511_v34, 0.0 }
 0xb28   : > { %1516 = vadd.xlane.f32.xlu0 %v1515_v35 }
 0xbad   : > { %v1514_v38 = vpop.xlane.xlu0 %1513 }
 0xbae   : > { %v1518_v39 = vmul.f32 0.03125, %v1514_v38 }
 0xbb0   : > { %v1520_v40 = vadd.f32 1e-05, %v1518_v39 }
 0xbb1   : > { %v1517_v41 = vpop.xlane.xlu0 %1516 }
 0xbb2   : > { %3784 = vrsqrt.f32 %v1520_v40  ;;  %v1519_v43 = vmul.f32 0.03125, %v1517_v41 }
 0xbb4   : > { %v1521_v42 = vadd.f32 1e-05, %v1519_v43 }
 0xbb6   : > { %3786 = vrsqrt.f32 %v1521_v42 }
 0xbbf   : > { %v3785_v45 = vpop.eup %3784 }
 0xbc0   : > { %v1524_v46 = vmul.f32 %v3785_v45, %v1508_v27 }
 0xbc2   : > { %v1530_v53 = vmul.f32 %v1529_v47, %v1524_v46 }
 0xbc3   : > { %v3787_v49 = vpop.eup %3786 }
 0xbc4   : > { %v1525_v51 = vmul.f32 %v3787_v49, %v1509_v18  ;;  %v1536_v58 = vadd.f32 %v1535_v55, %v1530_v53 }
 0xbc6   : > { %v1531_v57 = vmul.f32 %v1529_v47, %v1525_v51 }
 0xbc8   : > { %v1537_v59 = vadd.f32 %v1535_v55, %v1531_v57 }
 0xbca   : > { %v1538_v60 = vpack.c.bf16 %v1537_v59, %v1536_v58 }
 0xbcc   : > { %3480 = vmatmul.mubr.msk.bf16.vlgmr.msra.gmra.mxu0 %vm570_vm0, %v1538_v60 }
 0xbcd   : > { %3485 = vmatprep.mubr.msk.bf16.mxu0 %vm4079_vm1, %v4078_v15 }
 0xc8c   : > { %v1593_v61 = vpop.f32.mrf.mxu0 }
 0xc8e   : > { %v3481_v62 = vpop.f32.mrf.mxu0 }
 0xc90   : > { %v1596_v63 = vpop.f32.mrf.mxu0 }
 0xc91   : > { %v4670_v2 = vpack.c.bf16 %v1596_v63, %v1593_v61 }
 0xc92   : > { %v3482_v3 = vpop.f32.mrf.mxu0 }
 0xc93   : > { %1723 = vrot.lane.b32.xlu1 %v4670_v2, %s4080_s26  ;;  %1602 = vrot.lane.b32.xlu0 %v4670_v2, %s4081_s28  ;;  %s4088_s26 = smov [#allocation11]  }
 0xc97   : > { %1721 = vrot.lane.b32.xlu1 %v4670_v2, %s4082_s13  ;;  %s3965_s13 = sshll.u32 %s4088_s26, 4  ;;  %s3966_s13 = int_to_ptr.vmem [resolvable:$false] %s3965_s13 }
 0xd05   : > { %v1603_v26 = vpop.permute.xlu0 %1602  ;;  %v1724_v5 = vpop.permute.xlu1 %1723 }
 0xd06   : > { %v1608_v4 = vsel %vm681_vm2, %v1603_v26, 0  ;;  %v1729_v8 = vsel %vm681_vm2, %v1724_v5, 0 }
 0xd07   : > { %3484 = vmatpush3.bf16.xpose.msra.mxu0 %v1608_v4 }
 0xd08   : > { %3495 = vmatprep.subr.bf16.mxu0 %v4078_v15 }
 0xd09   : > { %v1722_v12 = vpop.permute.xlu1 %1721 }
 0xd0e   : > { %3486 = vmatmul.mubr.msk.bf16.vlgmr.msra.gmra.mxu0 %vm681_vm2, %v4670_v2 }
 0xd0f   : > { %3496 = vmatpush3.bf16.xpose.msra.mxu0 %v1729_v8  ;;  %3497 = vmatprep.mubr.msk.bf16.mxu0 %vm4079_vm1, %v4078_v15 }
 0xd10   : > { %3507 = vmatprep.subr.bf16.mxu0 %v4078_v15 }
 0xd16   : > { %3498 = vmatmul.mubr.msk.bf16.vlgmr.msra.gmra.mxu0 %vm681_vm2, %v1722_v12 }
 0xd17   : > { %3511 = vmatprep.mubr.msk.bf16.mxu0 %vm4079_vm1, %v4078_v15 }
 0xdce   : > { %v1644_v13 = vpop.f32.mrf.mxu0 }
 0xdcf   : > { %v1645_v14 = vadd.f32 %v1644_v13, %v4430_v52 }
 0xdd0   : > { %v3487_v10 = vpop.f32.mrf.mxu0 }
 0xdd1   : > { %v1651_v17 = vsel %vm681_vm2, %v1645_v14, -inf }
 0xdd2   : > { %1652 = vmax.xlane.f32.xlu1 %v1651_v17  ;;  %v1647_v19 = vpop.f32.mrf.mxu0  ;;  %v3713_v17 = vld [vmem:[#allocation10 + $0x18] sm:$0xff]  }
 0xdd3   : > { %v1648_v20 = vadd.f32 %v1647_v19, %v4430_v52  ;;  %3508 = vmatpush3.bf16.msra.mxu0 %v3713_v17 }
 0xdd4   : > { %v3488_v21 = vpop.f32.mrf.mxu0  ;;  %3509 = vmatprep.subr.bf16.mxu0 %v4078_v15 }
 0xdd5   : > { %v1654_v22 = vsel %vm681_vm2, %v1648_v20, -inf }
 0xdd6   : > { %1655 = vmax.xlane.f32.xlu0 %v1654_v22  ;;  %v1765_v1 = vpop.f32.mrf.mxu0  ;;  %v3714_v22 = vld [vmem:[#allocation10 + $0x10] sm:$0xff]  }
 0xdd7   : > { %v1766_v11 = vadd.f32 %v1765_v1, %v4430_v52  ;;  %3510 = vmatpush3.bf16.msra.mxu0 %v3714_v22  ;;  %v4772_v22 = vld [vmem:[#allocation7 + $0x8] sm:$0xff] }
 0xdd8   : > { %v3499_v23 = vpop.f32.mrf.mxu0  ;;  %3515 = vmatprep.subr.bf16.mxu0 %v4078_v15 }
 0xdd9   : > { %v1772_v27 = vsel %vm681_vm2, %v1766_v11, -inf }
 0xdda   : > { %1773 = vmax.xlane.f32.xlu0 %v1772_v27  ;;  %v1768_v28 = vpop.f32.mrf.mxu0 }
 0xddb   : > { %v1769_v29 = vadd.f32 %v1768_v28, %v4430_v52 }
 0xddc   : > { %v3500_v31 = vpop.f32.mrf.mxu0 }
 0xddd   : > { %v1775_v18 = vsel %vm681_vm2, %v1769_v29, -inf }
 0xdde   : > { %1776 = vmax.xlane.f32.xlu0 %v1775_v18 }
 0xe5b   : > { %v1653_v32 = vpop.xlane.xlu1 %1652 }
 0xe5c   : > { %v1657_v34 = vsub.f32 %v1645_v14, %v1653_v32 }
 0xe5e   : > { %v1659_v35 = vmul.f32 1.442695, %v1657_v34 }
 0xe5f   : > { %v1656_v36 = vpop.xlane.xlu0 %1655 }
 0xe60   : > { %3788 = vpow2.f32 %v1659_v35  ;;  %v1658_v37 = vsub.f32 %v1648_v20, %v1656_v36 }
 0xe62   : > { %v1661_v38 = vmul.f32 1.442695, %v1658_v37 }
 0xe63   : > { %v1774_v39 = vpop.xlane.xlu0 %1773 }
 0xe64   : > { %3790 = vpow2.f32 %v1661_v38  ;;  %v1778_v40 = vsub.f32 %v1766_v11, %v1774_v39 }
 0xe66   : > { %v1780_v41 = vmul.f32 1.442695, %v1778_v40 }
 0xe67   : > { %v1777_v43 = vpop.xlane.xlu0 %1776 }
 0xe68   : > { %3792 = vpow2.f32 %v1780_v41  ;;  %v1779_v42 = vsub.f32 %v1769_v29, %v1777_v43 }
 0xe6a   : > { %v1782_v45 = vmul.f32 1.442695, %v1779_v42 }
 0xe6c   : > { %3794 = vpow2.f32 %v1782_v45 }
 0xe6d   : > { %v3789_v52 = vpop.eup %3788 }
 0xe6e   : > { %v1663_v46 = vsel %vm681_vm2, %v3789_v52, 0.0 }
 0xe6f   : > { %1664 = vadd.xlane.f32.xlu1 %v1663_v46 }
 0xe71   : > { %v3791_v47 = vpop.eup %3790 }
 0xe72   : > { %v1666_v49 = vsel %vm681_vm2, %v3791_v47, 0.0 }
 0xe73   : > { %1667 = vadd.xlane.f32.xlu0 %v1666_v49 }
 0xe75   : > { %v3793_v51 = vpop.eup %3792 }
 0xe76   : > { %v1784_v53 = vsel %vm681_vm2, %v3793_v51, 0.0 }
 0xe77   : > { %1785 = vadd.xlane.f32.xlu1 %v1784_v53 }
 0xe79   : > { %v3795_v55 = vpop.eup %3794 }
 0xe7a   : > { %v1787_v57 = vsel %vm681_vm2, %v3795_v55, 0.0 }
 0xe7b   : > { %1788 = vadd.xlane.f32.xlu0 %v1787_v57 }
 0xe88   : > { %1674 = vrot.lane.b32.xlu1 %v4670_v2, %s4083_s23 }
 0xe91   : > { %1795 = vrot.lane.b32.xlu0 %v4670_v2, %s4084_s19 }
 0xef8   : > { %v1665_v58 = vpop.xlane.xlu1 %1664 }
 0xef9   : > { %3796 = vrcp.f32 %v1665_v58 }
 0xefc   : > { %v1668_v59 = vpop.xlane.xlu0 %1667 }
 0xefd   : > { %3798 = vrcp.f32 %v1668_v59 }
 0xf00   : > { %v1786_v60 = vpop.xlane.xlu1 %1785 }
 0xf01   : > { %3800 = vrcp.f32 %v1786_v60  ;;  %v3715_v60 = vld [vmem:[%s5093_s7 + $0x118] sm:$0xff]  }
 0xf04   : > { %v1675_v61 = vpop.permute.xlu1 %1674  ;;  %v1789_v62 = vpop.xlane.xlu0 %1788 }
 0xf05   : > { %3802 = vrcp.f32 %v1789_v62  ;;  %3490 = vmatpush3.bf16.msra.mxu1 %v1675_v61  ;;  %v3716_v61 = vld [vmem:[%s5093_s7 + $0x110] sm:$0xff]   ;;  %v3717_v62 = vld [vmem:[%s5093_s7 + $0x108] sm:$0xff]  }
 0xf06   : > { %3501 = vmatprep.subr.bf16.mxu1 %v4078_v15  ;;  %v3797_v63 = vpop.eup %3796 }
 0xf07   : > { %v1671_v26 = vmul.f32 %v3797_v63, %v3789_v52  ;;  %v3718_v63 = vld [vmem:[%s5093_s7 + $0xc8] sm:$0xff]  }
 0xf08   : > { %v1796_v8 = vpop.permute.xlu0 %1795 }
 0xf0a   : > { %v3799_v3 = vpop.eup %3798 }
 0xf0b   : > { %v1672_v4 = vmul.f32 %v3799_v3, %v3791_v47  ;;  %v3719_v3 = vld [vmem:[%s5093_s7 + $0x100] sm:$0xff]  }
 0xf0d   : > { %v1673_v5 = vpack.c.bf16 %v1672_v4, %v1671_v26  ;;  %v3720_v26 = vld [vmem:[%s5093_s7 + $0xc0] sm:$0xff]   ;;  %v3721_v4 = vld [vmem:[%s5093_s7 + $0xf8] sm:$0xff]  }
 0xf0e   : > { %v3801_v2 = vpop.eup %3800 }
 0xf0f   : > { %3492 = vmatmul.mubr.msk.bf16.vlgmr.msra.gmra.mxu1 %vm681_vm2, %v1673_v5  ;;  %v1792_v13 = vmul.f32 %v3801_v2, %v3793_v51  ;;  %v3722_v5 = vld [vmem:[%s5093_s7 + $0xb8] sm:$0xff]   ;;  %v3724_v2 = vld [vmem:[%s5093_s7 + $0xb0] sm:$0xff]  }
 0xf10   : > { %3502 = vmatpush3.bf16.msra.mxu1 %v1796_v8  ;;  %3503 = vmatprep.mubr.msk.bf16.mxu1 %vm4079_vm1, %v4078_v15  ;;  %v3723_v8 = vld [vmem:[%s5093_s7 + $0xf0] sm:$0xff]  }
 0xf11   : > { %3363 = vmatprep.subr.bf16.mxu1 %v3717_v62 }
 0xf12   : > { %v3803_v12 = vpop.eup %3802 }
 0xf13   : > { %v1793_v14 = vmul.f32 %v3803_v12, %v3795_v55  ;;  %v3725_v12 = vld [vmem:[%s5093_s7 + $0xe8] sm:$0xff]  }
 0xf15   : > { %v1794_v10 = vpack.c.bf16 %v1793_v14, %v1792_v13  ;;  %v3726_v13 = vld [vmem:[%s5093_s7 + $0xa8] sm:$0xff]  }
 0xf17   : > { %3504 = vmatmul.mubr.msk.bf16.vlgmr.msra.gmra.mxu1 %vm681_vm2, %v1794_v10 }
 0xf18   : > { %3364 = vmatpush3.bf16.msra.mxu1 %v3718_v63 }
 0xf19   : > { %3365 = vmatprep.subr.bf16.mxu1 %v3719_v3 }
 0xf1c   : > { %3366 = vmatpush3.bf16.msra.mxu1 %v3720_v26 }
 0xf1d   : > { %3367 = vmatprep.subr.bf16.mxu1 %v3721_v4 }
 0xf20   : > { %3368 = vmatpush3.bf16.msra.mxu1 %v3722_v5 }
 0xf21   : > { %3369 = vmatprep.subr.bf16.mxu1 %v3723_v8 }
 0xf24   : > { %3370 = vmatpush3.bf16.msra.mxu1 %v3724_v2 }
 0xf25   : > { %3371 = vmatprep.subr.bf16.mxu1 %v3725_v12 }
 0xf28   : > { %3372 = vmatpush3.bf16.msra.mxu1 %v3726_v13 }
 0xfcf   : > { %v1714_v19 = vpop.f32.mrf.mxu1 }
 0xfd1   : > { %v3493_v20 = vpop.f32.mrf.mxu1 }
 0xfd3   : > { %v1717_v21 = vpop.f32.mrf.mxu1 }
 0xfd5   : > { %v3494_v1 = vpop.f32.mrf.mxu1 }
 0xfd7   : > { %v1835_v11 = vpop.f32.mrf.mxu1 }
 0xfd9   : > { %v3505_v23 = vpop.f32.mrf.mxu1 }
 0xfdb   : > { %v1838_v27 = vpop.f32.mrf.mxu1 }
 0xfdc   : > { %v3675_v28 = vpack.i.bf16 %v1838_v27, %v1835_v11  ;;  %v1947_v11 = vrot.slane %v4772_v22, %v4394_v25 }
 0xfdd   : > { %v3506_v29 = vpop.f32.mrf.mxu1 }
 0xfde   : > { %3676 = vrot.lane.b32.xlu1 %v3675_v28, %s4086_s4  ;;  %v1953_v28 = vrot.slane %v4772_v22, %v4401_v30  ;;  %s5141_s4 = sshll.u32 %s4335_s21, 4 }
 0xfdf   : > { %s4906_s14 = scalar_lea.vmem [#allocation11], %s5141_s4  ;;  %s3967_s4 = scalar_lea.vmem %s3966_s13, 512 }
 0xfe0   : > { %s2937_s30 = sshll.u32 %s4906_s14, 4  ;;  %s5023_s30 = int_to_ptr.vmem [resolvable:$true] %s2937_s30 }
 0xfe1   : > { %s3961_s29 = scalar_lea.vmem %s5023_s30, 256  ;;  %p3968_p13 = scmp.lt.s32.totalorder %s5023_s30, %s3966_s13 }
 0xfe2   : > { %p3962_p5 = scmp.ne.s32.totalorder %s5023_s30, %s3961_s29  ;;  %p3969_p1 = scmp.lt.s32.totalorder %s3967_s4, %s3961_s29 }
 0xfe4   : > { %p3963_p11 = pnand %p3962_p5, %p5144_p10  ;;  %p3970_p4 = por %p3969_p1, %p3968_p13 }
 0xfe6   : > { %p3964_p9 = pneg %p3963_p11 }
 0xfe8   : > { %p3971_p6 = pnand %p3970_p4, %p3964_p9 }
0x1050   : > { %v3677_v31 = vpop.permute.xlu1 %3676 }
0x1051   : > { %v3679_v18 = vunpack.i.h.bf16 %v3677_v31  ;;  %v3678_v32 = vunpack.i.l.bf16 %v3677_v31 }
0x1053   : > { %v1851_v34 = vsel %vm681_vm2, %v1717_v21, %v3679_v18  ;;  %v1850_v35 = vsel %vm681_vm2, %v1714_v19, %v3678_v32  ;;  %v3727_v18 = vld [vmem:[%s5093_s7 + $0xe0] sm:$0xff]  }
0x1054   : > { %v1852_v36 = vpack.c.bf16 %v1851_v34, %v1850_v35  ;;  %v3728_v32 = vld [vmem:[%s5093_s7 + $0xa0] sm:$0xff]   ;;  %3373 = vmatprep.subr.bf16.mxu1 %v3727_v18 }
0x1055   : > { %3374 = vmatpush3.bf16.msra.mxu1 %v3728_v32 }
0x1056   : > { %3512 = vmatmul.mubr.msk.bf16.vlgmr.msra.gmra.mxu0 %vm570_vm0, %v1852_v36 }
0x1057   : > { %3519 = vmatprep.mubr.msk.bf16.mxu0 %vm4079_vm1, %v4078_v15  ;;  %3516 = vmatpush3.bf16.msra.mxu0 %v3715_v60 }
0x1058   : > { %3517 = vmatprep.subr.bf16.mxu0 %v4078_v15 }
0x105b   : > { %3518 = vmatpush3.bf16.msra.mxu0 %v3716_v61 }
0x105c   : > { %3523 = vmatprep.subr.bf16.mxu0 %v4078_v15 }
0x1116   : > { %v1907_v37 = vpop.f32.mrf.mxu0 }
0x1117   : > { %v1914_v38 = vadd.f32 %v1907_v37, %v4643_v0 }
0x1118   : > { %v3513_v39 = vpop.f32.mrf.mxu0 }
0x1119   : > { %v4720_v40 = vmul.f32 %v1914_v38, %v4468_v7  ;;  %v3729_v38 = vld [vmem:[%s5093_s7 + $0xd8] sm:$0xff]  }
0x111a   : > { %v1910_v41 = vpop.f32.mrf.mxu0  ;;  %v3730_v39 = vld [vmem:[%s5093_s7 + $0x98] sm:$0xff]   ;;  %3375 = vmatprep.subr.bf16.mxu1 %v3729_v38 }
0x111b   : > { %v1915_v43 = vadd.f32 %v1910_v41, %v4649_v9  ;;  %v1918_v42 = vsel %vm570_vm0, %v4720_v40, 0.0  ;;  %3376 = vmatpush3.bf16.msra.mxu1 %v3730_v39 }
0x111c   : > { %1919 = vadd.xlane.f32.xlu1 %v1918_v42  ;;  %v3514_v45 = vpop.f32.mrf.mxu0 }
0x111d   : > { %v4726_v52 = vmul.f32 %v1915_v43, %v4477_v16  ;;  %v3731_v45 = vld [vmem:[%s5093_s7 + $0xd0] sm:$0xff]  }
0x111e   : > { %3377 = vmatprep.subr.bf16.mxu1 %v3731_v45 }
0x111f   : > { %v1921_v46 = vsel %vm570_vm0, %v4726_v52, 0.0 }
0x1120   : > { %1922 = vadd.xlane.f32.xlu0 %v1921_v46 }
0x11a5   : > { %v1920_v0 = vpop.xlane.xlu1 %1919 }
0x11a6   : > { %v1924_v47 = vmul.f32 0.03125, %v1920_v0 }
0x11a8   : > { %v1926_v49 = vsub.f32 %v4720_v40, %v1924_v47 }
0x11a9   : > { %v1923_v51 = vpop.xlane.xlu0 %1922 }
0x11aa   : > { %v1925_v53 = vmul.f32 0.03125, %v1923_v51  ;;  %v1928_v55 = vmul.f32 %v1926_v49, %v1926_v49 }
0x11ac   : > { %v1927_v9 = vsub.f32 %v4726_v52, %v1925_v53  ;;  %v1930_v57 = vsel %vm570_vm0, %v1928_v55, 0.0 }
0x11ad   : > { %1931 = vadd.xlane.f32.xlu0 %v1930_v57  ;;  %v3732_v57 = vld [vmem:[%s5093_s7 + $0x90] sm:$0xff]  }
0x11ae   : > { %v1929_v58 = vmul.f32 %v1927_v9, %v1927_v9  ;;  %3378 = vmatpush3.bf16.msra.mxu1 %v3732_v57 }
0x11af   : > { %3543 = vmatprep.subr.bf16.mxu1 %v4078_v15 }
0x11b0   : > { %v1933_v59 = vsel %vm570_vm0, %v1929_v58, 0.0 }
0x11b1   : > { %1934 = vadd.xlane.f32.xlu1 %v1933_v59 }
0x1236   : > { %v1932_v14 = vpop.xlane.xlu0 %1931 }
0x1237   : > { %v1936_v10 = vmul.f32 0.03125, %v1932_v14 }
0x1239   : > { %v1938_v17 = vadd.f32 1e-05, %v1936_v10 }
0x123a   : > { %v1935_v19 = vpop.xlane.xlu1 %1934 }
0x123b   : > { %3804 = vrsqrt.f32 %v1938_v17  ;;  %v1937_v20 = vmul.f32 0.03125, %v1935_v19 }
0x123d   : > { %v1939_v21 = vadd.f32 1e-05, %v1937_v20 }
0x123f   : > { %3806 = vrsqrt.f32 %v1939_v21 }
0x1248   : > { %v3805_v1 = vpop.eup %3804 }
0x1249   : > { %v1942_v23 = vmul.f32 %v3805_v1, %v1926_v49 }
0x124b   : > { %v1948_v29 = vmul.f32 %v1947_v11, %v1942_v23 }
0x124c   : > { %v3807_v27 = vpop.eup %3806 }
0x124d   : > { %v1943_v31 = vmul.f32 %v3807_v27, %v1927_v9  ;;  %v1954_v35 = vadd.f32 %v1953_v28, %v1948_v29 }
0x124f   : > { %v1949_v34 = vmul.f32 %v1947_v11, %v1943_v31 }
0x1251   : > { %v1955_v36 = vadd.f32 %v1953_v28, %v1949_v34 }
0x1253   : > { %v1993_v37 = vpack.c.bf16 %v1955_v36, %v1954_v35 }
0x1255   : > { %v1995_v41 = vrot.slane %v1993_v37, 6 }
0x1257   : > { %v4791_v43 = vsel %vm1082_vm3, 0, %v1995_v41  ;;  %v1998_v42 = vsel %vm1082_vm3, %v1995_v41, 0  ;;  %vm4919_vm3 = vmand %vm2471_vm14, %vm2472_vm15 }
0x1258   : > { %v2055_v46 = vrot.slane %v4791_v43, 4  ;;  %v2056_v0 = vrot.slane %v1998_v42, 4  ;;  %v2041_v47 = vrot.slane %v4791_v43, 3  ;;  %v2042_v49 = vrot.slane %v1998_v42, 3 }
0x1259   : > { %v2013_v51 = vrot.slane %v4791_v43, 1  ;;  %v2014_v53 = vrot.slane %v1998_v42, 1  ;;  %v1999_v55 = vshrl.u32 %v4791_v43, 16  ;;  %v2001_v9 = vshll.u32 %v4791_v43, 16 }
0x125a   : > { %v2057_v58 = vsel %vm1150_vm4, %v2055_v46, %v2056_v0  ;;  %v2043_v59 = vsel %vm1134_vm5, %v2041_v47, %v2042_v49  ;;  %v2005_v60 = vshll.u32 %v1998_v42, 16  ;;  %v2021_v61 = vshrl.u32 %v1998_v42, 16 }
0x125b   : > { %3520 = vmatmul.mubr.msk.bf16.vlgmr.msra.gmra.mxu0 %vm570_vm0, %v2057_v58  ;;  %2044 = vrot.lane.b32.xlu1 %v2043_v59, %s4083_s23  ;;  %v2032_v62 = vrot.slane %v1999_v55, 2  ;;  %v2033_v63 = vrot.slane %v2001_v9, 3  ;;  %v2046_v3 = vrot.slane %v1999_v55, 3  ;;  %v2047_v5 = vrot.slane %v2001_v9, 4 }
0x125c   : > { %v2035_v26 = vrot.slane %v2021_v61, 2  ;;  %v2036_v4 = vrot.slane %v2005_v60, 3  ;;  %v2049_v8 = vrot.slane %v2021_v61, 3  ;;  %3539 = vmatprep.mubr.msk.bf16.mxu0 %vm4079_vm1, %v4078_v15  ;;  %v2050_v12 = vrot.slane %v2005_v60, 4 }
0x125d   : > { %v2034_v2 = vor.u32 %v2033_v63, %v2032_v62  ;;  %v2003_v13 = vrot.slane %v2001_v9, 1  ;;  %v2015_v14 = vsel %vm1102_vm6, %v2013_v51, %v2014_v53  ;;  %v2018_v17 = vrot.slane %v1999_v55, 1  ;;  %v3736_v62 = vld [vmem:[%s5094_s8 + $0x60] sm:$0xff]   ;;  %v3737_v63 = vld [vmem:[%s5094_s8 + $0x58] sm:$0xff]  }
0x125e   : > { %v2037_v10 = vor.u32 %v2036_v4, %v2035_v26  ;;  %v2019_v19 = vrot.slane %v2001_v9, 2  ;;  %v2023_v21 = vrot.slane %v2021_v61, 1  ;;  %v2024_v1 = vrot.slane %v2005_v60, 2  ;;  %v3735_v61 = vld [vmem:[%s5094_s8 + $0x68] sm:$0xff]   ;;  %v3740_v4 = vld [vmem:[%s5094_s8 + $0x40] sm:$0xff]  }
0x125f   : > { %2016 = vrot.lane.b32.xlu1 %v2015_v14, %s4083_s23  ;;  %v2004_v20 = vor.u32 %v2003_v13, %v1999_v55  ;;  %v2048_v23 = vor.u32 %v2047_v5, %v2046_v3  ;;  %v2051_v27 = vor.u32 %v2050_v12, %v2049_v8  ;;  %v2007_v28 = vrot.slane %v2005_v60, 1  ;;  %v3734_v60 = vld [vmem:[%s5094_s8 + $0x70] sm:$0xff]   ;;  %v3739_v26 = vld [vmem:[%s5094_s8 + $0x48] sm:$0xff]  }
0x1260   : > { %v2038_v11 = vsel %vm1124_vm7, %v2034_v2, %v2037_v10  ;;  %v2020_v31 = vor.u32 %v2019_v19, %v2018_v17  ;;  %v2025_v18 = vor.u32 %v2024_v1, %v2023_v21  ;;  %v2029_v36 = vrot.slane %v4791_v43, 2  ;;  %v3738_v3 = vld [vmem:[%s5094_s8 + $0x50] sm:$0xff]  }
0x1261   : > { %2039 = vrot.lane.b32.xlu0 %v2038_v11, %s4087_s17  ;;  %v2008_v29 = vsel %vm1087_vm8, %v2004_v20, %v2007_v28  ;;  %v2052_v32 = vsel %vm1140_vm9, %v2048_v23, %v2051_v27  ;;  %v2030_v37 = vrot.slane %v1998_v42, 2  ;;  %v2076_v8 = vrot.slane %v4772_v22, %v4532_v54 }
0x1262   : > { %v2026_v34 = vsel %vm1108_vm10, %v2020_v31, %v2025_v18  ;;  %vm2586_vm4 = vcmask 392192  }
0x1263   : > { %2009 = vrot.lane.b32.xlu1 %v2008_v29, %s4087_s17  ;;  %v2031_v39 = vsel %vm1120_vm11, %v2029_v36, %v2030_v37 }
0x1265   : > { %2053 = vrot.lane.b32.xlu0 %v2052_v32, %s4081_s28 }
0x1267   : > { %2027 = vrot.lane.b32.xlu1 %v2026_v34, %s4081_s28 }
0x12cd   : > { %v2045_v35 = vpop.permute.xlu1 %2044 }
0x12d1   : > { %v2017_v38 = vpop.permute.xlu1 %2016 }
0x12d3   : > { %v2040_v41 = vpop.permute.xlu0 %2039 }
0x12d4   : > { %v2067_v45 = vsel %vm570_vm0, %v2031_v39, %v2040_v41 }
0x12d5   : > { %v2010_v46 = vpop.permute.xlu1 %2009  ;;  %v2069_v49 = vsel %vm1156_vm12, %v2067_v45, %v2045_v35 }
0x12d6   : > { %v2059_v0 = vsel %vm570_vm0, %v4791_v43, %v2010_v46  ;;  %v3733_v43 = vld [vmem:[%s5094_s8 + $0x78] sm:$0xff]  }
0x12d7   : > { %v2054_v47 = vpop.permute.xlu0 %2053  ;;  %v2061_v53 = vsel %vm1156_vm12, %v2059_v0, %v2017_v38  ;;  %3524 = vmatpush3.bf16.msra.mxu0 %v3733_v43 }
0x12d8   : > { %v2071_v51 = vsel %vm1159_vm13, %v2069_v49, %v2054_v47  ;;  %3525 = vmatprep.subr.bf16.mxu0 %v4078_v15  ;;  %v2309_v47 = vrot.slane %v4772_v22, %v4527_v50 }
0x12d9   : > { %2220 = vmatprep.mubr.bf16.mxu1 %v2071_v51  ;;  %v2028_v55 = vpop.permute.xlu1 %2027 }
0x12da   : > { %v2063_v42 = vsel %vm1159_vm13, %v2061_v53, %v2028_v55 }
0x12db   : > { %2221 = vmatmul.mubr.bf16.vlgmr.msra.gmra.mxu1 %v2063_v42  ;;  %3526 = vmatpush3.bf16.msra.mxu0 %v3734_v60 }
0x12dc   : > { %3555 = vmatprep.mubr.msk.bf16.mxu1 %vm4079_vm1, %v4078_v15  ;;  %3527 = vmatprep.subr.bf16.mxu0 %v4078_v15 }
0x12df   : > { %3528 = vmatpush3.bf16.msra.mxu0 %v3735_v61 }
0x12e0   : > { %3529 = vmatprep.subr.bf16.mxu0 %v4078_v15 }
0x12e3   : > { %3530 = vmatpush3.bf16.msra.mxu0 %v3736_v62 }
0x12e4   : > { %3531 = vmatprep.subr.bf16.mxu0 %v4078_v15 }
0x12e7   : > { %3532 = vmatpush3.bf16.msra.mxu0 %v3737_v63 }
0x12e8   : > { %3533 = vmatprep.subr.bf16.mxu0 %v4078_v15 }
0x12eb   : > { %3534 = vmatpush3.bf16.msra.mxu0 %v3738_v3 }
0x12ec   : > { %3535 = vmatprep.subr.bf16.mxu0 %v4078_v15 }
0x12ef   : > { %3536 = vmatpush3.bf16.msra.mxu0 %v3739_v26 }
0x12f0   : > { %3537 = vmatprep.subr.bf16.mxu0 %v4078_v15 }
0x12f3   : > { %3538 = vmatpush3.bf16.msra.mxu0 %v3740_v4 }
0x12f4   : > { %2744 = vmatprep.subr.bf16.mxu0 %v4085_v56 }
0x131b   : > { %v2263_v9 = vpop.f32.mrf.mxu0 }
0x131d   : > { %v3521_v57 = vpop.f32.mrf.mxu0 }
0x131f   : > { %v2266_v58 = vpop.f32.mrf.mxu0 }
0x1321   : > { %v3522_v59 = vpop.f32.mrf.mxu0 }
0x139b   : > { %v3379_v5 = vpop.f32.mrf.mxu1 }
0x139d   : > { %v3380_v2 = vpop.f32.mrf.mxu1 }
0x139e   : > { %v3381_v12 = vadd.f32 %v3380_v2, %v3379_v5 }
0x139f   : > { %v3382_v13 = vpop.f32.mrf.mxu1 }
0x13a0   : > { %v2223_v14 = vadd.f32 %v3381_v12, %v2076_v8  ;;  %v3741_v12 = vld [vmem:[%s5095_s9 + $0x28] sm:$0xff]  }
0x13a1   : > { %v3383_v10 = vpop.f32.mrf.mxu1  ;;  %3544 = vmatpush3.bf16.msra.mxu1 %v3741_v12 }
0x13a2   : > { %v2264_v17 = vadd.f32 %v2263_v9, %v2223_v14  ;;  %v3384_v19 = vadd.f32 %v3383_v10, %v3382_v13  ;;  %v3742_v13 = vld [vmem:[%s5095_s9 + $0x20] sm:$0xff]   ;;  %3545 = vmatprep.subr.bf16.mxu1 %v4078_v15  ;;  %v3743_v14 = vld [vmem:[%s5095_s9 + $0x18] sm:$0xff]   ;;  %v3744_v10 = vld [vmem:[%s5095_s9 + $0x10] sm:$0xff]  }
0x13a4   : > { %v2270_v20 = vmul.f32 %v2264_v17, %v2264_v17  ;;  %v2226_v21 = vadd.f32 %v3384_v19, %v2076_v8 }
0x13a5   : > { %3546 = vmatpush3.bf16.msra.mxu1 %v3742_v13 }
0x13a6   : > { %v2272_v1 = vmul.f32 %v2270_v20, %v2264_v17  ;;  %v2267_v11 = vadd.f32 %v2266_v58, %v2226_v21  ;;  %3547 = vmatprep.subr.bf16.mxu1 %v4078_v15 }
0x13a8   : > { %v2274_v23 = vmul.f32 0.044715, %v2272_v1  ;;  %v2271_v27 = vmul.f32 %v2267_v11, %v2267_v11 }
0x13a9   : > { %3548 = vmatpush3.bf16.msra.mxu1 %v3743_v14 }
0x13aa   : > { %v2276_v28 = vadd.f32 %v2274_v23, %v2264_v17  ;;  %v2273_v29 = vmul.f32 %v2271_v27, %v2267_v11  ;;  %3549 = vmatprep.subr.bf16.mxu1 %v4078_v15  ;;  %v2432_v27 = vrot.slane %v4772_v22, %v1405_v6  ;;  %v2445_v6 = vld [vmem:[%s4341_s16] sm:$0xff] }
0x13ac   : > { %v2278_v31 = vmul.f32 0.7978846, %v2276_v28  ;;  %v2275_v18 = vmul.f32 0.044715, %v2273_v29  ;;  %v2438_v29 = vrot.slane %v4772_v22, %v1173_v33 }
0x13ad   : > { %3550 = vmatpush3.bf16.msra.mxu1 %v3744_v10 }
0x13ae   : > { %3808 = vtanh.f32 %v2278_v31  ;;  %v2277_v32 = vadd.f32 %v2275_v18, %v2267_v11  ;;  %3551 = vmatprep.subr.bf16.mxu1 %v4078_v15 }
0x13b0   : > { %v2279_v34 = vmul.f32 0.7978846, %v2277_v32 }
0x13b2   : > { %3810 = vtanh.f32 %v2279_v34 }
0x13bb   : > { %v3809_v35 = vpop.eup %3808 }
0x13bc   : > { %v2282_v36 = vadd.f32 1.0, %v3809_v35 }
0x13be   : > { %v2284_v39 = vmul.f32 0.5, %v2282_v36 }
0x13bf   : > { %v3811_v37 = vpop.eup %3810 }
0x13c0   : > { %v2283_v38 = vadd.f32 1.0, %v3811_v37  ;;  %v2286_v45 = vmul.f32 %v2284_v39, %v2264_v17  ;;  %v3745_v17 = vld [vmem:[%s5095_s9 + $0x8] sm:$0xff]  }
0x13c1   : > { %3552 = vmatpush3.bf16.msra.mxu1 %v3745_v17  ;;  %v2446_v39 = vld [vmem:[%s4341_s16 + $0x8] sm:$0xff] }
0x13c2   : > { %v2285_v41 = vmul.f32 0.5, %v2283_v38  ;;  %3553 = vmatprep.subr.bf16.mxu1 %v4078_v15 }
0x13c4   : > { %v2287_v46 = vmul.f32 %v2285_v41, %v2267_v11 }
0x13c6   : > { %v2288_v0 = vpack.c.bf16 %v2287_v46, %v2286_v45  ;;  %v3746_v46 = vld [vmem:[%s5095_s9] sm:$0xff]  }
0x13c7   : > { %3554 = vmatpush3.bf16.msra.mxu1 %v3746_v46 }
0x13c8   : > { %3540 = vmatmul.mubr.bf16.vlgmr.msra.gmra.mxu0 %v2288_v0  ;;  %3559 = vmatprep.subr.mxu1 %v4078_v15 }
0x1488   : > { %v2392_v49 = vpop.f32.mrf.mxu0 }
0x1489   : > { %v2393_v51 = vadd.f32 %v2392_v49, %v2309_v47 }
0x148a   : > { %v3541_v53 = vpop.f32.mrf.mxu0 }
0x148b   : > { %v2399_v55 = vadd.f32 %v2393_v51, %v4720_v40 }
0x148c   : > { %v2395_v42 = vpop.f32.mrf.mxu0 }
0x148d   : > { %v2396_v9 = vadd.f32 %v2395_v42, %v2309_v47  ;;  %v2401_v57 = vmul.f32 %v2399_v55, %v4468_v7 }
0x148e   : > { %v3542_v58 = vpop.f32.mrf.mxu0 }
0x148f   : > { %v2400_v59 = vadd.f32 %v2396_v9, %v4726_v52  ;;  %v2403_v43 = vsel %vm570_vm0, %v2401_v57, 0.0 }
0x1490   : > { %2404 = vadd.xlane.f32.xlu0 %v2403_v43 }
0x1491   : > { %v2402_v60 = vmul.f32 %v2400_v59, %v4477_v16 }
0x1493   : > { %v2406_v61 = vsel %vm570_vm0, %v2402_v60, 0.0 }
0x1494   : > { %2407 = vadd.xlane.f32.xlu1 %v2406_v61 }
0x1519   : > { %v2405_v62 = vpop.xlane.xlu0 %2404 }
0x151a   : > { %v2409_v63 = vmul.f32 0.03125, %v2405_v62 }
0x151c   : > { %v2411_v3 = vsub.f32 %v2401_v57, %v2409_v63 }
0x151d   : > { %v2408_v26 = vpop.xlane.xlu1 %2407 }
0x151e   : > { %v2410_v40 = vmul.f32 0.03125, %v2408_v26  ;;  %v2413_v4 = vmul.f32 %v2411_v3, %v2411_v3 }
0x1520   : > { %v2412_v5 = vsub.f32 %v2402_v60, %v2410_v40  ;;  %v2415_v8 = vsel %vm570_vm0, %v2413_v4, 0.0 }
0x1521   : > { %2416 = vadd.xlane.f32.xlu0 %v2415_v8 }
0x1522   : > { %v2414_v2 = vmul.f32 %v2412_v5, %v2412_v5 }
0x1524   : > { %v2418_v52 = vsel %vm570_vm0, %v2414_v2, 0.0  ;;  %v2504_v2 = vrot.slane %v4772_v22, %v1528_v44 }
0x1525   : > { %2419 = vadd.xlane.f32.xlu0 %v2418_v52 }
0x15aa   : > { %v2417_v19 = vpop.xlane.xlu0 %2416 }
0x15ab   : > { %v2421_v20 = vmul.f32 0.03125, %v2417_v19 }
0x15ad   : > { %v2423_v21 = vadd.f32 1e-05, %v2421_v20 }
0x15ae   : > { %v2420_v1 = vpop.xlane.xlu0 %2419 }
0x15af   : > { %3812 = vrsqrt.f32 %v2423_v21  ;;  %v2422_v11 = vmul.f32 0.03125, %v2420_v1 }
0x15b1   : > { %v2424_v23 = vadd.f32 1e-05, %v2422_v11 }
0x15b3   : > { %3814 = vrsqrt.f32 %v2424_v23 }
0x15bc   : > { %v3813_v28 = vpop.eup %3812 }
0x15bd   : > { %v2427_v31 = vmul.f32 %v3813_v28, %v2411_v3 }
0x15bf   : > { %v2433_v18 = vmul.f32 %v2432_v27, %v2427_v31 }
0x15c0   : > { %v3815_v32 = vpop.eup %3814 }
0x15c1   : > { %v2428_v34 = vmul.f32 %v3815_v32, %v2412_v5  ;;  %v2439_v35 = vadd.f32 %v2438_v29, %v2433_v18 }
0x15c3   : > { %v2434_v36 = vmul.f32 %v2432_v27, %v2428_v34  ;;  %v2441_v37 = vmul.f32 %v2439_v35, %v4468_v7  ;;  %v3747_v35 = vld [vmem:[%s5096_s10 + $0x38] sm:$0xff]  }
0x15c4   : > { %2745 = vmatpush1.bf16.msra.mxu0 %v3747_v35 }
0x15c5   : > { %v2440_v38 = vadd.f32 %v2438_v29, %v2434_v36  ;;  %2443 = vst.msk [vmem:[%s4906_s14] sm:$0xff] %vm570_vm0, %v2441_v37  ;;  %v2447_v41 = vadd.f32 %v2445_v6, %v2441_v37  ;;  %v3748_v36 = vld [vmem:[%s5096_s10 + $0x30] sm:$0xff]   ;;  %2746 = vmatprep.subr.bf16.mxu0 %v4085_v56  ;;  %v3749_v37 = vld [vmem:[%s5096_s10 + $0x28] sm:$0xff]   ;;  %v3751_v6 = vld [vmem:[%s5096_s10 + $0x18] sm:$0xff]  }
0x15c7   : > { %v2442_v33 = vmul.f32 %v2440_v38, %v4477_v16  ;;  %v3750_v38 = vld [vmem:[%s5096_s10 + $0x20] sm:$0xff]  }
0x15c8   : > { %2747 = vmatpush1.bf16.msra.mxu0 %v3748_v36 }
0x15c9   : > { %v2448_v45 = vadd.f32 %v2446_v39, %v2442_v33  ;;  %2444 = vst.msk [vmem:[%s4906_s14 + $0x8] sm:$0xff] %vm570_vm0, %v2442_v33  ;;  %2748 = vmatprep.subr.bf16.mxu0 %v4085_v56  ;;  %v3752_v39 = vld [vmem:[%s5096_s10 + $0x10] sm:$0xff]   ;;  %v3753_v33 = vld [vmem:[%s5096_s10 + $0x8] sm:$0xff]  }
0x15cb   : > { %v2461_v0 = vpack.c.bf16 %v2448_v45, %v2447_v41  ;;  %v3754_v41 = vld [vmem:[%s5096_s10] sm:$0xff]  }
0x15cc   : > { %2749 = vmatpush1.bf16.msra.mxu0 %v3749_v37 }
0x15cd   : > { %v2463_v47 = vshrl.u32 %v2461_v0, 16  ;;  %v2466_v53 = vshll.u32 %v2461_v0, 16  ;;  %2750 = vmatprep.subr.bf16.mxu0 %v4085_v56 }
0x15cf   : > { %v2465_v51 = vrot.slane %v2463_v47, 7 }
0x15d0   : > { %2751 = vmatpush1.bf16.msra.mxu0 %v3750_v38 }
0x15d1   : > { %v2468_v55 = vor.u32 %v2466_v53, %v2465_v51  ;;  %v2475_v42 = vsel %vm4919_vm3, %v2465_v51, 0  ;;  %2752 = vmatprep.subr.bf16.mxu0 %v4085_v56 }
0x15d2   : > { %v2493_v58 = vrot.slane %v2475_v42, 1  ;;  %v2484_v43 = vshll.u32 %v2475_v42, 16 }
0x15d3   : > { %v2474_v9 = vsel %vm4919_vm3, 0, %v2468_v55  ;;  %v2617_v55 = vrot.slane %v4772_v22, %v1534_v48 }
0x15d4   : > { %v2492_v57 = vrot.slane %v2474_v9, 1  ;;  %v2479_v59 = vshll.u32 %v2474_v9, 16  ;;  %v2477_v61 = vshrl.u32 %v2474_v9, 16  ;;  %v2486_v3 = vrot.slane %v2484_v43, 1  ;;  %2753 = vmatpush1.bf16.msra.mxu0 %v3751_v6 }
0x15d5   : > { %2754 = vmatprep.subr.bf16.mxu0 %v4085_v56 }
0x15d6   : > { %v2494_v60 = vsel %vm1102_vm6, %v2492_v57, %v2493_v58  ;;  %v2481_v62 = vrot.slane %v2479_v59, 1 }
0x15d7   : > { %2495 = vrot.lane.b32.xlu1 %v2494_v60, %s4083_s23 }
0x15d8   : > { %v2482_v63 = vor.u32 %v2481_v62, %v2477_v61  ;;  %2755 = vmatpush1.bf16.msra.mxu0 %v3752_v39 }
0x15d9   : > { %2756 = vmatprep.subr.bf16.mxu0 %v4085_v56 }
0x15da   : > { %v2487_v26 = vsel %vm1087_vm8, %v2482_v63, %v2486_v3 }
0x15db   : > { %2488 = vrot.lane.b32.xlu0 %v2487_v26, %s4087_s17 }
0x15dc   : > { %2757 = vmatpush1.bf16.msra.mxu0 %v3753_v33 }
0x15dd   : > { %2758 = vmatprep.subr.bf16.mxu0 %v4085_v56 }
0x15e0   : > { %2759 = vmatpush1.bf16.msra.mxu0 %v3754_v41 }
0x15e1   : > { %2774 = vmatprep.subr.bf16.mxu0 %v4085_v56 }
0x15e4   : > { %2775 = vmatpush2.bf16.msra.mxu0 %v3755_v24 }
0x1649   : > { %v2496_v4 = vpop.permute.xlu1 %2495 }
0x164d   : > { %v2489_v40 = vpop.permute.xlu0 %2488 }
0x164e   : > { %v2498_v5 = vsel %vm570_vm0, %v2474_v9, %v2489_v40  ;;  %v4978_v9 = vld [vmem:[#allocation7 + $0x10] sm:$0xff] }
0x164f   : > { %v2500_v8 = vsel %vm1156_vm12, %v2498_v5, %v2496_v4  ;;  %v2623_v56 = vrot.slane %v4978_v9, %v4394_v25 }
0x1650   : > { %3556 = vmatmul.mubr.msk.bf16.vlgmr.msra.gmra.mxu1 %vm1159_vm13, %v2500_v8 }
0x1651   : > { %3563 = vmatprep.mubr.msk.f32.mxu1 %vm4079_vm1, %v4078_v15 }
0x1710   : > { %v2577_v52 = vpop.f32.mrf.mxu1 }
0x1711   : > { %v2578_v12 = vadd.f32 %v2577_v52, %v2504_v2 }
0x1712   : > { %v3557_v13 = vpop.f32.mrf.mxu1 }
0x1713   : > { %v2584_v14 = vmax.f32 %v2578_v12, 0.0 }
0x1714   : > { %v2580_v10 = vpop.f32.mrf.mxu1 }
0x1715   : > { %v2581_v17 = vadd.f32 %v2580_v10, %v2504_v2  ;;  %v2587_v19 = vsel %vm2586_vm4, %v2584_v14, 0.0 }
0x1716   : > { %2588 = vadd.xlane.f32.xlu1 %v2587_v19  ;;  %v3558_v20 = vpop.f32.mrf.mxu1 }
0x1717   : > { %v2585_v21 = vmax.f32 %v2581_v17, 0.0 }
0x1719   : > { %v2590_v1 = vsel %vm2586_vm4, %v2585_v21, 0.0 }
0x171a   : > { %2591 = vadd.xlane.f32.xlu0 %v2590_v1 }
0x179f   : > { %v2589_v11 = vpop.xlane.xlu1 %2588 }
0x17a0   : > { %v2594_v23 = vmul.f32 0.020833334, %v2589_v11 }
0x17a2   : > { %v2596_v27 = vsub.f32 %v2584_v14, %v2594_v23  ;;  %v2687_v23 = vrot.slane %v4978_v9, %v4401_v30 }
0x17a3   : > { %v2592_v28 = vpop.xlane.xlu0 %2591 }
0x17a4   : > { %v2595_v44 = vmul.f32 0.020833334, %v2592_v28  ;;  %v2598_v29 = vmul.f32 %v2596_v27, %v2596_v27 }
0x17a6   : > { %v2597_v31 = vsub.f32 %v2585_v21, %v2595_v44  ;;  %v2600_v18 = vsel %vm2586_vm4, %v2598_v29, 0.0 }
0x17a7   : > { %2601 = vadd.xlane.f32.xlu0 %v2600_v18 }
0x17a8   : > { %v2599_v32 = vmul.f32 %v2597_v31, %v2597_v31 }
0x17aa   : > { %v2603_v34 = vsel %vm2586_vm4, %v2599_v32, 0.0 }
0x17ab   : > { %2604 = vadd.xlane.f32.xlu1 %v2603_v34 }
0x1830   : > { %v2602_v45 = vpop.xlane.xlu0 %2601 }
0x1831   : > { %v2606_v46 = vmul.f32 0.020833334, %v2602_v45 }
0x1833   : > { %v2608_v0 = vadd.f32 1e-05, %v2606_v46 }
0x1834   : > { %v2605_v47 = vpop.xlane.xlu1 %2604 }
0x1835   : > { %3816 = vrsqrt.f32 %v2608_v0  ;;  %v2607_v51 = vmul.f32 0.020833334, %v2605_v47 }
0x1837   : > { %v2609_v53 = vadd.f32 1e-05, %v2607_v51 }
0x1839   : > { %3818 = vrsqrt.f32 %v2609_v53 }
0x1842   : > { %v3817_v42 = vpop.eup %3816 }
0x1843   : > { %v2612_v57 = vmul.f32 %v3817_v42, %v2596_v27 }
0x1845   : > { %v2618_v58 = vmul.f32 %v2617_v55, %v2612_v57 }
0x1846   : > { %v3819_v59 = vpop.eup %3818 }
0x1847   : > { %v2613_v43 = vmul.f32 %v3819_v59, %v2597_v31  ;;  %v2624_v61 = vadd.f32 %v2623_v56, %v2618_v58  ;;  %v2816_v59 = vrot.slane %v4978_v9, %v4527_v50 }
0x1849   : > { %v2619_v60 = vmul.f32 %v2617_v55, %v2613_v43  ;;  %v2626_v63 = vmul.f32 %v2624_v61, %v4468_v7 }
0x184b   : > { %v2625_v62 = vadd.f32 %v2623_v56, %v2619_v60 }
0x184d   : > { %v2627_v3 = vmul.f32 %v2625_v62, %v4477_v16  ;;  %v2822_v62 = vrot.slane %v4978_v9, %v4532_v54 }
0x184f   : > { %v2646_v48 = vpack.c.bf16 %v2627_v3, %v2626_v63 }
0x1851   : > { %v2648_v22 = vshrl.u32 %v2646_v48, 16  ;;  %v2651_v40 = vshll.u32 %v2646_v48, 16 }
0x1853   : > { %v2650_v26 = vrot.slane %v2648_v22, 7  ;;  %v2831_v22 = vrot.slane %v4978_v9, 4 }
0x1855   : > { %v2653_v4 = vor.u32 %v2651_v40, %v2650_v26  ;;  %v2657_v25 = vsel %vm4919_vm3, %v2650_v26, 0 }
0x1856   : > { %v2675_v2 = vrot.slane %v2657_v25, 1  ;;  %v2666_v12 = vshll.u32 %v2657_v25, 16 }
0x1857   : > { %v2656_v5 = vsel %vm4919_vm3, 0, %v2653_v4 }
0x1858   : > { %v2674_v8 = vrot.slane %v2656_v5, 1  ;;  %v2661_v52 = vshll.u32 %v2656_v5, 16  ;;  %v2659_v14 = vshrl.u32 %v2656_v5, 16  ;;  %v2668_v19 = vrot.slane %v2666_v12, 1 }
0x185a   : > { %v2676_v13 = vsel %vm1102_vm6, %v2674_v8, %v2675_v2  ;;  %v2663_v10 = vrot.slane %v2661_v52, 1 }
0x185b   : > { %2677 = vrot.lane.b32.xlu1 %v2676_v13, %s4081_s28  ;;  %s3300_s28 = sshll.u32 %s4178_s25, 8 }
0x185c   : > { %v2664_v17 = vor.u32 %v2663_v10, %v2659_v14  ;;  %s5020_s6 = scalar_lea.hbm %s5097_s11, %s3300_s28 }
0x185e   : > { %v2669_v20 = vsel %vm1087_vm8, %v2664_v17, %v2668_v19 }
0x185f   : > { %2670 = vrot.lane.b32.xlu0 %v2669_v20, %s4084_s19 }
0x18cd   : > { %v2678_v21 = vpop.permute.xlu1 %2677 }
0x18ce   : > { %3286 = vmatprep.mubr.msk.bf16.mxu0 %vm681_vm2, %v2678_v21 }
0x18d1   : > { %v2671_v49 = vpop.permute.xlu0 %2670 }
0x18d2   : > { %v2680_v1 = vsel %vm2586_vm4, %v2656_v5, %v2671_v49 }
0x18d3   : > { %v2682_v11 = vsel %vm1159_vm13, %v2680_v1, %v2678_v21 }
0x18d4   : > { %2777 = vmatmul.mubr.bf16.vlgmr.msra.gmra.mxu0 %v2682_v11 }
0x1994   : > { %v2778_v27 = vpop.f32.mrf.mxu0 }
0x1995   : > { %v2779_v28 = vadd.f32 %v2778_v27, %v2687_v23 }
0x1996   : > { %v2780_v44 = vpop.f32.mrf.mxu0 }
0x1997   : > { %v2785_v29 = vmax.f32 %v2779_v28, 0.0 }
0x1998   : > { %v2781_v31 = vpop.f32.mrf.mxu0 }
0x1999   : > { %v2782_v18 = vadd.f32 %v2781_v31, %v2687_v23  ;;  %v2787_v32 = vsel %vm2586_vm4, %v2785_v29, 0.0 }
0x199a   : > { %v2783_v34 = vpop.f32.mrf.mxu0  ;;  %2788 = vadd.xlane.f32.xlu0 %v2787_v32 }
0x199b   : > { %v2786_v35 = vmax.f32 %v2782_v18, 0.0 }
0x199d   : > { %v2790_v36 = vsel %vm2586_vm4, %v2786_v35, 0.0 }
0x199e   : > { %2791 = vadd.xlane.f32.xlu1 %v2790_v36 }
0x1a23   : > { %v2789_v37 = vpop.xlane.xlu0 %2788 }
0x1a24   : > { %v2793_v38 = vmul.f32 0.020833334, %v2789_v37 }
0x1a26   : > { %v2795_v6 = vsub.f32 %v2785_v29, %v2793_v38 }
0x1a27   : > { %v2792_v39 = vpop.xlane.xlu1 %2791 }
0x1a28   : > { %v2794_v33 = vmul.f32 0.020833334, %v2792_v39  ;;  %v2797_v30 = vmul.f32 %v2795_v6, %v2795_v6 }
0x1a2a   : > { %v2796_v41 = vsub.f32 %v2786_v35, %v2794_v33  ;;  %v2799_v45 = vsel %vm2586_vm4, %v2797_v30, 0.0 }
0x1a2b   : > { %2800 = vadd.xlane.f32.xlu1 %v2799_v45 }
0x1a2c   : > { %v2798_v46 = vmul.f32 %v2796_v41, %v2796_v41 }
0x1a2e   : > { %v2802_v0 = vsel %vm2586_vm4, %v2798_v46, 0.0 }
0x1a2f   : > { %2803 = vadd.xlane.f32.xlu0 %v2802_v0 }
0x1a45   : > { %2829 = vperm.xlu0 %3680, %v4978_v9  }
0x1ab4   : > { %v2801_v47 = vpop.xlane.xlu1 %2800 }
0x1ab5   : > { %v2805_v51 = vmul.f32 0.020833334, %v2801_v47 }
0x1ab7   : > { %v2807_v53 = vadd.f32 1e-05, %v2805_v51 }
0x1ab8   : > { %v2804_v55 = vpop.xlane.xlu0 %2803 }
0x1ab9   : > { %3820 = vrsqrt.f32 %v2807_v53  ;;  %v2806_v42 = vmul.f32 0.020833334, %v2804_v55 }
0x1abb   : > { %v2808_v57 = vadd.f32 1e-05, %v2806_v42 }
0x1abd   : > { %3822 = vrsqrt.f32 %v2808_v57 }
0x1ac6   : > { %v3821_v58 = vpop.eup %3820 }
0x1ac7   : > { %v2811_v56 = vmul.f32 %v3821_v58, %v2795_v6 }
0x1ac9   : > { %v2817_v63 = vmul.f32 %v2816_v59, %v2811_v56 }
0x1aca   : > { %v3823_v43 = vpop.eup %3822 }
0x1acb   : > { %v2812_v60 = vmul.f32 %v3823_v43, %v2796_v41  ;;  %v2823_v48 = vadd.f32 %v2822_v62, %v2817_v63 }
0x1acd   : > { %v2818_v61 = vmul.f32 %v2816_v59, %v2812_v60  ;;  %v2825_v50 = vmul.f32 %v2823_v48, %v4468_v7 }
0x1acf   : > { %v2824_v3 = vadd.f32 %v2822_v62, %v2818_v61 }
0x1ad1   : > { %v2826_v24 = vmul.f32 %v2824_v3, %v4477_v16 }
0x1ad3   : > { %3560 = vmatpush3.xpose.msk.msra.mxu1 %vm2586_vm4, %v2826_v24 }
0x1ad4   : > { %3561 = vmatprep.subr.mxu1 %v4078_v15 }
0x1ad7   : > { %3562 = vmatpush3.xpose.msk.msra.mxu1 %vm2586_vm4, %v2825_v50 }
0x1ada   : > { %3564 = vmatmul.mubr.msk.f32.vlgmr.msra.gmra.mxu1 %vm2586_vm4, %v2831_v22 }
0x1adb   : > { %3974 = shalt.err (!%p3971_p6)
}
0x1adc   : > { %s3975_s14 = scalar_lea.hbm %s5020_s6, 256  ;;  %s3979_s16 = scalar_lea.hbm %s5097_s11, 512 }
0x1add   : > { %p3976_p8 = scmp.ne.s32.totalorder %s5020_s6, %s3975_s14  ;;  %p3980_p3 = scmp.lt.s32.totalorder %s5020_s6, %s5097_s11 }
0x1ade   : > { %p3981_p12 = scmp.lt.s32.totalorder %s3979_s16, %s3975_s14 }
0x1adf   : > { %p3977_p2 = pnand %p3976_p8, %p5144_p10 }
0x1ae0   : > { %p3982_p0 = por %p3981_p12, %p3980_p3 }
0x1ae1   : > { %p3978_p7 = pneg %p3977_p2 }
0x1ae3   : > { %p3983_p5 = pnand %p3982_p0, %p3978_p7 }
0x1ae5   : > { %3986 = shalt.err (!%p3983_p5)
}
0x1ae6   : > { %s4089_s18 = smov 128   ;;  %s4090_s28 = smov 8   ;;  %v2830_v15 = vpop.permute.xlu0 %2829  ;;  %vm2917_vm0 = vcmask 122880  }
0x1ae7   : > { %3582 = dma.vmem_to_hbm [thread:$0]  (%p5144_p10), %s5023_s30, 256, %s5020_s6, %s2920_s5, %s4089_s18, %s4089_s18, %s4090_s28   ;;  %v2832_v7 = vrot.slane %v2830_v15, 5 }
0x1ae8   : > { %s5145_s19 = scalar_lea.vmem [#allocation5], %s4335_s21  ;;  %s3294_s27 = sshll.u32 %s4178_s25, 4 }
0x1ae9   : > { %v3826_v26 = vld [vmem:[%s5145_s19] sm:$0x1]  ;;  %s548_s29 = scalar_lea.vmem [#allocation12], %s4335_s21  ;;  %s2951_s5 = scalar_lea.hbm %s5098_s12, %s3294_s27 }
0x1aea   : > { %s2953_s26 = sshll.u32 %s548_s29, 4  ;;  %s2925_s13 = scalar_lea.sflag [#allocation13], %s4335_s21  ;;  %s2954_s26 = int_to_ptr.vmem [resolvable:$true] %s2953_s26 }
0x1aeb   : > { %s3987_s4 = scalar_lea.vmem %s2954_s26, 16  ;;  %s4091_s14 = smov [#allocation12]  }
0x1aec   : > { %p3988_p11 = scmp.ne.s32.totalorder %s2954_s26, %s3987_s4  ;;  %s3991_s15 = sshll.u32 %s4091_s14, 4  ;;  %s3992_s15 = int_to_ptr.vmem [resolvable:$false] %s3991_s15 }
0x1aed   : > { %s3993_s25 = scalar_lea.vmem %s3992_s15, 32  ;;  %p3994_p1 = scmp.lt.s32.totalorder %s2954_s26, %s3992_s15 }
0x1aee   : > { %p3989_p9 = pnand %p3988_p11, %p5144_p10  ;;  %p3995_p4 = scmp.lt.s32.totalorder %s3993_s25, %s3987_s4 }
0x1af0   : > { %p3990_p13 = pneg %p3989_p9  ;;  %p3996_p6 = por %p3995_p4, %p3994_p1 }
0x1af2   : > { %p3997_p8 = pnand %p3996_p6, %p3990_p13 }
0x1b9a   : > { %v2908_v16 = vpop.f32.mrf.mxu1 }
0x1b9b   : > { %v2909_v54 = vadd.f32 %v2908_v16, %v2832_v7 }
0x1b9c   : > { %v3565_v9 = vpop.f32.mrf.mxu1 }
0x1b9d   : > { %v2912_v40 = vmul.f32 %v3826_v26, %v2909_v54 }
0x1b9f   : > { %v2913_v4 = vmul.f32 1.442695, %v2912_v40 }
0x1ba1   : > { %3824 = vpow2.f32 %v2913_v4 }
0x1bae   : > { %v3825_v25 = vpop.eup %3824 }
0x1baf   : > { %v3290_v5 = vadd.f32 -1.0, %v3825_v25 }
0x1bb1   : > { %v2916_v8 = vmax.f32 %v3290_v5, 0.0 }
0x1bb3   : > { %2918 = vst.msk [vmem:[%s548_s29] sm:$0x1] %vm2917_vm0, %v2916_v8 }
0x1bb4   : > { %4000 = shalt.err (!%p3997_p8)
}
0x1bb5   : > { %s4001_s1 = scalar_lea.hbm %s2951_s5, 16  ;;  %s4005_s23 = scalar_lea.hbm %s5098_s12, 32 }
0x1bb6   : > { %p4002_p2 = scmp.ne.s32.totalorder %s2951_s5, %s4001_s1  ;;  %p4006_p12 = scmp.lt.s32.totalorder %s2951_s5, %s5098_s12 }
0x1bb7   : > { %p4007_p0 = scmp.lt.s32.totalorder %s4005_s23, %s4001_s1 }
0x1bb8   : > { %p4003_p7 = pnand %p4002_p2, %p5144_p10 }
0x1bb9   : > { %p4008_p5 = por %p4007_p0, %p4006_p12 }
0x1bba   : > { %p4004_p3 = pneg %p4003_p7 }
0x1bbc   : > { %p4009_p11 = pnand %p4008_p5, %p4004_p3 }
0x1bbe   : > { %4012 = shalt.err (!%p4009_p11)
}
0x1bbf   : > { %3583 = dma.vmem_to_hbm [thread:$0]  (%p5144_p10), %s2954_s26, 16, %s2951_s5, %s2925_s13  }
0x1bc0 PF: > { %s5146_s28 = sld [smem:[#allocation20_spill]]  ;;  %p5149_p13 = scmp.ge.s32.totalorder %s4067_s24, 2 }
0x1bc1   : > { %s5147_s19 = sld [smem:[#allocation22_spill]] }
0x1bc6   : > { %s2965_s27 = sand.u32 1, %s5146_s28  }
0x1bc7   : > { %p5148_p9 = scmp.ne.s32.totalorder %s5147_s19, 0  ;;  %s2966_s29 = scalar_lea.sflag [#allocation4], %s2965_s27 }
0x1bc9   : > { %p3604_p1 = pnand %p5149_p13, %p5148_p9 }
0x1bcb   : > { %p3605_p4 = pneg %p3604_p1 }
0x1bcd   : > { %4046 = dma.done.wait (%p3605_p4), %s2966_s29, 256  }
0x1bce   : > { %4048 = vsyncadd (%p3605_p4), %s2966_s29, 4294967040  ;;  %s2975_s6 = scalar_lea.sflag [#allocation13], %s2965_s27 }
0x1bcf   : > { %4050 = dma.done.wait (%p3605_p4), %s2975_s6, 16  }
0x1bd0   : > { %4052 = vsyncadd (%p3605_p4), %s2975_s6, 4294967280  ;;  %s5150_s24 = sld [smem:[#allocation23_spill]]  ;;  %s5153_s21 = smov %s4059_s22 }
0x1bd1   : > { %s5151_s30 = sld [smem:[#allocation21_spill]] }
0x1bd2   : > { %s5152_s23 = sld [smem:[#allocation24_spill]] }
0x1bd6   : > { %p33_p10 = scmp.ge.s32.totalorder %s5150_s24, 4  }
0x1bd7   : > { %s5154_s22 = smov %s5151_s30 }
0x1bd8   :  { %35 = sbr.rel (!%p33_p10) target bundleno = 15 (0xf), region = 161 }
0x1bdd   :  { %2979 = vsyncpa [#allocation3], 1 }
0x1bde   :  { %2981 = vsyncpa [#allocation3 + $0x1], 1 }
0x1bdf   :  { %2982 = vsyncpa [#allocation6], 1 }
0x1be0   :  { %2984 = vsyncpa [#allocation6 + $0x1], 1 }
0x1be1   :  { %2985 = vsyncpa [#allocation9], 1 }
0x1be2   :  { %2986 = vsyncpa [#allocation4], 1 }
0x1be3   :  { %2988 = vsyncpa [#allocation4 + $0x1], 1 }
0x1be4   :  { %2989 = vsyncpa [#allocation13], 1 }
0x1be5   :  { %2991 = vsyncpa [#allocation13 + $0x1], 1 }

</bundles_post_ra>
